<compile_context>
chip_gen: v5e
topology: v5e:2x2
jax: 0.10.0
libtpu: 0.0.40
codegen_flags: <defaults>
</compile_context>

<pallas_src>
import functools
import jax
import jax.numpy as jnp
from jax.experimental import pallas as pl
from jax.experimental.pallas import tpu as pltpu

EPS = 1.1920929e-07   # torch.finfo(torch.float32).eps, the F.rms_norm default
NEG_BIG = -1e30       # finite mask value (exp underflows to exactly 0)


def _rmsnorm(x):
    # F.rms_norm over the last dim, no learned weight.
    ms = jnp.mean(x * x, axis=-1, keepdims=True)
    return x * jax.lax.rsqrt(ms + EPS)


def block_kernel(x_ref, wattn_ref, wprojh_ref, wfc_ref, wproj2_ref,
                 cos_ref, sin_ref, o_ref,
                 q_scr, k_scr, v_scr,
                 *, n_head, head_dim, tq):
    T = x_ref.shape[1]
    C = x_ref.shape[2]
    hd = head_dim
    d2 = hd // 2
    scale = 1.0 / (hd ** 0.5)
    bf16 = jnp.bfloat16
    qi = pl.program_id(1)

    # ---------------- once per batch element: cache per-head Q/K/V -----------
    # Chunked over rows so only a (tq, 3C) f32 QKV temp is live at any time.
    @pl.when(qi == 0)
    def _init_qkv():
        n_chunks = T // tq

        def chunk_body(c, carry):
            r0 = pl.multiple_of(c * tq, tq)
            cos_c = cos_ref[pl.ds(r0, tq), :]       # (tq, hd) = [cos | cos]
            sin_c = sin_ref[pl.ds(r0, tq), :]       # (tq, hd) = [sin | -sin]

            def rope(t):
                # rotate-half with one static concat; the sign is folded in sin.
                rot = jnp.concatenate([t[:, d2:], t[:, :d2]], axis=-1)
                return t * cos_c + rot * sin_c

            xf = x_ref[0, pl.ds(r0, tq), :]                      # (tq, C) f32
            hf = _rmsnorm(xf).astype(bf16)
            qkv = jnp.dot(hf, wattn_ref[...],                    # K=C, N=3C GEMM
                          preferred_element_type=jnp.float32)    # (tq, 3C) f32

            # TODO(synk): apply RoPE slab-wide with (tq, C) cos/sin tables on the
            # whole Q/K slabs instead of per head inside this loop.
            for h in range(n_head):          # static -> static lane slices
                lo = h * hd
                qh = qkv[:, lo:lo + hd]
                kh = qkv[:, C + lo:C + lo + hd]
                vh = qkv[:, 2 * C + lo:2 * C + lo + hd]
                # 1/sqrt(hd) folded into Q so the hot path never scales scores.
                q_scr[h, pl.ds(r0, tq), :] = (
                    _rmsnorm(rope(qh)) * scale).astype(bf16)
                k_scr[h, pl.ds(r0, tq), :] = _rmsnorm(rope(kh)).astype(bf16)
                v_scr[h, pl.ds(r0, tq), :] = vh.astype(bf16)
            return carry

        jax.lax.fori_loop(0, n_chunks, chunk_body, 0)

    # ---------------- per query tile: causal flash attention -----------------
    start = pl.multiple_of(qi * tq, tq)
    x_q = x_ref[0, pl.ds(start, tq), :]                           # (tq, C) f32

    # Only the diagonal kv block needs masking; earlier blocks are all-visible.
    diag_mask = (jax.lax.broadcasted_iota(jnp.int32, (tq, tq), 0) >=
                 jax.lax.broadcasted_iota(jnp.int32, (tq, tq), 1))
    n_kv = qi + 1                                   # causal: kv blocks [0, qi]

    def head_body(h, attn_acc):
        q_h = q_scr[h, pl.ds(start, tq), :]         # (tq, hd) bf16 (pre-scaled)

        def kv_body(j, carry):
            m, l, acc = carry
            k0 = pl.multiple_of(j * tq, tq)
            k_b = k_scr[h, pl.ds(k0, tq), :]        # (tq, hd) bf16
            v_b = v_scr[h, pl.ds(k0, tq), :]        # (tq, hd) bf16
            # Q . K^T with K kept in (T, hd) layout (no transpose materialized).
            s = jax.lax.dot_general(
                q_h, k_b, (((1,), (1,)), ((), ())),
                preferred_element_type=jnp.float32)               # (tq, tq)
            s = jnp.where(jnp.logical_or(j < qi, diag_mask), s, NEG_BIG)
            m_new = jnp.maximum(m, jnp.max(s, axis=-1, keepdims=True))
            alpha = jnp.exp(m - m_new)
            p = jnp.exp(s - m_new)
            l_new = alpha * l + jnp.sum(p, axis=-1, keepdims=True)
            acc_new = alpha * acc + jnp.dot(
                p.astype(bf16), v_b, preferred_element_type=jnp.float32)
            return m_new, l_new, acc_new

        m0 = jnp.full((tq, 1), NEG_BIG, jnp.float32)
        l0 = jnp.zeros((tq, 1), jnp.float32)
        a0 = jnp.zeros((tq, hd), jnp.float32)
        m, l, acc = jax.lax.fori_loop(0, n_kv, kv_body, (m0, l0, a0))

        y_h = acc * pl.reciprocal(l, approx=True)                 # (tq, hd) f32
        # Output projection folded in per head (no (tq, C) head-output scratch,
        # no 64-lane masked column stores).
        # TODO(synk): process two heads per iteration so this GEMM has K=2*hd
        # (better fill of the 256-wide MXU on v6e/v7x).
        return attn_acc + jnp.dot(y_h.astype(bf16), wprojh_ref[h],
                                  preferred_element_type=jnp.float32)

    attn = jax.lax.fori_loop(0, n_head, head_body,
                             jnp.zeros((tq, C), jnp.float32))
    x1 = x_q + attn

    # ---------------- per query tile: MLP ------------------------------------
    h2 = _rmsnorm(x1).astype(bf16)
    ff = jnp.dot(h2, wfc_ref[...], preferred_element_type=jnp.float32)
    ff = jnp.square(jnp.maximum(ff, 0.0)).astype(bf16)
    mlp = jnp.dot(ff, wproj2_ref[...], preferred_element_type=jnp.float32)

    o_ref[0] = x1 + mlp


def block_forward(x, w_attn, w_proj, w_fc, w_proj2, *, n_head):
    """x: (B, T, C) f32.  Weights are in PyTorch (out, in) layout."""
    B, T, C = x.shape
    assert C % n_head == 0
    hd = C // n_head
    assert hd % 2 == 0

    # Query/kv tile size (= M of the per-tile GEMMs). 256 matches the 256-row
    # MXU on v6e/v7x; fall back to 128 (v5e MXU height) or the whole sequence.
    if T % 256 == 0:
        tq = 256
    elif T % 128 == 0:
        tq = 128
    else:
        tq = T
    n_qt = T // tq

    # Rotary tables at full head width with the rotation sign folded into sin.
    inv_freq = 1.0 / (10000.0 ** (jnp.arange(0, hd, 2, dtype=jnp.float32) / hd))
    freqs = jnp.outer(jnp.arange(T, dtype=jnp.float32), inv_freq)   # (T, hd/2)
    cos_f = jnp.concatenate([jnp.cos(freqs), jnp.cos(freqs)], axis=1)
    sin_f = jnp.concatenate([jnp.sin(freqs), -jnp.sin(freqs)], axis=1)

    # Pre-transpose to (in, out) and cast to bf16 for the MXU.  w_proj is split
    # per head so the kernel can index its head block on the leading dim.
    bf16 = jnp.bfloat16
    wattn_t = w_attn.T.astype(bf16)                        # (C, 3C)
    wproj_h = w_proj.T.astype(bf16).reshape(n_head, hd, C)  # (n_head, hd, C)
    wfc_t = w_fc.T.astype(bf16)                            # (C, 4C)
    wproj2_t = w_proj2.T.astype(bf16)                      # (4C, C)

    kernel = functools.partial(block_kernel, n_head=n_head, head_dim=hd, tq=tq)

    try:
        vmem_cap = int(pltpu.get_tpu_info().vmem_capacity_bytes)
    except Exception:
        vmem_cap = 64 * 1024 * 1024        # conservative: v7x per-core VMEM

    def build(single_buffer_consts):
        wbuf = 1 if single_buffer_consts else 2
        # Footprint estimate: weights, double-buffered x/out blocks, bf16 Q/K/V
        # scratch, f32 temps (QKV chunk, score block, MLP hidden) + headroom.
        demand = (wbuf * 2 * 12 * C * C
                  + 2 * 4 * (T * C + tq * C)
                  + 3 * 2 * n_head * T * hd
                  + 4 * (12 * tq * C + 2 * tq * tq + 24 * tq * C))
        vmem_limit = int(min(max(demand * 5 // 4, 32 * 1024 * 1024),
                             int(vmem_cap * 0.9)))

        def const_spec(shape):
            n = len(shape)
            idx = lambda b, q: (0,) * n
            if single_buffer_consts:
                # Constant index_map => block is never re-fetched; one VMEM
                # buffer is enough (halves resident weight VMEM).
                return pl.BlockSpec(shape, idx, pipeline_mode=pl.Buffered(1))
            return pl.BlockSpec(shape, idx)

        return pl.pallas_call(
            kernel,
            out_shape=jax.ShapeDtypeStruct((B, T, C), jnp.float32),
            grid_spec=pltpu.PrefetchScalarGridSpec(
                num_scalar_prefetch=0,
                grid=(B, n_qt),
                in_specs=[
                    pl.BlockSpec((1, T, C), lambda b, q: (b, 0, 0)),  # full seq
                    const_spec(wattn_t.shape),
                    const_spec(wproj_h.shape),
                    const_spec(wfc_t.shape),
                    const_spec(wproj2_t.shape),
                    const_spec(cos_f.shape),
                    const_spec(sin_f.shape),
                ],
                out_specs=pl.BlockSpec((1, tq, C), lambda b, q: (b, q, 0)),
                # TODO(synk): for very long T on v7x, keep K/V scratch in HBM
                # (memory_space=pl.ANY) and double-buffer per kv block with
                # pltpu.make_async_copy instead of full-sequence VMEM scratch.
                scratch_shapes=[
                    pltpu.VMEM((n_head, T, hd), bf16),   # Q (rope+rmsnorm)*scale
                    pltpu.VMEM((n_head, T, hd), bf16),   # K (rope+rmsnorm)
                    pltpu.VMEM((n_head, T, hd), bf16),   # V
                ],
            ),
            # The q axis must stay "arbitrary": the qi==0 Q/K/V caching relies
            # on sequential query tiles within one batch element.
            # TODO(synk): for B == 1 on v7x, split the QKV init into its own
            # pallas_call so the q axis can be marked "parallel" across cores.
            compiler_params=pltpu.CompilerParams(
                dimension_semantics=("parallel", "arbitrary"),
                vmem_limit_bytes=vmem_limit),
        )

    args = (x, wattn_t, wproj_h, wfc_t, wproj2_t, cos_f, sin_f)
    try:
        return build(True)(*args)
    except Exception:
        # pl.Buffered(1) rejected by this jax build -> default double buffering.
        return build(False)(*args)


# ---------------- pure-JAX reference (for a sanity check) ----------------
def block_reference(x, w_attn, w_proj, w_fc, w_proj2, *, n_head):
    B, T, C = x.shape
    hd = C // n_head
    d2 = hd // 2

    inv_freq = 1.0 / (10000.0 ** (jnp.arange(0, hd, 2, dtype=jnp.float32) / hd))
    freqs = jnp.outer(jnp.arange(T, dtype=jnp.float32), inv_freq)
    cos = jnp.cos(freqs)[None, :, None, :]
    sin = jnp.sin(freqs)[None, :, None, :]

    h = _rmsnorm(x)
    qkv = h @ w_attn.T
    q, k, v = jnp.split(qkv, 3, axis=-1)
    q = q.reshape(B, T, n_head, hd)
    k = k.reshape(B, T, n_head, hd)
    v = v.reshape(B, T, n_head, hd)

    def rope(t):
        t1, t2 = t[..., :d2], t[..., d2:]
        return jnp.concatenate([t1 * cos + t2 * sin, -t1 * sin + t2 * cos], axis=-1)

    q = _rmsnorm(rope(q))
    k = _rmsnorm(rope(k))

    qh, kh, vh = (a.transpose(0, 2, 1, 3) for a in (q, k, v))
    s = jnp.einsum('bhqd,bhkd->bhqk', qh, kh) / jnp.sqrt(jnp.float32(hd))
    mask = jnp.tril(jnp.ones((T, T), bool))
    s = jnp.where(mask, s, -jnp.inf)
    p = jax.nn.softmax(s, axis=-1)
    y = jnp.einsum('bhqk,bhkd->bhqd', p, vh).transpose(0, 2, 1, 3).reshape(B, T, C)
    x1 = x + y @ w_proj.T

    h2 = _rmsnorm(x1)
    ff = jnp.square(jnp.maximum(h2 @ w_fc.T, 0.0))
    return x1 + ff @ w_proj2.T


if __name__ == "__main__":
    B, T, C, n_head = 2, 16, 64, 4

    key = jax.random.PRNGKey(0)
    kx, k1, k2, k3, k4 = jax.random.split(key, 5)
    x = jax.random.normal(kx, (B, T, C), dtype=jnp.float32)

    # PyTorch Linear weight shapes (out_features, in_features).
    # The module zero-inits c_proj weights; use small random values instead so
    # the kernel compute path is actually exercised.
    scale = 0.02
    w_attn = scale * jax.random.normal(k1, (3 * C, C), dtype=jnp.float32)
    w_proj = scale * jax.random.normal(k2, (C, C), dtype=jnp.float32)
    w_fc = scale * jax.random.normal(k3, (4 * C, C), dtype=jnp.float32)
    w_proj2 = scale * jax.random.normal(k4, (C, 4 * C), dtype=jnp.float32)

    out = jax.block_until_ready(
        block_forward(x, w_attn, w_proj, w_fc, w_proj2, n_head=n_head))
    ref = jax.block_until_ready(
        block_reference(x, w_attn, w_proj, w_fc, w_proj2, n_head=n_head))

    assert out.shape == (B, T, C)
    assert bool(jnp.all(jnp.isfinite(out)))
    max_diff = float(jnp.max(jnp.abs(out - ref)))
    # bf16 matmul operands + approx reciprocal vs f32 reference: ~1e-2 tolerance.
    assert bool(jnp.allclose(out, ref, atol=1e-2, rtol=1e-2)), (
        f"max abs diff = {max_diff}")

    print("KERNEL_OK")
</pallas_src>

<mosaic_0001>
module attributes {stable_mosaic.version = 11 : i64} {
  func.func @block_kernel(%arg0: i32, %arg1: i32, %arg2: memref<1x16x64xf32, #tpu.memory_space<vmem>>, %arg3: memref<64x192xbf16, #tpu.memory_space<vmem>>, %arg4: memref<4x16x64xbf16, #tpu.memory_space<vmem>>, %arg5: memref<64x256xbf16, #tpu.memory_space<vmem>>, %arg6: memref<256x64xbf16, #tpu.memory_space<vmem>>, %arg7: memref<16x16xf32, #tpu.memory_space<vmem>>, %arg8: memref<16x16xf32, #tpu.memory_space<vmem>>, %arg9: memref<1x16x64xf32, #tpu.memory_space<vmem>>, %arg10: memref<4x16x16xbf16, #tpu.memory_space<vmem>>, %arg11: memref<4x16x16xbf16, #tpu.memory_space<vmem>>, %arg12: memref<4x16x16xbf16, #tpu.memory_space<vmem>>) attributes {dimension_semantics = [#tpu.dimension_semantics<parallel>, #tpu.dimension_semantics<arbitrary>], iteration_bounds = array<i64: 2, 1>, scalar_prefetch = 0 : i64, scratch_operands = 3 : i64, tpu.core_type = #tpu.core_type<tc>, window_params = [{transform_indices = @transform_0, window_bounds = array<i64: 1, 16, 64>}, {pipeline_mode = #tpu.pipeline_mode<synchronous>, transform_indices = @transform_1, window_bounds = array<i64: 64, 192>}, {pipeline_mode = #tpu.pipeline_mode<synchronous>, transform_indices = @transform_2, window_bounds = array<i64: 4, 16, 64>}, {pipeline_mode = #tpu.pipeline_mode<synchronous>, transform_indices = @transform_3, window_bounds = array<i64: 64, 256>}, {pipeline_mode = #tpu.pipeline_mode<synchronous>, transform_indices = @transform_4, window_bounds = array<i64: 256, 64>}, {pipeline_mode = #tpu.pipeline_mode<synchronous>, transform_indices = @transform_5, window_bounds = array<i64: 16, 16>}, {pipeline_mode = #tpu.pipeline_mode<synchronous>, transform_indices = @transform_6, window_bounds = array<i64: 16, 16>}, {transform_indices = @transform_7, window_bounds = array<i64: 1, 16, 64>}]} {
    %c0_i32 = arith.constant 0 : i32
    %0 = arith.cmpi eq, %arg1, %c0_i32 : i32
    %1 = arith.extui %0 : i1 to i32
    %c0_i32_0 = arith.constant 0 : i32
    %2 = arith.cmpi ne, %1, %c0_i32_0 : i32
    scf.if %2 {
      %c0_i32_18 = arith.constant 0 : i32
      %c16_i32_19 = arith.constant 16 : i32
      %39 = arith.muli %c0_i32_18, %c16_i32_19 : i32
      %40 = tpu.assume_multiple %39, 16 : i32
      %41 = arith.index_cast %40 : i32 to index
      %c0_20 = arith.constant 0 : index
      %42 = vector.load %arg7[%41, %c0_20] : memref<16x16xf32, #tpu.memory_space<vmem>>, vector<16x16xf32>
      %43 = arith.index_cast %40 : i32 to index
      %c0_21 = arith.constant 0 : index
      %44 = vector.load %arg8[%43, %c0_21] : memref<16x16xf32, #tpu.memory_space<vmem>>, vector<16x16xf32>
      %c0_22 = arith.constant 0 : index
      %45 = arith.index_cast %40 : i32 to index
      %c0_23 = arith.constant 0 : index
      %46 = vector.load %arg2[%c0_22, %45, %c0_23] : memref<1x16x64xf32, #tpu.memory_space<vmem>>, vector<1x16x64xf32>
      %47 = vector.shape_cast %46 : vector<1x16x64xf32> to vector<16x64xf32>
      %48 = arith.mulf %47, %47 : vector<16x64xf32>
      %cst_24 = arith.constant dense<0.000000e+00> : vector<16xf32>
      %49 = vector.multi_reduction <add>, %48, %cst_24 [1] : vector<16x64xf32> to vector<16xf32>
      %50 = vector.shape_cast %49 : vector<16xf32> to vector<16x1xf32>
      %cst_25 = arith.constant 6.400000e+01 : f32
      %51 = vector.broadcast %cst_25 : f32 to vector<16x1xf32>
      %52 = arith.divf %50, %51 : vector<16x1xf32>
      %cst_26 = arith.constant 1.1920929E-7 : f32
      %53 = vector.broadcast %cst_26 : f32 to vector<16x1xf32>
      %54 = arith.addf %52, %53 : vector<16x1xf32>
      %55 = math.rsqrt %54 : vector<16x1xf32>
      %56 = vector.broadcast %55 : vector<16x1xf32> to vector<16x64xf32>
      %57 = arith.mulf %47, %56 : vector<16x64xf32>
      %58 = arith.truncf %57 : vector<16x64xf32> to vector<16x64xbf16>
      %c0_27 = arith.constant 0 : index
      %c0_28 = arith.constant 0 : index
      %59 = vector.load %arg3[%c0_27, %c0_28] : memref<64x192xbf16, #tpu.memory_space<vmem>>, vector<64x192xbf16>
      %cst_29 = arith.constant dense<0.000000e+00> : vector<16x192xf32>
      %60 = tpu.matmul %58, %59, %cst_29 {dimension_numbers = #tpu.dot_dimension_numbers<[1], [0], [0], [1], [0, 0, 1, 1], [], []>} : vector<16x64xbf16>, vector<64x192xbf16>, vector<16x192xf32> -> vector<16x192xf32>
      %61 = vector.extract_strided_slice %60 {offsets = [0, 0], sizes = [16, 16], strides = [1, 1]} : vector<16x192xf32> to vector<16x16xf32>
      %62 = vector.extract_strided_slice %60 {offsets = [0, 64], sizes = [16, 16], strides = [1, 1]} : vector<16x192xf32> to vector<16x16xf32>
      %63 = vector.extract_strided_slice %60 {offsets = [0, 128], sizes = [16, 16], strides = [1, 1]} : vector<16x192xf32> to vector<16x16xf32>
      %64 = vector.extract_strided_slice %61 {offsets = [0, 8], sizes = [16, 8], strides = [1, 1]} : vector<16x16xf32> to vector<16x8xf32>
      %65 = vector.extract_strided_slice %61 {offsets = [0, 0], sizes = [16, 8], strides = [1, 1]} : vector<16x16xf32> to vector<16x8xf32>
      %66 = tpu.concatenate %64, %65 in 1 : vector<16x8xf32>, vector<16x8xf32> -> vector<16x16xf32>
      %67 = arith.mulf %61, %42 : vector<16x16xf32>
      %68 = arith.mulf %66, %44 : vector<16x16xf32>
      %69 = arith.addf %67, %68 : vector<16x16xf32>
      %70 = arith.mulf %69, %69 : vector<16x16xf32>
      %cst_30 = arith.constant dense<0.000000e+00> : vector<16xf32>
      %71 = vector.multi_reduction <add>, %70, %cst_30 [1] : vector<16x16xf32> to vector<16xf32>
      %72 = vector.shape_cast %71 : vector<16xf32> to vector<16x1xf32>
      %cst_31 = arith.constant 1.600000e+01 : f32
      %73 = vector.broadcast %cst_31 : f32 to vector<16x1xf32>
      %74 = arith.divf %72, %73 : vector<16x1xf32>
      %cst_32 = arith.constant 1.1920929E-7 : f32
      %75 = vector.broadcast %cst_32 : f32 to vector<16x1xf32>
      %76 = arith.addf %74, %75 : vector<16x1xf32>
      %77 = math.rsqrt %76 : vector<16x1xf32>
      %78 = vector.broadcast %77 : vector<16x1xf32> to vector<16x16xf32>
      %79 = arith.mulf %69, %78 : vector<16x16xf32>
      %cst_33 = arith.constant 2.500000e-01 : f32
      %80 = vector.broadcast %cst_33 : f32 to vector<16x16xf32>
      %81 = arith.mulf %79, %80 : vector<16x16xf32>
      %82 = arith.truncf %81 : vector<16x16xf32> to vector<16x16xbf16>
      %c0_34 = arith.constant 0 : index
      %83 = arith.index_cast %40 : i32 to index
      %c0_35 = arith.constant 0 : index
      %84 = vector.load %arg10[%c0_34, %83, %c0_35] : memref<4x16x16xbf16, #tpu.memory_space<vmem>>, vector<1x16x16xbf16>
      %85 = vector.shape_cast %84 : vector<1x16x16xbf16> to vector<16x16xbf16>
      %86 = vector.shape_cast %82 : vector<16x16xbf16> to vector<1x16x16xbf16>
      tpu.vector_store %arg10[%c0_34, %83, %c0_35], %86 {strides = array<i32>} : memref<4x16x16xbf16, #tpu.memory_space<vmem>>, vector<1x16x16xbf16>,
      %87 = vector.extract_strided_slice %62 {offsets = [0, 8], sizes = [16, 8], strides = [1, 1]} : vector<16x16xf32> to vector<16x8xf32>
      %88 = vector.extract_strided_slice %62 {offsets = [0, 0], sizes = [16, 8], strides = [1, 1]} : vector<16x16xf32> to vector<16x8xf32>
      %89 = tpu.concatenate %87, %88 in 1 : vector<16x8xf32>, vector<16x8xf32> -> vector<16x16xf32>
      %90 = arith.mulf %62, %42 : vector<16x16xf32>
      %91 = arith.mulf %89, %44 : vector<16x16xf32>
      %92 = arith.addf %90, %91 : vector<16x16xf32>
      %93 = arith.mulf %92, %92 : vector<16x16xf32>
      %cst_36 = arith.constant dense<0.000000e+00> : vector<16xf32>
      %94 = vector.multi_reduction <add>, %93, %cst_36 [1] : vector<16x16xf32> to vector<16xf32>
      %95 = vector.shape_cast %94 : vector<16xf32> to vector<16x1xf32>
      %cst_37 = arith.constant 1.600000e+01 : f32
      %96 = vector.broadcast %cst_37 : f32 to vector<16x1xf32>
      %97 = arith.divf %95, %96 : vector<16x1xf32>
      %cst_38 = arith.constant 1.1920929E-7 : f32
      %98 = vector.broadcast %cst_38 : f32 to vector<16x1xf32>
      %99 = arith.addf %97, %98 : vector<16x1xf32>
      %100 = math.rsqrt %99 : vector<16x1xf32>
      %101 = vector.broadcast %100 : vector<16x1xf32> to vector<16x16xf32>
      %102 = arith.mulf %92, %101 : vector<16x16xf32>
      %103 = arith.truncf %102 : vector<16x16xf32> to vector<16x16xbf16>
      %c0_39 = arith.constant 0 : index
      %104 = arith.index_cast %40 : i32 to index
      %c0_40 = arith.constant 0 : index
      %105 = vector.load %arg11[%c0_39, %104, %c0_40] : memref<4x16x16xbf16, #tpu.memory_space<vmem>>, vector<1x16x16xbf16>
      %106 = vector.shape_cast %105 : vector<1x16x16xbf16> to vector<16x16xbf16>
      %107 = vector.shape_cast %103 : vector<16x16xbf16> to vector<1x16x16xbf16>
      tpu.vector_store %arg11[%c0_39, %104, %c0_40], %107 {strides = array<i32>} : memref<4x16x16xbf16, #tpu.memory_space<vmem>>, vector<1x16x16xbf16>,
      %108 = arith.truncf %63 : vector<16x16xf32> to vector<16x16xbf16>
      %c0_41 = arith.constant 0 : index
      %109 = arith.index_cast %40 : i32 to index
      %c0_42 = arith.constant 0 : index
      %110 = vector.load %arg12[%c0_41, %109, %c0_42] : memref<4x16x16xbf16, #tpu.memory_space<vmem>>, vector<1x16x16xbf16>
      %111 = vector.shape_cast %110 : vector<1x16x16xbf16> to vector<16x16xbf16>
      %112 = vector.shape_cast %108 : vector<16x16xbf16> to vector<1x16x16xbf16>
      tpu.vector_store %arg12[%c0_41, %109, %c0_42], %112 {strides = array<i32>} : memref<4x16x16xbf16, #tpu.memory_space<vmem>>, vector<1x16x16xbf16>,
      %113 = vector.extract_strided_slice %60 {offsets = [0, 16], sizes = [16, 16], strides = [1, 1]} : vector<16x192xf32> to vector<16x16xf32>
      %114 = vector.extract_strided_slice %60 {offsets = [0, 80], sizes = [16, 16], strides = [1, 1]} : vector<16x192xf32> to vector<16x16xf32>
      %115 = vector.extract_strided_slice %60 {offsets = [0, 144], sizes = [16, 16], strides = [1, 1]} : vector<16x192xf32> to vector<16x16xf32>
      %116 = vector.extract_strided_slice %113 {offsets = [0, 8], sizes = [16, 8], strides = [1, 1]} : vector<16x16xf32> to vector<16x8xf32>
      %117 = vector.extract_strided_slice %113 {offsets = [0, 0], sizes = [16, 8], strides = [1, 1]} : vector<16x16xf32> to vector<16x8xf32>
      %118 = tpu.concatenate %116, %117 in 1 : vector<16x8xf32>, vector<16x8xf32> -> vector<16x16xf32>
      %119 = arith.mulf %113, %42 : vector<16x16xf32>
      %120 = arith.mulf %118, %44 : vector<16x16xf32>
      %121 = arith.addf %119, %120 : vector<16x16xf32>
      %122 = arith.mulf %121, %121 : vector<16x16xf32>
      %cst_43 = arith.constant dense<0.000000e+00> : vector<16xf32>
      %123 = vector.multi_reduction <add>, %122, %cst_43 [1] : vector<16x16xf32> to vector<16xf32>
      %124 = vector.shape_cast %123 : vector<16xf32> to vector<16x1xf32>
      %cst_44 = arith.constant 1.600000e+01 : f32
      %125 = vector.broadcast %cst_44 : f32 to vector<16x1xf32>
      %126 = arith.divf %124, %125 : vector<16x1xf32>
      %cst_45 = arith.constant 1.1920929E-7 : f32
      %127 = vector.broadcast %cst_45 : f32 to vector<16x1xf32>
      %128 = arith.addf %126, %127 : vector<16x1xf32>
      %129 = math.rsqrt %128 : vector<16x1xf32>
      %130 = vector.broadcast %129 : vector<16x1xf32> to vector<16x16xf32>
      %131 = arith.mulf %121, %130 : vector<16x16xf32>
      %cst_46 = arith.constant 2.500000e-01 : f32
      %132 = vector.broadcast %cst_46 : f32 to vector<16x16xf32>
      %133 = arith.mulf %131, %132 : vector<16x16xf32>
      %134 = arith.truncf %133 : vector<16x16xf32> to vector<16x16xbf16>
      %c1 = arith.constant 1 : index
      %135 = arith.index_cast %40 : i32 to index
      %c0_47 = arith.constant 0 : index
      %136 = vector.load %arg10[%c1, %135, %c0_47] : memref<4x16x16xbf16, #tpu.memory_space<vmem>>, vector<1x16x16xbf16>
      %137 = vector.shape_cast %136 : vector<1x16x16xbf16> to vector<16x16xbf16>
      %138 = vector.shape_cast %134 : vector<16x16xbf16> to vector<1x16x16xbf16>
      tpu.vector_store %arg10[%c1, %135, %c0_47], %138 {strides = array<i32>} : memref<4x16x16xbf16, #tpu.memory_space<vmem>>, vector<1x16x16xbf16>,
      %139 = vector.extract_strided_slice %114 {offsets = [0, 8], sizes = [16, 8], strides = [1, 1]} : vector<16x16xf32> to vector<16x8xf32>
      %140 = vector.extract_strided_slice %114 {offsets = [0, 0], sizes = [16, 8], strides = [1, 1]} : vector<16x16xf32> to vector<16x8xf32>
      %141 = tpu.concatenate %139, %140 in 1 : vector<16x8xf32>, vector<16x8xf32> -> vector<16x16xf32>
      %142 = arith.mulf %114, %42 : vector<16x16xf32>
      %143 = arith.mulf %141, %44 : vector<16x16xf32>
      %144 = arith.addf %142, %143 : vector<16x16xf32>
      %145 = arith.mulf %144, %144 : vector<16x16xf32>
      %cst_48 = arith.constant dense<0.000000e+00> : vector<16xf32>
      %146 = vector.multi_reduction <add>, %145, %cst_48 [1] : vector<16x16xf32> to vector<16xf32>
      %147 = vector.shape_cast %146 : vector<16xf32> to vector<16x1xf32>
      %cst_49 = arith.constant 1.600000e+01 : f32
      %148 = vector.broadcast %cst_49 : f32 to vector<16x1xf32>
      %149 = arith.divf %147, %148 : vector<16x1xf32>
      %cst_50 = arith.constant 1.1920929E-7 : f32
      %150 = vector.broadcast %cst_50 : f32 to vector<16x1xf32>
      %151 = arith.addf %149, %150 : vector<16x1xf32>
      %152 = math.rsqrt %151 : vector<16x1xf32>
      %153 = vector.broadcast %152 : vector<16x1xf32> to vector<16x16xf32>
      %154 = arith.mulf %144, %153 : vector<16x16xf32>
      %155 = arith.truncf %154 : vector<16x16xf32> to vector<16x16xbf16>
      %c1_51 = arith.constant 1 : index
      %156 = arith.index_cast %40 : i32 to index
      %c0_52 = arith.constant 0 : index
      %157 = vector.load %arg11[%c1_51, %156, %c0_52] : memref<4x16x16xbf16, #tpu.memory_space<vmem>>, vector<1x16x16xbf16>
      %158 = vector.shape_cast %157 : vector<1x16x16xbf16> to vector<16x16xbf16>
      %159 = vector.shape_cast %155 : vector<16x16xbf16> to vector<1x16x16xbf16>
      tpu.vector_store %arg11[%c1_51, %156, %c0_52], %159 {strides = array<i32>} : memref<4x16x16xbf16, #tpu.memory_space<vmem>>, vector<1x16x16xbf16>,
      %160 = arith.truncf %115 : vector<16x16xf32> to vector<16x16xbf16>
      %c1_53 = arith.constant 1 : index
      %161 = arith.index_cast %40 : i32 to index
      %c0_54 = arith.constant 0 : index
      %162 = vector.load %arg12[%c1_53, %161, %c0_54] : memref<4x16x16xbf16, #tpu.memory_space<vmem>>, vector<1x16x16xbf16>
      %163 = vector.shape_cast %162 : vector<1x16x16xbf16> to vector<16x16xbf16>
      %164 = vector.shape_cast %160 : vector<16x16xbf16> to vector<1x16x16xbf16>
      tpu.vector_store %arg12[%c1_53, %161, %c0_54], %164 {strides = array<i32>} : memref<4x16x16xbf16, #tpu.memory_space<vmem>>, vector<1x16x16xbf16>,
      %165 = vector.extract_strided_slice %60 {offsets = [0, 32], sizes = [16, 16], strides = [1, 1]} : vector<16x192xf32> to vector<16x16xf32>
      %166 = vector.extract_strided_slice %60 {offsets = [0, 96], sizes = [16, 16], strides = [1, 1]} : vector<16x192xf32> to vector<16x16xf32>
      %167 = vector.extract_strided_slice %60 {offsets = [0, 160], sizes = [16, 16], strides = [1, 1]} : vector<16x192xf32> to vector<16x16xf32>
      %168 = vector.extract_strided_slice %165 {offsets = [0, 8], sizes = [16, 8], strides = [1, 1]} : vector<16x16xf32> to vector<16x8xf32>
      %169 = vector.extract_strided_slice %165 {offsets = [0, 0], sizes = [16, 8], strides = [1, 1]} : vector<16x16xf32> to vector<16x8xf32>
      %170 = tpu.concatenate %168, %169 in 1 : vector<16x8xf32>, vector<16x8xf32> -> vector<16x16xf32>
      %171 = arith.mulf %165, %42 : vector<16x16xf32>
      %172 = arith.mulf %170, %44 : vector<16x16xf32>
      %173 = arith.addf %171, %172 : vector<16x16xf32>
      %174 = arith.mulf %173, %173 : vector<16x16xf32>
      %cst_55 = arith.constant dense<0.000000e+00> : vector<16xf32>
      %175 = vector.multi_reduction <add>, %174, %cst_55 [1] : vector<16x16xf32> to vector<16xf32>
      %176 = vector.shape_cast %175 : vector<16xf32> to vector<16x1xf32>
      %cst_56 = arith.constant 1.600000e+01 : f32
      %177 = vector.broadcast %cst_56 : f32 to vector<16x1xf32>
      %178 = arith.divf %176, %177 : vector<16x1xf32>
      %cst_57 = arith.constant 1.1920929E-7 : f32
      %179 = vector.broadcast %cst_57 : f32 to vector<16x1xf32>
      %180 = arith.addf %178, %179 : vector<16x1xf32>
      %181 = math.rsqrt %180 : vector<16x1xf32>
      %182 = vector.broadcast %181 : vector<16x1xf32> to vector<16x16xf32>
      %183 = arith.mulf %173, %182 : vector<16x16xf32>
      %cst_58 = arith.constant 2.500000e-01 : f32
      %184 = vector.broadcast %cst_58 : f32 to vector<16x16xf32>
      %185 = arith.mulf %183, %184 : vector<16x16xf32>
      %186 = arith.truncf %185 : vector<16x16xf32> to vector<16x16xbf16>
      %c2 = arith.constant 2 : index
      %187 = arith.index_cast %40 : i32 to index
      %c0_59 = arith.constant 0 : index
      %188 = vector.load %arg10[%c2, %187, %c0_59] : memref<4x16x16xbf16, #tpu.memory_space<vmem>>, vector<1x16x16xbf16>
      %189 = vector.shape_cast %188 : vector<1x16x16xbf16> to vector<16x16xbf16>
      %190 = vector.shape_cast %186 : vector<16x16xbf16> to vector<1x16x16xbf16>
      tpu.vector_store %arg10[%c2, %187, %c0_59], %190 {strides = array<i32>} : memref<4x16x16xbf16, #tpu.memory_space<vmem>>, vector<1x16x16xbf16>,
      %191 = vector.extract_strided_slice %166 {offsets = [0, 8], sizes = [16, 8], strides = [1, 1]} : vector<16x16xf32> to vector<16x8xf32>
      %192 = vector.extract_strided_slice %166 {offsets = [0, 0], sizes = [16, 8], strides = [1, 1]} : vector<16x16xf32> to vector<16x8xf32>
      %193 = tpu.concatenate %191, %192 in 1 : vector<16x8xf32>, vector<16x8xf32> -> vector<16x16xf32>
      %194 = arith.mulf %166, %42 : vector<16x16xf32>
      %195 = arith.mulf %193, %44 : vector<16x16xf32>
      %196 = arith.addf %194, %195 : vector<16x16xf32>
      %197 = arith.mulf %196, %196 : vector<16x16xf32>
      %cst_60 = arith.constant dense<0.000000e+00> : vector<16xf32>
      %198 = vector.multi_reduction <add>, %197, %cst_60 [1] : vector<16x16xf32> to vector<16xf32>
      %199 = vector.shape_cast %198 : vector<16xf32> to vector<16x1xf32>
      %cst_61 = arith.constant 1.600000e+01 : f32
      %200 = vector.broadcast %cst_61 : f32 to vector<16x1xf32>
      %201 = arith.divf %199, %200 : vector<16x1xf32>
      %cst_62 = arith.constant 1.1920929E-7 : f32
      %202 = vector.broadcast %cst_62 : f32 to vector<16x1xf32>
      %203 = arith.addf %201, %202 : vector<16x1xf32>
      %204 = math.rsqrt %203 : vector<16x1xf32>
      %205 = vector.broadcast %204 : vector<16x1xf32> to vector<16x16xf32>
      %206 = arith.mulf %196, %205 : vector<16x16xf32>
      %207 = arith.truncf %206 : vector<16x16xf32> to vector<16x16xbf16>
      %c2_63 = arith.constant 2 : index
      %208 = arith.index_cast %40 : i32 to index
      %c0_64 = arith.constant 0 : index
      %209 = vector.load %arg11[%c2_63, %208, %c0_64] : memref<4x16x16xbf16, #tpu.memory_space<vmem>>, vector<1x16x16xbf16>
      %210 = vector.shape_cast %209 : vector<1x16x16xbf16> to vector<16x16xbf16>
      %211 = vector.shape_cast %207 : vector<16x16xbf16> to vector<1x16x16xbf16>
      tpu.vector_store %arg11[%c2_63, %208, %c0_64], %211 {strides = array<i32>} : memref<4x16x16xbf16, #tpu.memory_space<vmem>>, vector<1x16x16xbf16>,
      %212 = arith.truncf %167 : vector<16x16xf32> to vector<16x16xbf16>
      %c2_65 = arith.constant 2 : index
      %213 = arith.index_cast %40 : i32 to index
      %c0_66 = arith.constant 0 : index
      %214 = vector.load %arg12[%c2_65, %213, %c0_66] : memref<4x16x16xbf16, #tpu.memory_space<vmem>>, vector<1x16x16xbf16>
      %215 = vector.shape_cast %214 : vector<1x16x16xbf16> to vector<16x16xbf16>
      %216 = vector.shape_cast %212 : vector<16x16xbf16> to vector<1x16x16xbf16>
      tpu.vector_store %arg12[%c2_65, %213, %c0_66], %216 {strides = array<i32>} : memref<4x16x16xbf16, #tpu.memory_space<vmem>>, vector<1x16x16xbf16>,
      %217 = vector.extract_strided_slice %60 {offsets = [0, 48], sizes = [16, 16], strides = [1, 1]} : vector<16x192xf32> to vector<16x16xf32>
      %218 = vector.extract_strided_slice %60 {offsets = [0, 112], sizes = [16, 16], strides = [1, 1]} : vector<16x192xf32> to vector<16x16xf32>
      %219 = vector.extract_strided_slice %60 {offsets = [0, 176], sizes = [16, 16], strides = [1, 1]} : vector<16x192xf32> to vector<16x16xf32>
      %220 = vector.extract_strided_slice %217 {offsets = [0, 8], sizes = [16, 8], strides = [1, 1]} : vector<16x16xf32> to vector<16x8xf32>
      %221 = vector.extract_strided_slice %217 {offsets = [0, 0], sizes = [16, 8], strides = [1, 1]} : vector<16x16xf32> to vector<16x8xf32>
      %222 = tpu.concatenate %220, %221 in 1 : vector<16x8xf32>, vector<16x8xf32> -> vector<16x16xf32>
      %223 = arith.mulf %217, %42 : vector<16x16xf32>
      %224 = arith.mulf %222, %44 : vector<16x16xf32>
      %225 = arith.addf %223, %224 : vector<16x16xf32>
      %226 = arith.mulf %225, %225 : vector<16x16xf32>
      %cst_67 = arith.constant dense<0.000000e+00> : vector<16xf32>
      %227 = vector.multi_reduction <add>, %226, %cst_67 [1] : vector<16x16xf32> to vector<16xf32>
      %228 = vector.shape_cast %227 : vector<16xf32> to vector<16x1xf32>
      %cst_68 = arith.constant 1.600000e+01 : f32
      %229 = vector.broadcast %cst_68 : f32 to vector<16x1xf32>
      %230 = arith.divf %228, %229 : vector<16x1xf32>
      %cst_69 = arith.constant 1.1920929E-7 : f32
      %231 = vector.broadcast %cst_69 : f32 to vector<16x1xf32>
      %232 = arith.addf %230, %231 : vector<16x1xf32>
      %233 = math.rsqrt %232 : vector<16x1xf32>
      %234 = vector.broadcast %233 : vector<16x1xf32> to vector<16x16xf32>
      %235 = arith.mulf %225, %234 : vector<16x16xf32>
      %cst_70 = arith.constant 2.500000e-01 : f32
      %236 = vector.broadcast %cst_70 : f32 to vector<16x16xf32>
      %237 = arith.mulf %235, %236 : vector<16x16xf32>
      %238 = arith.truncf %237 : vector<16x16xf32> to vector<16x16xbf16>
      %c3 = arith.constant 3 : index
      %239 = arith.index_cast %40 : i32 to index
      %c0_71 = arith.constant 0 : index
      %240 = vector.load %arg10[%c3, %239, %c0_71] : memref<4x16x16xbf16, #tpu.memory_space<vmem>>, vector<1x16x16xbf16>
      %241 = vector.shape_cast %240 : vector<1x16x16xbf16> to vector<16x16xbf16>
      %242 = vector.shape_cast %238 : vector<16x16xbf16> to vector<1x16x16xbf16>
      tpu.vector_store %arg10[%c3, %239, %c0_71], %242 {strides = array<i32>} : memref<4x16x16xbf16, #tpu.memory_space<vmem>>, vector<1x16x16xbf16>,
      %243 = vector.extract_strided_slice %218 {offsets = [0, 8], sizes = [16, 8], strides = [1, 1]} : vector<16x16xf32> to vector<16x8xf32>
      %244 = vector.extract_strided_slice %218 {offsets = [0, 0], sizes = [16, 8], strides = [1, 1]} : vector<16x16xf32> to vector<16x8xf32>
      %245 = tpu.concatenate %243, %244 in 1 : vector<16x8xf32>, vector<16x8xf32> -> vector<16x16xf32>
      %246 = arith.mulf %218, %42 : vector<16x16xf32>
      %247 = arith.mulf %245, %44 : vector<16x16xf32>
      %248 = arith.addf %246, %247 : vector<16x16xf32>
      %249 = arith.mulf %248, %248 : vector<16x16xf32>
      %cst_72 = arith.constant dense<0.000000e+00> : vector<16xf32>
      %250 = vector.multi_reduction <add>, %249, %cst_72 [1] : vector<16x16xf32> to vector<16xf32>
      %251 = vector.shape_cast %250 : vector<16xf32> to vector<16x1xf32>
      %cst_73 = arith.constant 1.600000e+01 : f32
      %252 = vector.broadcast %cst_73 : f32 to vector<16x1xf32>
      %253 = arith.divf %251, %252 : vector<16x1xf32>
      %cst_74 = arith.constant 1.1920929E-7 : f32
      %254 = vector.broadcast %cst_74 : f32 to vector<16x1xf32>
      %255 = arith.addf %253, %254 : vector<16x1xf32>
      %256 = math.rsqrt %255 : vector<16x1xf32>
      %257 = vector.broadcast %256 : vector<16x1xf32> to vector<16x16xf32>
      %258 = arith.mulf %248, %257 : vector<16x16xf32>
      %259 = arith.truncf %258 : vector<16x16xf32> to vector<16x16xbf16>
      %c3_75 = arith.constant 3 : index
      %260 = arith.index_cast %40 : i32 to index
      %c0_76 = arith.constant 0 : index
      %261 = vector.load %arg11[%c3_75, %260, %c0_76] : memref<4x16x16xbf16, #tpu.memory_space<vmem>>, vector<1x16x16xbf16>
      %262 = vector.shape_cast %261 : vector<1x16x16xbf16> to vector<16x16xbf16>
      %263 = vector.shape_cast %259 : vector<16x16xbf16> to vector<1x16x16xbf16>
      tpu.vector_store %arg11[%c3_75, %260, %c0_76], %263 {strides = array<i32>} : memref<4x16x16xbf16, #tpu.memory_space<vmem>>, vector<1x16x16xbf16>,
      %264 = arith.truncf %219 : vector<16x16xf32> to vector<16x16xbf16>
      %c3_77 = arith.constant 3 : index
      %265 = arith.index_cast %40 : i32 to index
      %c0_78 = arith.constant 0 : index
      %266 = vector.load %arg12[%c3_77, %265, %c0_78] : memref<4x16x16xbf16, #tpu.memory_space<vmem>>, vector<1x16x16xbf16>
      %267 = vector.shape_cast %266 : vector<1x16x16xbf16> to vector<16x16xbf16>
      %268 = vector.shape_cast %264 : vector<16x16xbf16> to vector<1x16x16xbf16>
      tpu.vector_store %arg12[%c3_77, %265, %c0_78], %268 {strides = array<i32>} : memref<4x16x16xbf16, #tpu.memory_space<vmem>>, vector<1x16x16xbf16>,
      %c1_i32_79 = arith.constant 1 : i32
    } else {
    }
    %c16_i32 = arith.constant 16 : i32
    %3 = arith.muli %arg1, %c16_i32 : i32
    %4 = tpu.assume_multiple %3, 16 : i32
    %c0 = arith.constant 0 : index
    %5 = arith.index_cast %4 : i32 to index
    %c0_1 = arith.constant 0 : index
    %6 = vector.load %arg2[%c0, %5, %c0_1] : memref<1x16x64xf32, #tpu.memory_space<vmem>>, vector<1x16x64xf32>
    %7 = vector.shape_cast %6 : vector<1x16x64xf32> to vector<16x64xf32>
    %8 = tpu.iota {dimensions = array<i32: 0>} : vector<16x16xi32>
    %9 = tpu.iota {dimensions = array<i32: 1>} : vector<16x16xi32>
    %10 = arith.cmpi sge, %8, %9 : vector<16x16xi32>
    %c1_i32 = arith.constant 1 : i32
    %11 = arith.addi %arg1, %c1_i32 : i32
    %cst = arith.constant 0.000000e+00 : f32
    %12 = vector.broadcast %cst : f32 to vector<16x64xf32>
    %c0_i32_2 = arith.constant 0 : i32
    %c4_i32 = arith.constant 4 : i32
    %13 = arith.addi %c0_i32_2, %c4_i32 : i32
    %c1_i32_3 = arith.constant 1 : i32
    %14 = scf.for %arg13 = %c0_i32_2 to %13 step %c1_i32_3 iter_args(%arg14 = %12) -> (vector<16x64xf32>)  : i32 {
      %39 = arith.index_cast %arg13 : i32 to index
      %40 = arith.index_cast %4 : i32 to index
      %c0_18 = arith.constant 0 : index
      %41 = vector.load %arg10[%39, %40, %c0_18] : memref<4x16x16xbf16, #tpu.memory_space<vmem>>, vector<1x16x16xbf16>
      %42 = vector.shape_cast %41 : vector<1x16x16xbf16> to vector<16x16xbf16>
      %cst_19 = arith.constant -1.000000e+30 : f32
      %43 = vector.broadcast %cst_19 : f32 to vector<16x1xf32>
      %cst_20 = arith.constant 0.000000e+00 : f32
      %44 = vector.broadcast %cst_20 : f32 to vector<16x1xf32>
      %cst_21 = arith.constant 0.000000e+00 : f32
      %45 = vector.broadcast %cst_21 : f32 to vector<16x16xf32>
      %c0_i32_22 = arith.constant 0 : i32
      %46 = arith.subi %11, %c0_i32_22 : i32
      %47 = arith.addi %c0_i32_22, %46 : i32
      %c1_i32_23 = arith.constant 1 : i32
      %48:3 = scf.for %arg15 = %c0_i32_22 to %47 step %c1_i32_23 iter_args(%arg16 = %43, %arg17 = %44, %arg18 = %45) -> (vector<16x1xf32>, vector<16x1xf32>, vector<16x16xf32>)  : i32 {
        %c16_i32_27 = arith.constant 16 : i32
        %58 = arith.muli %arg15, %c16_i32_27 : i32
        %59 = tpu.assume_multiple %58, 16 : i32
        %60 = arith.index_cast %arg13 : i32 to index
        %61 = arith.index_cast %59 : i32 to index
        %c0_28 = arith.constant 0 : index
        %62 = vector.load %arg11[%60, %61, %c0_28] : memref<4x16x16xbf16, #tpu.memory_space<vmem>>, vector<1x16x16xbf16>
        %63 = vector.shape_cast %62 : vector<1x16x16xbf16> to vector<16x16xbf16>
        %64 = arith.index_cast %arg13 : i32 to index
        %65 = arith.index_cast %59 : i32 to index
        %c0_29 = arith.constant 0 : index
        %66 = vector.load %arg12[%64, %65, %c0_29] : memref<4x16x16xbf16, #tpu.memory_space<vmem>>, vector<1x16x16xbf16>
        %67 = vector.shape_cast %66 : vector<1x16x16xbf16> to vector<16x16xbf16>
        %cst_30 = arith.constant dense<0.000000e+00> : vector<16x16xf32>
        %68 = tpu.matmul %42, %63, %cst_30 {dimension_numbers = #tpu.dot_dimension_numbers<[1], [1], [0], [0], [0, 0, 1, 0], [], []>} : vector<16x16xbf16>, vector<16x16xbf16>, vector<16x16xf32> -> vector<16x16xf32>
        %69 = arith.cmpi slt, %arg15, %arg1 : i32
        %70 = vector.broadcast %69 : i1 to vector<16x16xi1>
        %71 = arith.ori %70, %10 : vector<16x16xi1>
        %cst_31 = arith.constant -1.000000e+30 : f32
        %72 = vector.broadcast %cst_31 : f32 to vector<16x16xf32>
        %73 = arith.select %71, %68, %72 : vector<16x16xi1>, vector<16x16xf32>
        %cst_32 = arith.constant dense<0xFF800000> : vector<16xf32>
        %74 = vector.multi_reduction <maximumf>, %73, %cst_32 [1] : vector<16x16xf32> to vector<16xf32>
        %75 = vector.shape_cast %74 : vector<16xf32> to vector<16x1xf32>
        %76 = arith.maximumf %arg16, %75 : vector<16x1xf32>
        %77 = arith.subf %arg16, %76 : vector<16x1xf32>
        %78 = math.exp %77 : vector<16x1xf32>
        %79 = vector.broadcast %76 : vector<16x1xf32> to vector<16x16xf32>
        %80 = arith.subf %73, %79 : vector<16x16xf32>
        %81 = math.exp %80 : vector<16x16xf32>
        %82 = arith.mulf %78, %arg17 : vector<16x1xf32>
        %cst_33 = arith.constant dense<0.000000e+00> : vector<16xf32>
        %83 = vector.multi_reduction <add>, %81, %cst_33 [1] : vector<16x16xf32> to vector<16xf32>
        %84 = vector.shape_cast %83 : vector<16xf32> to vector<16x1xf32>
        %85 = arith.addf %82, %84 : vector<16x1xf32>
        %86 = vector.broadcast %78 : vector<16x1xf32> to vector<16x16xf32>
        %87 = arith.mulf %86, %arg18 : vector<16x16xf32>
        %88 = arith.truncf %81 : vector<16x16xf32> to vector<16x16xbf16>
        %cst_34 = arith.constant dense<0.000000e+00> : vector<16x16xf32>
        %89 = tpu.matmul %88, %67, %cst_34 {dimension_numbers = #tpu.dot_dimension_numbers<[1], [0], [0], [1], [0, 0, 1, 1], [], []>} : vector<16x16xbf16>, vector<16x16xbf16>, vector<16x16xf32> -> vector<16x16xf32>
        %90 = arith.addf %87, %89 : vector<16x16xf32>
        scf.yield %76, %85, %90 : vector<16x1xf32>, vector<16x1xf32>, vector<16x16xf32>
      }
      %49 = tpu.reciprocal %48#1 {approx = true} : vector<16x1xf32> -> vector<16x1xf32>
      %50 = vector.broadcast %49 : vector<16x1xf32> to vector<16x16xf32>
      %51 = arith.mulf %48#2, %50 : vector<16x16xf32>
      %52 = arith.truncf %51 : vector<16x16xf32> to vector<16x16xbf16>
      %53 = arith.index_cast %arg13 : i32 to index
      %c0_24 = arith.constant 0 : index
      %c0_25 = arith.constant 0 : index
      %54 = vector.load %arg4[%53, %c0_24, %c0_25] : memref<4x16x64xbf16, #tpu.memory_space<vmem>>, vector<1x16x64xbf16>
      %55 = vector.shape_cast %54 : vector<1x16x64xbf16> to vector<16x64xbf16>
      %cst_26 = arith.constant dense<0.000000e+00> : vector<16x64xf32>
      %56 = tpu.matmul %52, %55, %cst_26 {dimension_numbers = #tpu.dot_dimension_numbers<[1], [0], [0], [1], [0, 0, 1, 1], [], []>} : vector<16x16xbf16>, vector<16x64xbf16>, vector<16x64xf32> -> vector<16x64xf32>
      %57 = arith.addf %arg14, %56 : vector<16x64xf32>
      scf.yield %57 : vector<16x64xf32>
    }
    %c4_i32_4 = arith.constant 4 : i32
    %15 = arith.addf %7, %14 : vector<16x64xf32>
    %16 = arith.mulf %15, %15 : vector<16x64xf32>
    %cst_5 = arith.constant dense<0.000000e+00> : vector<16xf32>
    %17 = vector.multi_reduction <add>, %16, %cst_5 [1] : vector<16x64xf32> to vector<16xf32>
    %18 = vector.shape_cast %17 : vector<16xf32> to vector<16x1xf32>
    %cst_6 = arith.constant 6.400000e+01 : f32
    %19 = vector.broadcast %cst_6 : f32 to vector<16x1xf32>
    %20 = arith.divf %18, %19 : vector<16x1xf32>
    %cst_7 = arith.constant 1.1920929E-7 : f32
    %21 = vector.broadcast %cst_7 : f32 to vector<16x1xf32>
    %22 = arith.addf %20, %21 : vector<16x1xf32>
    %23 = math.rsqrt %22 : vector<16x1xf32>
    %24 = vector.broadcast %23 : vector<16x1xf32> to vector<16x64xf32>
    %25 = arith.mulf %15, %24 : vector<16x64xf32>
    %26 = arith.truncf %25 : vector<16x64xf32> to vector<16x64xbf16>
    %c0_8 = arith.constant 0 : index
    %c0_9 = arith.constant 0 : index
    %27 = vector.load %arg5[%c0_8, %c0_9] : memref<64x256xbf16, #tpu.memory_space<vmem>>, vector<64x256xbf16>
    %cst_10 = arith.constant dense<0.000000e+00> : vector<16x256xf32>
    %28 = tpu.matmul %26, %27, %cst_10 {dimension_numbers = #tpu.dot_dimension_numbers<[1], [0], [0], [1], [0, 0, 1, 1], [], []>} : vector<16x64xbf16>, vector<64x256xbf16>, vector<16x256xf32> -> vector<16x256xf32>
    %cst_11 = arith.constant 0.000000e+00 : f32
    %29 = vector.broadcast %cst_11 : f32 to vector<16x256xf32>
    %30 = arith.maximumf %28, %29 : vector<16x256xf32>
    %31 = arith.mulf %30, %30 : vector<16x256xf32>
    %32 = arith.truncf %31 : vector<16x256xf32> to vector<16x256xbf16>
    %c0_12 = arith.constant 0 : index
    %c0_13 = arith.constant 0 : index
    %33 = vector.load %arg6[%c0_12, %c0_13] : memref<256x64xbf16, #tpu.memory_space<vmem>>, vector<256x64xbf16>
    %cst_14 = arith.constant dense<0.000000e+00> : vector<16x64xf32>
    %34 = tpu.matmul %32, %33, %cst_14 {dimension_numbers = #tpu.dot_dimension_numbers<[1], [0], [0], [1], [0, 0, 1, 1], [], []>} : vector<16x256xbf16>, vector<256x64xbf16>, vector<16x64xf32> -> vector<16x64xf32>
    %35 = arith.addf %15, %34 : vector<16x64xf32>
    %c0_15 = arith.constant 0 : index
    %c0_16 = arith.constant 0 : index
    %c0_17 = arith.constant 0 : index
    %36 = vector.load %arg9[%c0_15, %c0_16, %c0_17] : memref<1x16x64xf32, #tpu.memory_space<vmem>>, vector<1x16x64xf32>
    %37 = vector.shape_cast %36 : vector<1x16x64xf32> to vector<16x64xf32>
    %38 = vector.shape_cast %35 : vector<16x64xf32> to vector<1x16x64xf32>
    tpu.vector_store %arg9[%c0_15, %c0_16, %c0_17], %38 {strides = array<i32>} : memref<1x16x64xf32, #tpu.memory_space<vmem>>, vector<1x16x64xf32>,
    return
  }
  func.func @transform_0(%arg0: i32, %arg1: i32) -> (i32, i32, i32) {
    %c0_i32 = arith.constant 0 : i32
    %c0_i32_0 = arith.constant 0 : i32
    %c0_i32_1 = arith.constant 0 : i32
    return %arg0, %c0_i32, %c0_i32_0 : i32, i32, i32
  }
  func.func @transform_1(%arg0: i32, %arg1: i32) -> (i32, i32) {
    %c0_i32 = arith.constant 0 : i32
    %c0_i32_0 = arith.constant 0 : i32
    %c0_i32_1 = arith.constant 0 : i32
    return %c0_i32, %c0_i32_0 : i32, i32
  }
  func.func @transform_2(%arg0: i32, %arg1: i32) -> (i32, i32, i32) {
    %c0_i32 = arith.constant 0 : i32
    %c0_i32_0 = arith.constant 0 : i32
    %c0_i32_1 = arith.constant 0 : i32
    %c0_i32_2 = arith.constant 0 : i32
    return %c0_i32, %c0_i32_0, %c0_i32_1 : i32, i32, i32
  }
  func.func @transform_3(%arg0: i32, %arg1: i32) -> (i32, i32) {
    %c0_i32 = arith.constant 0 : i32
    %c0_i32_0 = arith.constant 0 : i32
    %c0_i32_1 = arith.constant 0 : i32
    return %c0_i32, %c0_i32_0 : i32, i32
  }
  func.func @transform_4(%arg0: i32, %arg1: i32) -> (i32, i32) {
    %c0_i32 = arith.constant 0 : i32
    %c0_i32_0 = arith.constant 0 : i32
    %c0_i32_1 = arith.constant 0 : i32
    return %c0_i32, %c0_i32_0 : i32, i32
  }
  func.func @transform_5(%arg0: i32, %arg1: i32) -> (i32, i32) {
    %c0_i32 = arith.constant 0 : i32
    %c0_i32_0 = arith.constant 0 : i32
    %c0_i32_1 = arith.constant 0 : i32
    return %c0_i32, %c0_i32_0 : i32, i32
  }
  func.func @transform_6(%arg0: i32, %arg1: i32) -> (i32, i32) {
    %c0_i32 = arith.constant 0 : i32
    %c0_i32_0 = arith.constant 0 : i32
    %c0_i32_1 = arith.constant 0 : i32
    return %c0_i32, %c0_i32_0 : i32, i32
  }
  func.func @transform_7(%arg0: i32, %arg1: i32) -> (i32, i32, i32) {
    %c0_i32 = arith.constant 0 : i32
    %c0_i32_0 = arith.constant 0 : i32
    return %arg0, %arg1, %c0_i32 : i32, i32, i32
  }
}

module attributes {stable_mosaic.version = 11 : i64} {
  func.func @block_kernel(%arg0: i32, %arg1: i32, %arg2: memref<1x16x64xf32, #tpu.memory_space<vmem>>, %arg3: memref<64x192xbf16, #tpu.memory_space<vmem>>, %arg4: memref<4x16x64xbf16, #tpu.memory_space<vmem>>, %arg5: memref<64x256xbf16, #tpu.memory_space<vmem>>, %arg6: memref<256x64xbf16, #tpu.memory_space<vmem>>, %arg7: memref<16x16xf32, #tpu.memory_space<vmem>>, %arg8: memref<16x16xf32, #tpu.memory_space<vmem>>, %arg9: memref<1x16x64xf32, #tpu.memory_space<vmem>>, %arg10: memref<4x16x16xbf16, #tpu.memory_space<vmem>>, %arg11: memref<4x16x16xbf16, #tpu.memory_space<vmem>>, %arg12: memref<4x16x16xbf16, #tpu.memory_space<vmem>>) attributes {dimension_semantics = [#tpu.dimension_semantics<parallel>, #tpu.dimension_semantics<arbitrary>], iteration_bounds = array<i64: 2, 1>, scalar_prefetch = 0 : i64, scratch_operands = 3 : i64, tpu.core_type = #tpu.core_type<tc>, window_params = [{transform_indices = @transform_0, window_bounds = array<i64: 1, 16, 64>}, {pipeline_mode = #tpu.pipeline_mode<synchronous>, transform_indices = @transform_1, window_bounds = array<i64: 64, 192>}, {pipeline_mode = #tpu.pipeline_mode<synchronous>, transform_indices = @transform_2, window_bounds = array<i64: 4, 16, 64>}, {pipeline_mode = #tpu.pipeline_mode<synchronous>, transform_indices = @transform_3, window_bounds = array<i64: 64, 256>}, {pipeline_mode = #tpu.pipeline_mode<synchronous>, transform_indices = @transform_4, window_bounds = array<i64: 256, 64>}, {pipeline_mode = #tpu.pipeline_mode<synchronous>, transform_indices = @transform_5, window_bounds = array<i64: 16, 16>}, {pipeline_mode = #tpu.pipeline_mode<synchronous>, transform_indices = @transform_6, window_bounds = array<i64: 16, 16>}, {transform_indices = @transform_7, window_bounds = array<i64: 1, 16, 64>}]} {
    %c0_i32 = arith.constant 0 : i32
    %0 = arith.cmpi eq, %arg1, %c0_i32 : i32
    %1 = arith.extui %0 : i1 to i32
    %c0_i32_0 = arith.constant 0 : i32
    %2 = arith.cmpi ne, %1, %c0_i32_0 : i32
    scf.if %2 {
      %c0_i32_18 = arith.constant 0 : i32
      %c16_i32_19 = arith.constant 16 : i32
      %39 = arith.muli %c0_i32_18, %c16_i32_19 : i32
      %40 = tpu.assume_multiple %39, 16 : i32
      %41 = arith.index_cast %40 : i32 to index
      %c0_20 = arith.constant 0 : index
      %42 = vector.load %arg7[%41, %c0_20] : memref<16x16xf32, #tpu.memory_space<vmem>>, vector<16x16xf32>
      %43 = arith.index_cast %40 : i32 to index
      %c0_21 = arith.constant 0 : index
      %44 = vector.load %arg8[%43, %c0_21] : memref<16x16xf32, #tpu.memory_space<vmem>>, vector<16x16xf32>
      %c0_22 = arith.constant 0 : index
      %45 = arith.index_cast %40 : i32 to index
      %c0_23 = arith.constant 0 : index
      %46 = vector.load %arg2[%c0_22, %45, %c0_23] : memref<1x16x64xf32, #tpu.memory_space<vmem>>, vector<1x16x64xf32>
      %47 = vector.shape_cast %46 : vector<1x16x64xf32> to vector<16x64xf32>
      %48 = arith.mulf %47, %47 : vector<16x64xf32>
      %cst_24 = arith.constant dense<0.000000e+00> : vector<16xf32>
      %49 = vector.multi_reduction <add>, %48, %cst_24 [1] : vector<16x64xf32> to vector<16xf32>
      %50 = vector.shape_cast %49 : vector<16xf32> to vector<16x1xf32>
      %cst_25 = arith.constant 6.400000e+01 : f32
      %51 = vector.broadcast %cst_25 : f32 to vector<16x1xf32>
      %52 = arith.divf %50, %51 : vector<16x1xf32>
      %cst_26 = arith.constant 1.1920929E-7 : f32
      %53 = vector.broadcast %cst_26 : f32 to vector<16x1xf32>
      %54 = arith.addf %52, %53 : vector<16x1xf32>
      %55 = math.rsqrt %54 : vector<16x1xf32>
      %56 = vector.broadcast %55 : vector<16x1xf32> to vector<16x64xf32>
      %57 = arith.mulf %47, %56 : vector<16x64xf32>
      %58 = arith.truncf %57 : vector<16x64xf32> to vector<16x64xbf16>
      %c0_27 = arith.constant 0 : index
      %c0_28 = arith.constant 0 : index
      %59 = vector.load %arg3[%c0_27, %c0_28] : memref<64x192xbf16, #tpu.memory_space<vmem>>, vector<64x192xbf16>
      %cst_29 = arith.constant dense<0.000000e+00> : vector<16x192xf32>
      %60 = tpu.matmul %58, %59, %cst_29 {dimension_numbers = #tpu.dot_dimension_numbers<[1], [0], [0], [1], [0, 0, 1, 1], [], []>} : vector<16x64xbf16>, vector<64x192xbf16>, vector<16x192xf32> -> vector<16x192xf32>
      %61 = vector.extract_strided_slice %60 {offsets = [0, 0], sizes = [16, 16], strides = [1, 1]} : vector<16x192xf32> to vector<16x16xf32>
      %62 = vector.extract_strided_slice %60 {offsets = [0, 64], sizes = [16, 16], strides = [1, 1]} : vector<16x192xf32> to vector<16x16xf32>
      %63 = vector.extract_strided_slice %60 {offsets = [0, 128], sizes = [16, 16], strides = [1, 1]} : vector<16x192xf32> to vector<16x16xf32>
      %64 = vector.extract_strided_slice %61 {offsets = [0, 8], sizes = [16, 8], strides = [1, 1]} : vector<16x16xf32> to vector<16x8xf32>
      %65 = vector.extract_strided_slice %61 {offsets = [0, 0], sizes = [16, 8], strides = [1, 1]} : vector<16x16xf32> to vector<16x8xf32>
      %66 = tpu.concatenate %64, %65 in 1 : vector<16x8xf32>, vector<16x8xf32> -> vector<16x16xf32>
      %67 = arith.mulf %61, %42 : vector<16x16xf32>
      %68 = arith.mulf %66, %44 : vector<16x16xf32>
      %69 = arith.addf %67, %68 : vector<16x16xf32>
      %70 = arith.mulf %69, %69 : vector<16x16xf32>
      %cst_30 = arith.constant dense<0.000000e+00> : vector<16xf32>
      %71 = vector.multi_reduction <add>, %70, %cst_30 [1] : vector<16x16xf32> to vector<16xf32>
      %72 = vector.shape_cast %71 : vector<16xf32> to vector<16x1xf32>
      %cst_31 = arith.constant 1.600000e+01 : f32
      %73 = vector.broadcast %cst_31 : f32 to vector<16x1xf32>
      %74 = arith.divf %72, %73 : vector<16x1xf32>
      %cst_32 = arith.constant 1.1920929E-7 : f32
      %75 = vector.broadcast %cst_32 : f32 to vector<16x1xf32>
      %76 = arith.addf %74, %75 : vector<16x1xf32>
      %77 = math.rsqrt %76 : vector<16x1xf32>
      %78 = vector.broadcast %77 : vector<16x1xf32> to vector<16x16xf32>
      %79 = arith.mulf %69, %78 : vector<16x16xf32>
      %cst_33 = arith.constant 2.500000e-01 : f32
      %80 = vector.broadcast %cst_33 : f32 to vector<16x16xf32>
      %81 = arith.mulf %79, %80 : vector<16x16xf32>
      %82 = arith.truncf %81 : vector<16x16xf32> to vector<16x16xbf16>
      %c0_34 = arith.constant 0 : index
      %83 = arith.index_cast %40 : i32 to index
      %c0_35 = arith.constant 0 : index
      %84 = vector.load %arg10[%c0_34, %83, %c0_35] : memref<4x16x16xbf16, #tpu.memory_space<vmem>>, vector<1x16x16xbf16>
      %85 = vector.shape_cast %84 : vector<1x16x16xbf16> to vector<16x16xbf16>
      %86 = vector.shape_cast %82 : vector<16x16xbf16> to vector<1x16x16xbf16>
      tpu.vector_store %arg10[%c0_34, %83, %c0_35], %86 {strides = array<i32>} : memref<4x16x16xbf16, #tpu.memory_space<vmem>>, vector<1x16x16xbf16>,
      %87 = vector.extract_strided_slice %62 {offsets = [0, 8], sizes = [16, 8], strides = [1, 1]} : vector<16x16xf32> to vector<16x8xf32>
      %88 = vector.extract_strided_slice %62 {offsets = [0, 0], sizes = [16, 8], strides = [1, 1]} : vector<16x16xf32> to vector<16x8xf32>
      %89 = tpu.concatenate %87, %88 in 1 : vector<16x8xf32>, vector<16x8xf32> -> vector<16x16xf32>
      %90 = arith.mulf %62, %42 : vector<16x16xf32>
      %91 = arith.mulf %89, %44 : vector<16x16xf32>
      %92 = arith.addf %90, %91 : vector<16x16xf32>
      %93 = arith.mulf %92, %92 : vector<16x16xf32>
      %cst_36 = arith.constant dense<0.000000e+00> : vector<16xf32>
      %94 = vector.multi_reduction <add>, %93, %cst_36 [1] : vector<16x16xf32> to vector<16xf32>
      %95 = vector.shape_cast %94 : vector<16xf32> to vector<16x1xf32>
      %cst_37 = arith.constant 1.600000e+01 : f32
      %96 = vector.broadcast %cst_37 : f32 to vector<16x1xf32>
      %97 = arith.divf %95, %96 : vector<16x1xf32>
      %cst_38 = arith.constant 1.1920929E-7 : f32
      %98 = vector.broadcast %cst_38 : f32 to vector<16x1xf32>
      %99 = arith.addf %97, %98 : vector<16x1xf32>
      %100 = math.rsqrt %99 : vector<16x1xf32>
      %101 = vector.broadcast %100 : vector<16x1xf32> to vector<16x16xf32>
      %102 = arith.mulf %92, %101 : vector<16x16xf32>
      %103 = arith.truncf %102 : vector<16x16xf32> to vector<16x16xbf16>
      %c0_39 = arith.constant 0 : index
      %104 = arith.index_cast %40 : i32 to index
      %c0_40 = arith.constant 0 : index
      %105 = vector.load %arg11[%c0_39, %104, %c0_40] : memref<4x16x16xbf16, #tpu.memory_space<vmem>>, vector<1x16x16xbf16>
      %106 = vector.shape_cast %105 : vector<1x16x16xbf16> to vector<16x16xbf16>
      %107 = vector.shape_cast %103 : vector<16x16xbf16> to vector<1x16x16xbf16>
      tpu.vector_store %arg11[%c0_39, %104, %c0_40], %107 {strides = array<i32>} : memref<4x16x16xbf16, #tpu.memory_space<vmem>>, vector<1x16x16xbf16>,
      %108 = arith.truncf %63 : vector<16x16xf32> to vector<16x16xbf16>
      %c0_41 = arith.constant 0 : index
      %109 = arith.index_cast %40 : i32 to index
      %c0_42 = arith.constant 0 : index
      %110 = vector.load %arg12[%c0_41, %109, %c0_42] : memref<4x16x16xbf16, #tpu.memory_space<vmem>>, vector<1x16x16xbf16>
      %111 = vector.shape_cast %110 : vector<1x16x16xbf16> to vector<16x16xbf16>
      %112 = vector.shape_cast %108 : vector<16x16xbf16> to vector<1x16x16xbf16>
      tpu.vector_store %arg12[%c0_41, %109, %c0_42], %112 {strides = array<i32>} : memref<4x16x16xbf16, #tpu.memory_space<vmem>>, vector<1x16x16xbf16>,
      %113 = vector.extract_strided_slice %60 {offsets = [0, 16], sizes = [16, 16], strides = [1, 1]} : vector<16x192xf32> to vector<16x16xf32>
      %114 = vector.extract_strided_slice %60 {offsets = [0, 80], sizes = [16, 16], strides = [1, 1]} : vector<16x192xf32> to vector<16x16xf32>
      %115 = vector.extract_strided_slice %60 {offsets = [0, 144], sizes = [16, 16], strides = [1, 1]} : vector<16x192xf32> to vector<16x16xf32>
      %116 = vector.extract_strided_slice %113 {offsets = [0, 8], sizes = [16, 8], strides = [1, 1]} : vector<16x16xf32> to vector<16x8xf32>
      %117 = vector.extract_strided_slice %113 {offsets = [0, 0], sizes = [16, 8], strides = [1, 1]} : vector<16x16xf32> to vector<16x8xf32>
      %118 = tpu.concatenate %116, %117 in 1 : vector<16x8xf32>, vector<16x8xf32> -> vector<16x16xf32>
      %119 = arith.mulf %113, %42 : vector<16x16xf32>
      %120 = arith.mulf %118, %44 : vector<16x16xf32>
      %121 = arith.addf %119, %120 : vector<16x16xf32>
      %122 = arith.mulf %121, %121 : vector<16x16xf32>
      %cst_43 = arith.constant dense<0.000000e+00> : vector<16xf32>
      %123 = vector.multi_reduction <add>, %122, %cst_43 [1] : vector<16x16xf32> to vector<16xf32>
      %124 = vector.shape_cast %123 : vector<16xf32> to vector<16x1xf32>
      %cst_44 = arith.constant 1.600000e+01 : f32
      %125 = vector.broadcast %cst_44 : f32 to vector<16x1xf32>
      %126 = arith.divf %124, %125 : vector<16x1xf32>
      %cst_45 = arith.constant 1.1920929E-7 : f32
      %127 = vector.broadcast %cst_45 : f32 to vector<16x1xf32>
      %128 = arith.addf %126, %127 : vector<16x1xf32>
      %129 = math.rsqrt %128 : vector<16x1xf32>
      %130 = vector.broadcast %129 : vector<16x1xf32> to vector<16x16xf32>
      %131 = arith.mulf %121, %130 : vector<16x16xf32>
      %cst_46 = arith.constant 2.500000e-01 : f32
      %132 = vector.broadcast %cst_46 : f32 to vector<16x16xf32>
      %133 = arith.mulf %131, %132 : vector<16x16xf32>
      %134 = arith.truncf %133 : vector<16x16xf32> to vector<16x16xbf16>
      %c1 = arith.constant 1 : index
      %135 = arith.index_cast %40 : i32 to index
      %c0_47 = arith.constant 0 : index
      %136 = vector.load %arg10[%c1, %135, %c0_47] : memref<4x16x16xbf16, #tpu.memory_space<vmem>>, vector<1x16x16xbf16>
      %137 = vector.shape_cast %136 : vector<1x16x16xbf16> to vector<16x16xbf16>
      %138 = vector.shape_cast %134 : vector<16x16xbf16> to vector<1x16x16xbf16>
      tpu.vector_store %arg10[%c1, %135, %c0_47], %138 {strides = array<i32>} : memref<4x16x16xbf16, #tpu.memory_space<vmem>>, vector<1x16x16xbf16>,
      %139 = vector.extract_strided_slice %114 {offsets = [0, 8], sizes = [16, 8], strides = [1, 1]} : vector<16x16xf32> to vector<16x8xf32>
      %140 = vector.extract_strided_slice %114 {offsets = [0, 0], sizes = [16, 8], strides = [1, 1]} : vector<16x16xf32> to vector<16x8xf32>
      %141 = tpu.concatenate %139, %140 in 1 : vector<16x8xf32>, vector<16x8xf32> -> vector<16x16xf32>
      %142 = arith.mulf %114, %42 : vector<16x16xf32>
      %143 = arith.mulf %141, %44 : vector<16x16xf32>
      %144 = arith.addf %142, %143 : vector<16x16xf32>
      %145 = arith.mulf %144, %144 : vector<16x16xf32>
      %cst_48 = arith.constant dense<0.000000e+00> : vector<16xf32>
      %146 = vector.multi_reduction <add>, %145, %cst_48 [1] : vector<16x16xf32> to vector<16xf32>
      %147 = vector.shape_cast %146 : vector<16xf32> to vector<16x1xf32>
      %cst_49 = arith.constant 1.600000e+01 : f32
      %148 = vector.broadcast %cst_49 : f32 to vector<16x1xf32>
      %149 = arith.divf %147, %148 : vector<16x1xf32>
      %cst_50 = arith.constant 1.1920929E-7 : f32
      %150 = vector.broadcast %cst_50 : f32 to vector<16x1xf32>
      %151 = arith.addf %149, %150 : vector<16x1xf32>
      %152 = math.rsqrt %151 : vector<16x1xf32>
      %153 = vector.broadcast %152 : vector<16x1xf32> to vector<16x16xf32>
      %154 = arith.mulf %144, %153 : vector<16x16xf32>
      %155 = arith.truncf %154 : vector<16x16xf32> to vector<16x16xbf16>
      %c1_51 = arith.constant 1 : index
      %156 = arith.index_cast %40 : i32 to index
      %c0_52 = arith.constant 0 : index
      %157 = vector.load %arg11[%c1_51, %156, %c0_52] : memref<4x16x16xbf16, #tpu.memory_space<vmem>>, vector<1x16x16xbf16>
      %158 = vector.shape_cast %157 : vector<1x16x16xbf16> to vector<16x16xbf16>
      %159 = vector.shape_cast %155 : vector<16x16xbf16> to vector<1x16x16xbf16>
      tpu.vector_store %arg11[%c1_51, %156, %c0_52], %159 {strides = array<i32>} : memref<4x16x16xbf16, #tpu.memory_space<vmem>>, vector<1x16x16xbf16>,
      %160 = arith.truncf %115 : vector<16x16xf32> to vector<16x16xbf16>
      %c1_53 = arith.constant 1 : index
      %161 = arith.index_cast %40 : i32 to index
      %c0_54 = arith.constant 0 : index
      %162 = vector.load %arg12[%c1_53, %161, %c0_54] : memref<4x16x16xbf16, #tpu.memory_space<vmem>>, vector<1x16x16xbf16>
      %163 = vector.shape_cast %162 : vector<1x16x16xbf16> to vector<16x16xbf16>
      %164 = vector.shape_cast %160 : vector<16x16xbf16> to vector<1x16x16xbf16>
      tpu.vector_store %arg12[%c1_53, %161, %c0_54], %164 {strides = array<i32>} : memref<4x16x16xbf16, #tpu.memory_space<vmem>>, vector<1x16x16xbf16>,
      %165 = vector.extract_strided_slice %60 {offsets = [0, 32], sizes = [16, 16], strides = [1, 1]} : vector<16x192xf32> to vector<16x16xf32>
      %166 = vector.extract_strided_slice %60 {offsets = [0, 96], sizes = [16, 16], strides = [1, 1]} : vector<16x192xf32> to vector<16x16xf32>
      %167 = vector.extract_strided_slice %60 {offsets = [0, 160], sizes = [16, 16], strides = [1, 1]} : vector<16x192xf32> to vector<16x16xf32>
      %168 = vector.extract_strided_slice %165 {offsets = [0, 8], sizes = [16, 8], strides = [1, 1]} : vector<16x16xf32> to vector<16x8xf32>
      %169 = vector.extract_strided_slice %165 {offsets = [0, 0], sizes = [16, 8], strides = [1, 1]} : vector<16x16xf32> to vector<16x8xf32>
      %170 = tpu.concatenate %168, %169 in 1 : vector<16x8xf32>, vector<16x8xf32> -> vector<16x16xf32>
      %171 = arith.mulf %165, %42 : vector<16x16xf32>
      %172 = arith.mulf %170, %44 : vector<16x16xf32>
      %173 = arith.addf %171, %172 : vector<16x16xf32>
      %174 = arith.mulf %173, %173 : vector<16x16xf32>
      %cst_55 = arith.constant dense<0.000000e+00> : vector<16xf32>
      %175 = vector.multi_reduction <add>, %174, %cst_55 [1] : vector<16x16xf32> to vector<16xf32>
      %176 = vector.shape_cast %175 : vector<16xf32> to vector<16x1xf32>
      %cst_56 = arith.constant 1.600000e+01 : f32
      %177 = vector.broadcast %cst_56 : f32 to vector<16x1xf32>
      %178 = arith.divf %176, %177 : vector<16x1xf32>
      %cst_57 = arith.constant 1.1920929E-7 : f32
      %179 = vector.broadcast %cst_57 : f32 to vector<16x1xf32>
      %180 = arith.addf %178, %179 : vector<16x1xf32>
      %181 = math.rsqrt %180 : vector<16x1xf32>
      %182 = vector.broadcast %181 : vector<16x1xf32> to vector<16x16xf32>
      %183 = arith.mulf %173, %182 : vector<16x16xf32>
      %cst_58 = arith.constant 2.500000e-01 : f32
      %184 = vector.broadcast %cst_58 : f32 to vector<16x16xf32>
      %185 = arith.mulf %183, %184 : vector<16x16xf32>
      %186 = arith.truncf %185 : vector<16x16xf32> to vector<16x16xbf16>
      %c2 = arith.constant 2 : index
      %187 = arith.index_cast %40 : i32 to index
      %c0_59 = arith.constant 0 : index
      %188 = vector.load %arg10[%c2, %187, %c0_59] : memref<4x16x16xbf16, #tpu.memory_space<vmem>>, vector<1x16x16xbf16>
      %189 = vector.shape_cast %188 : vector<1x16x16xbf16> to vector<16x16xbf16>
      %190 = vector.shape_cast %186 : vector<16x16xbf16> to vector<1x16x16xbf16>
      tpu.vector_store %arg10[%c2, %187, %c0_59], %190 {strides = array<i32>} : memref<4x16x16xbf16, #tpu.memory_space<vmem>>, vector<1x16x16xbf16>,
      %191 = vector.extract_strided_slice %166 {offsets = [0, 8], sizes = [16, 8], strides = [1, 1]} : vector<16x16xf32> to vector<16x8xf32>
      %192 = vector.extract_strided_slice %166 {offsets = [0, 0], sizes = [16, 8], strides = [1, 1]} : vector<16x16xf32> to vector<16x8xf32>
      %193 = tpu.concatenate %191, %192 in 1 : vector<16x8xf32>, vector<16x8xf32> -> vector<16x16xf32>
      %194 = arith.mulf %166, %42 : vector<16x16xf32>
      %195 = arith.mulf %193, %44 : vector<16x16xf32>
      %196 = arith.addf %194, %195 : vector<16x16xf32>
      %197 = arith.mulf %196, %196 : vector<16x16xf32>
      %cst_60 = arith.constant dense<0.000000e+00> : vector<16xf32>
      %198 = vector.multi_reduction <add>, %197, %cst_60 [1] : vector<16x16xf32> to vector<16xf32>
      %199 = vector.shape_cast %198 : vector<16xf32> to vector<16x1xf32>
      %cst_61 = arith.constant 1.600000e+01 : f32
      %200 = vector.broadcast %cst_61 : f32 to vector<16x1xf32>
      %201 = arith.divf %199, %200 : vector<16x1xf32>
      %cst_62 = arith.constant 1.1920929E-7 : f32
      %202 = vector.broadcast %cst_62 : f32 to vector<16x1xf32>
      %203 = arith.addf %201, %202 : vector<16x1xf32>
      %204 = math.rsqrt %203 : vector<16x1xf32>
      %205 = vector.broadcast %204 : vector<16x1xf32> to vector<16x16xf32>
      %206 = arith.mulf %196, %205 : vector<16x16xf32>
      %207 = arith.truncf %206 : vector<16x16xf32> to vector<16x16xbf16>
      %c2_63 = arith.constant 2 : index
      %208 = arith.index_cast %40 : i32 to index
      %c0_64 = arith.constant 0 : index
      %209 = vector.load %arg11[%c2_63, %208, %c0_64] : memref<4x16x16xbf16, #tpu.memory_space<vmem>>, vector<1x16x16xbf16>
      %210 = vector.shape_cast %209 : vector<1x16x16xbf16> to vector<16x16xbf16>
      %211 = vector.shape_cast %207 : vector<16x16xbf16> to vector<1x16x16xbf16>
      tpu.vector_store %arg11[%c2_63, %208, %c0_64], %211 {strides = array<i32>} : memref<4x16x16xbf16, #tpu.memory_space<vmem>>, vector<1x16x16xbf16>,
      %212 = arith.truncf %167 : vector<16x16xf32> to vector<16x16xbf16>
      %c2_65 = arith.constant 2 : index
      %213 = arith.index_cast %40 : i32 to index
      %c0_66 = arith.constant 0 : index
      %214 = vector.load %arg12[%c2_65, %213, %c0_66] : memref<4x16x16xbf16, #tpu.memory_space<vmem>>, vector<1x16x16xbf16>
      %215 = vector.shape_cast %214 : vector<1x16x16xbf16> to vector<16x16xbf16>
      %216 = vector.shape_cast %212 : vector<16x16xbf16> to vector<1x16x16xbf16>
      tpu.vector_store %arg12[%c2_65, %213, %c0_66], %216 {strides = array<i32>} : memref<4x16x16xbf16, #tpu.memory_space<vmem>>, vector<1x16x16xbf16>,
      %217 = vector.extract_strided_slice %60 {offsets = [0, 48], sizes = [16, 16], strides = [1, 1]} : vector<16x192xf32> to vector<16x16xf32>
      %218 = vector.extract_strided_slice %60 {offsets = [0, 112], sizes = [16, 16], strides = [1, 1]} : vector<16x192xf32> to vector<16x16xf32>
      %219 = vector.extract_strided_slice %60 {offsets = [0, 176], sizes = [16, 16], strides = [1, 1]} : vector<16x192xf32> to vector<16x16xf32>
      %220 = vector.extract_strided_slice %217 {offsets = [0, 8], sizes = [16, 8], strides = [1, 1]} : vector<16x16xf32> to vector<16x8xf32>
      %221 = vector.extract_strided_slice %217 {offsets = [0, 0], sizes = [16, 8], strides = [1, 1]} : vector<16x16xf32> to vector<16x8xf32>
      %222 = tpu.concatenate %220, %221 in 1 : vector<16x8xf32>, vector<16x8xf32> -> vector<16x16xf32>
      %223 = arith.mulf %217, %42 : vector<16x16xf32>
      %224 = arith.mulf %222, %44 : vector<16x16xf32>
      %225 = arith.addf %223, %224 : vector<16x16xf32>
      %226 = arith.mulf %225, %225 : vector<16x16xf32>
      %cst_67 = arith.constant dense<0.000000e+00> : vector<16xf32>
      %227 = vector.multi_reduction <add>, %226, %cst_67 [1] : vector<16x16xf32> to vector<16xf32>
      %228 = vector.shape_cast %227 : vector<16xf32> to vector<16x1xf32>
      %cst_68 = arith.constant 1.600000e+01 : f32
      %229 = vector.broadcast %cst_68 : f32 to vector<16x1xf32>
      %230 = arith.divf %228, %229 : vector<16x1xf32>
      %cst_69 = arith.constant 1.1920929E-7 : f32
      %231 = vector.broadcast %cst_69 : f32 to vector<16x1xf32>
      %232 = arith.addf %230, %231 : vector<16x1xf32>
      %233 = math.rsqrt %232 : vector<16x1xf32>
      %234 = vector.broadcast %233 : vector<16x1xf32> to vector<16x16xf32>
      %235 = arith.mulf %225, %234 : vector<16x16xf32>
      %cst_70 = arith.constant 2.500000e-01 : f32
      %236 = vector.broadcast %cst_70 : f32 to vector<16x16xf32>
      %237 = arith.mulf %235, %236 : vector<16x16xf32>
      %238 = arith.truncf %237 : vector<16x16xf32> to vector<16x16xbf16>
      %c3 = arith.constant 3 : index
      %239 = arith.index_cast %40 : i32 to index
      %c0_71 = arith.constant 0 : index
      %240 = vector.load %arg10[%c3, %239, %c0_71] : memref<4x16x16xbf16, #tpu.memory_space<vmem>>, vector<1x16x16xbf16>
      %241 = vector.shape_cast %240 : vector<1x16x16xbf16> to vector<16x16xbf16>
      %242 = vector.shape_cast %238 : vector<16x16xbf16> to vector<1x16x16xbf16>
      tpu.vector_store %arg10[%c3, %239, %c0_71], %242 {strides = array<i32>} : memref<4x16x16xbf16, #tpu.memory_space<vmem>>, vector<1x16x16xbf16>,
      %243 = vector.extract_strided_slice %218 {offsets = [0, 8], sizes = [16, 8], strides = [1, 1]} : vector<16x16xf32> to vector<16x8xf32>
      %244 = vector.extract_strided_slice %218 {offsets = [0, 0], sizes = [16, 8], strides = [1, 1]} : vector<16x16xf32> to vector<16x8xf32>
      %245 = tpu.concatenate %243, %244 in 1 : vector<16x8xf32>, vector<16x8xf32> -> vector<16x16xf32>
      %246 = arith.mulf %218, %42 : vector<16x16xf32>
      %247 = arith.mulf %245, %44 : vector<16x16xf32>
      %248 = arith.addf %246, %247 : vector<16x16xf32>
      %249 = arith.mulf %248, %248 : vector<16x16xf32>
      %cst_72 = arith.constant dense<0.000000e+00> : vector<16xf32>
      %250 = vector.multi_reduction <add>, %249, %cst_72 [1] : vector<16x16xf32> to vector<16xf32>
      %251 = vector.shape_cast %250 : vector<16xf32> to vector<16x1xf32>
      %cst_73 = arith.constant 1.600000e+01 : f32
      %252 = vector.broadcast %cst_73 : f32 to vector<16x1xf32>
      %253 = arith.divf %251, %252 : vector<16x1xf32>
      %cst_74 = arith.constant 1.1920929E-7 : f32
      %254 = vector.broadcast %cst_74 : f32 to vector<16x1xf32>
      %255 = arith.addf %253, %254 : vector<16x1xf32>
      %256 = math.rsqrt %255 : vector<16x1xf32>
      %257 = vector.broadcast %256 : vector<16x1xf32> to vector<16x16xf32>
      %258 = arith.mulf %248, %257 : vector<16x16xf32>
      %259 = arith.truncf %258 : vector<16x16xf32> to vector<16x16xbf16>
      %c3_75 = arith.constant 3 : index
      %260 = arith.index_cast %40 : i32 to index
      %c0_76 = arith.constant 0 : index
      %261 = vector.load %arg11[%c3_75, %260, %c0_76] : memref<4x16x16xbf16, #tpu.memory_space<vmem>>, vector<1x16x16xbf16>
      %262 = vector.shape_cast %261 : vector<1x16x16xbf16> to vector<16x16xbf16>
      %263 = vector.shape_cast %259 : vector<16x16xbf16> to vector<1x16x16xbf16>
      tpu.vector_store %arg11[%c3_75, %260, %c0_76], %263 {strides = array<i32>} : memref<4x16x16xbf16, #tpu.memory_space<vmem>>, vector<1x16x16xbf16>,
      %264 = arith.truncf %219 : vector<16x16xf32> to vector<16x16xbf16>
      %c3_77 = arith.constant 3 : index
      %265 = arith.index_cast %40 : i32 to index
      %c0_78 = arith.constant 0 : index
      %266 = vector.load %arg12[%c3_77, %265, %c0_78] : memref<4x16x16xbf16, #tpu.memory_space<vmem>>, vector<1x16x16xbf16>
      %267 = vector.shape_cast %266 : vector<1x16x16xbf16> to vector<16x16xbf16>
      %268 = vector.shape_cast %264 : vector<16x16xbf16> to vector<1x16x16xbf16>
      tpu.vector_store %arg12[%c3_77, %265, %c0_78], %268 {strides = array<i32>} : memref<4x16x16xbf16, #tpu.memory_space<vmem>>, vector<1x16x16xbf16>,
      %c1_i32_79 = arith.constant 1 : i32
    } else {
    }
    %c16_i32 = arith.constant 16 : i32
    %3 = arith.muli %arg1, %c16_i32 : i32
    %4 = tpu.assume_multiple %3, 16 : i32
    %c0 = arith.constant 0 : index
    %5 = arith.index_cast %4 : i32 to index
    %c0_1 = arith.constant 0 : index
    %6 = vector.load %arg2[%c0, %5, %c0_1] : memref<1x16x64xf32, #tpu.memory_space<vmem>>, vector<1x16x64xf32>
    %7 = vector.shape_cast %6 : vector<1x16x64xf32> to vector<16x64xf32>
    %8 = tpu.iota {dimensions = array<i32: 0>} : vector<16x16xi32>
    %9 = tpu.iota {dimensions = array<i32: 1>} : vector<16x16xi32>
    %10 = arith.cmpi sge, %8, %9 : vector<16x16xi32>
    %c1_i32 = arith.constant 1 : i32
    %11 = arith.addi %arg1, %c1_i32 : i32
    %cst = arith.constant 0.000000e+00 : f32
    %12 = vector.broadcast %cst : f32 to vector<16x64xf32>
    %c0_i32_2 = arith.constant 0 : i32
    %c4_i32 = arith.constant 4 : i32
    %13 = arith.addi %c0_i32_2, %c4_i32 : i32
    %c1_i32_3 = arith.constant 1 : i32
    %14 = scf.for %arg13 = %c0_i32_2 to %13 step %c1_i32_3 iter_args(%arg14 = %12) -> (vector<16x64xf32>)  : i32 {
      %39 = arith.index_cast %arg13 : i32 to index
      %40 = arith.index_cast %4 : i32 to index
      %c0_18 = arith.constant 0 : index
      %41 = vector.load %arg10[%39, %40, %c0_18] : memref<4x16x16xbf16, #tpu.memory_space<vmem>>, vector<1x16x16xbf16>
      %42 = vector.shape_cast %41 : vector<1x16x16xbf16> to vector<16x16xbf16>
      %cst_19 = arith.constant -1.000000e+30 : f32
      %43 = vector.broadcast %cst_19 : f32 to vector<16x1xf32>
      %cst_20 = arith.constant 0.000000e+00 : f32
      %44 = vector.broadcast %cst_20 : f32 to vector<16x1xf32>
      %cst_21 = arith.constant 0.000000e+00 : f32
      %45 = vector.broadcast %cst_21 : f32 to vector<16x16xf32>
      %c0_i32_22 = arith.constant 0 : i32
      %46 = arith.subi %11, %c0_i32_22 : i32
      %47 = arith.addi %c0_i32_22, %46 : i32
      %c1_i32_23 = arith.constant 1 : i32
      %48:3 = scf.for %arg15 = %c0_i32_22 to %47 step %c1_i32_23 iter_args(%arg16 = %43, %arg17 = %44, %arg18 = %45) -> (vector<16x1xf32>, vector<16x1xf32>, vector<16x16xf32>)  : i32 {
        %c16_i32_27 = arith.constant 16 : i32
        %58 = arith.muli %arg15, %c16_i32_27 : i32
        %59 = tpu.assume_multiple %58, 16 : i32
        %60 = arith.index_cast %arg13 : i32 to index
        %61 = arith.index_cast %59 : i32 to index
        %c0_28 = arith.constant 0 : index
        %62 = vector.load %arg11[%60, %61, %c0_28] : memref<4x16x16xbf16, #tpu.memory_space<vmem>>, vector<1x16x16xbf16>
        %63 = vector.shape_cast %62 : vector<1x16x16xbf16> to vector<16x16xbf16>
        %64 = arith.index_cast %arg13 : i32 to index
        %65 = arith.index_cast %59 : i32 to index
        %c0_29 = arith.constant 0 : index
        %66 = vector.load %arg12[%64, %65, %c0_29] : memref<4x16x16xbf16, #tpu.memory_space<vmem>>, vector<1x16x16xbf16>
        %67 = vector.shape_cast %66 : vector<1x16x16xbf16> to vector<16x16xbf16>
        %cst_30 = arith.constant dense<0.000000e+00> : vector<16x16xf32>
        %68 = tpu.matmul %42, %63, %cst_30 {dimension_numbers = #tpu.dot_dimension_numbers<[1], [1], [0], [0], [0, 0, 1, 0], [], []>} : vector<16x16xbf16>, vector<16x16xbf16>, vector<16x16xf32> -> vector<16x16xf32>
        %69 = arith.cmpi slt, %arg15, %arg1 : i32
        %70 = vector.broadcast %69 : i1 to vector<16x16xi1>
        %71 = arith.ori %70, %10 : vector<16x16xi1>
        %cst_31 = arith.constant -1.000000e+30 : f32
        %72 = vector.broadcast %cst_31 : f32 to vector<16x16xf32>
        %73 = arith.select %71, %68, %72 : vector<16x16xi1>, vector<16x16xf32>
        %cst_32 = arith.constant dense<0xFF800000> : vector<16xf32>
        %74 = vector.multi_reduction <maximumf>, %73, %cst_32 [1] : vector<16x16xf32> to vector<16xf32>
        %75 = vector.shape_cast %74 : vector<16xf32> to vector<16x1xf32>
        %76 = arith.maximumf %arg16, %75 : vector<16x1xf32>
        %77 = arith.subf %arg16, %76 : vector<16x1xf32>
        %78 = math.exp %77 : vector<16x1xf32>
        %79 = vector.broadcast %76 : vector<16x1xf32> to vector<16x16xf32>
        %80 = arith.subf %73, %79 : vector<16x16xf32>
        %81 = math.exp %80 : vector<16x16xf32>
        %82 = arith.mulf %78, %arg17 : vector<16x1xf32>
        %cst_33 = arith.constant dense<0.000000e+00> : vector<16xf32>
        %83 = vector.multi_reduction <add>, %81, %cst_33 [1] : vector<16x16xf32> to vector<16xf32>
        %84 = vector.shape_cast %83 : vector<16xf32> to vector<16x1xf32>
        %85 = arith.addf %82, %84 : vector<16x1xf32>
        %86 = vector.broadcast %78 : vector<16x1xf32> to vector<16x16xf32>
        %87 = arith.mulf %86, %arg18 : vector<16x16xf32>
        %88 = arith.truncf %81 : vector<16x16xf32> to vector<16x16xbf16>
        %cst_34 = arith.constant dense<0.000000e+00> : vector<16x16xf32>
        %89 = tpu.matmul %88, %67, %cst_34 {dimension_numbers = #tpu.dot_dimension_numbers<[1], [0], [0], [1], [0, 0, 1, 1], [], []>} : vector<16x16xbf16>, vector<16x16xbf16>, vector<16x16xf32> -> vector<16x16xf32>
        %90 = arith.addf %87, %89 : vector<16x16xf32>
        scf.yield %76, %85, %90 : vector<16x1xf32>, vector<16x1xf32>, vector<16x16xf32>
      }
      %49 = tpu.reciprocal %48#1 {approx = true} : vector<16x1xf32> -> vector<16x1xf32>
      %50 = vector.broadcast %49 : vector<16x1xf32> to vector<16x16xf32>
      %51 = arith.mulf %48#2, %50 : vector<16x16xf32>
      %52 = arith.truncf %51 : vector<16x16xf32> to vector<16x16xbf16>
      %53 = arith.index_cast %arg13 : i32 to index
      %c0_24 = arith.constant 0 : index
      %c0_25 = arith.constant 0 : index
      %54 = vector.load %arg4[%53, %c0_24, %c0_25] : memref<4x16x64xbf16, #tpu.memory_space<vmem>>, vector<1x16x64xbf16>
      %55 = vector.shape_cast %54 : vector<1x16x64xbf16> to vector<16x64xbf16>
      %cst_26 = arith.constant dense<0.000000e+00> : vector<16x64xf32>
      %56 = tpu.matmul %52, %55, %cst_26 {dimension_numbers = #tpu.dot_dimension_numbers<[1], [0], [0], [1], [0, 0, 1, 1], [], []>} : vector<16x16xbf16>, vector<16x64xbf16>, vector<16x64xf32> -> vector<16x64xf32>
      %57 = arith.addf %arg14, %56 : vector<16x64xf32>
      scf.yield %57 : vector<16x64xf32>
    }
    %c4_i32_4 = arith.constant 4 : i32
    %15 = arith.addf %7, %14 : vector<16x64xf32>
    %16 = arith.mulf %15, %15 : vector<16x64xf32>
    %cst_5 = arith.constant dense<0.000000e+00> : vector<16xf32>
    %17 = vector.multi_reduction <add>, %16, %cst_5 [1] : vector<16x64xf32> to vector<16xf32>
    %18 = vector.shape_cast %17 : vector<16xf32> to vector<16x1xf32>
    %cst_6 = arith.constant 6.400000e+01 : f32
    %19 = vector.broadcast %cst_6 : f32 to vector<16x1xf32>
    %20 = arith.divf %18, %19 : vector<16x1xf32>
    %cst_7 = arith.constant 1.1920929E-7 : f32
    %21 = vector.broadcast %cst_7 : f32 to vector<16x1xf32>
    %22 = arith.addf %20, %21 : vector<16x1xf32>
    %23 = math.rsqrt %22 : vector<16x1xf32>
    %24 = vector.broadcast %23 : vector<16x1xf32> to vector<16x64xf32>
    %25 = arith.mulf %15, %24 : vector<16x64xf32>
    %26 = arith.truncf %25 : vector<16x64xf32> to vector<16x64xbf16>
    %c0_8 = arith.constant 0 : index
    %c0_9 = arith.constant 0 : index
    %27 = vector.load %arg5[%c0_8, %c0_9] : memref<64x256xbf16, #tpu.memory_space<vmem>>, vector<64x256xbf16>
    %cst_10 = arith.constant dense<0.000000e+00> : vector<16x256xf32>
    %28 = tpu.matmul %26, %27, %cst_10 {dimension_numbers = #tpu.dot_dimension_numbers<[1], [0], [0], [1], [0, 0, 1, 1], [], []>} : vector<16x64xbf16>, vector<64x256xbf16>, vector<16x256xf32> -> vector<16x256xf32>
    %cst_11 = arith.constant 0.000000e+00 : f32
    %29 = vector.broadcast %cst_11 : f32 to vector<16x256xf32>
    %30 = arith.maximumf %28, %29 : vector<16x256xf32>
    %31 = arith.mulf %30, %30 : vector<16x256xf32>
    %32 = arith.truncf %31 : vector<16x256xf32> to vector<16x256xbf16>
    %c0_12 = arith.constant 0 : index
    %c0_13 = arith.constant 0 : index
    %33 = vector.load %arg6[%c0_12, %c0_13] : memref<256x64xbf16, #tpu.memory_space<vmem>>, vector<256x64xbf16>
    %cst_14 = arith.constant dense<0.000000e+00> : vector<16x64xf32>
    %34 = tpu.matmul %32, %33, %cst_14 {dimension_numbers = #tpu.dot_dimension_numbers<[1], [0], [0], [1], [0, 0, 1, 1], [], []>} : vector<16x256xbf16>, vector<256x64xbf16>, vector<16x64xf32> -> vector<16x64xf32>
    %35 = arith.addf %15, %34 : vector<16x64xf32>
    %c0_15 = arith.constant 0 : index
    %c0_16 = arith.constant 0 : index
    %c0_17 = arith.constant 0 : index
    %36 = vector.load %arg9[%c0_15, %c0_16, %c0_17] : memref<1x16x64xf32, #tpu.memory_space<vmem>>, vector<1x16x64xf32>
    %37 = vector.shape_cast %36 : vector<1x16x64xf32> to vector<16x64xf32>
    %38 = vector.shape_cast %35 : vector<16x64xf32> to vector<1x16x64xf32>
    tpu.vector_store %arg9[%c0_15, %c0_16, %c0_17], %38 {strides = array<i32>} : memref<1x16x64xf32, #tpu.memory_space<vmem>>, vector<1x16x64xf32>,
    return
  }
  func.func @transform_0(%arg0: i32, %arg1: i32) -> (i32, i32, i32) {
    %c0_i32 = arith.constant 0 : i32
    %c0_i32_0 = arith.constant 0 : i32
    %c0_i32_1 = arith.constant 0 : i32
    return %arg0, %c0_i32, %c0_i32_0 : i32, i32, i32
  }
  func.func @transform_1(%arg0: i32, %arg1: i32) -> (i32, i32) {
    %c0_i32 = arith.constant 0 : i32
    %c0_i32_0 = arith.constant 0 : i32
    %c0_i32_1 = arith.constant 0 : i32
    return %c0_i32, %c0_i32_0 : i32, i32
  }
  func.func @transform_2(%arg0: i32, %arg1: i32) -> (i32, i32, i32) {
    %c0_i32 = arith.constant 0 : i32
    %c0_i32_0 = arith.constant 0 : i32
    %c0_i32_1 = arith.constant 0 : i32
    %c0_i32_2 = arith.constant 0 : i32
    return %c0_i32, %c0_i32_0, %c0_i32_1 : i32, i32, i32
  }
  func.func @transform_3(%arg0: i32, %arg1: i32) -> (i32, i32) {
    %c0_i32 = arith.constant 0 : i32
    %c0_i32_0 = arith.constant 0 : i32
    %c0_i32_1 = arith.constant 0 : i32
    return %c0_i32, %c0_i32_0 : i32, i32
  }
  func.func @transform_4(%arg0: i32, %arg1: i32) -> (i32, i32) {
    %c0_i32 = arith.constant 0 : i32
    %c0_i32_0 = arith.constant 0 : i32
    %c0_i32_1 = arith.constant 0 : i32
    return %c0_i32, %c0_i32_0 : i32, i32
  }
  func.func @transform_5(%arg0: i32, %arg1: i32) -> (i32, i32) {
    %c0_i32 = arith.constant 0 : i32
    %c0_i32_0 = arith.constant 0 : i32
    %c0_i32_1 = arith.constant 0 : i32
    return %c0_i32, %c0_i32_0 : i32, i32
  }
  func.func @transform_6(%arg0: i32, %arg1: i32) -> (i32, i32) {
    %c0_i32 = arith.constant 0 : i32
    %c0_i32_0 = arith.constant 0 : i32
    %c0_i32_1 = arith.constant 0 : i32
    return %c0_i32, %c0_i32_0 : i32, i32
  }
  func.func @transform_7(%arg0: i32, %arg1: i32) -> (i32, i32, i32) {
    %c0_i32 = arith.constant 0 : i32
    %c0_i32_0 = arith.constant 0 : i32
    return %arg0, %arg1, %c0_i32 : i32, i32, i32
  }
}

</mosaic_0001>

<bundles_post_ra>
// kernel: tpu_custom_call.1
= control target key start
LH: loop header
LB: loop body
LE: loop exit
PB: predicated region body
PF: predicated region fallthrough
CT: control target
= control target key end

     0   :  { %12 = vsyncpa [#allocation6], 0  ;;  %s3347_s0 = inlined_call_operand.vmem [shape: f32[2,16,64], index: 0, kind: input, shape index: {}]   ;;  %s3348_s1 = inlined_call_operand.vmem [shape: bf16[64,192], index: 1, kind: input, shape index: {}]   ;;  %s3349_s2 = inlined_call_operand.vmem [shape: bf16[4,16,64], index: 2, kind: input, shape index: {}]   ;;  %s3350_s3 = inlined_call_operand.vmem [shape: bf16[64,256], index: 3, kind: input, shape index: {}]   ;;  %s3351_s4 = inlined_call_operand.vmem [shape: bf16[256,64], index: 4, kind: input, shape index: {}]   ;;  %s3352_s5 = inlined_call_operand.hbm [shape: f32[16,16], index: 5, kind: input, shape index: {}]   ;;  %s3353_s6 = inlined_call_operand.hbm [shape: f32[16,16], index: 6, kind: input, shape index: {}]   ;;  %s3354_s7 = inlined_call_operand.hbm [shape: f32[2,16,64], index: 7, kind: output, shape index: {}]  }
   0x1   :  { %13 = vsyncpa [#allocation9], 0 }
   0x2   :  { %14 = vsyncpa [#allocation7], 0 }
   0x3   :  { %16 = vsyncpa [#allocation7 + $0x1], 0  ;;  %s2544_s24 = smov 0   ;;  %s2546_s25 = smov 0  }
   0x4   :  { %s2548_s26 = smov 0   ;;  %s2550_s27 = smov 0  }
   0x5   :  { %s2552_s28 = smov 0   ;;  %s2554_s29 = smov 0  }
   0x6 LB: > { %s1808_s30 = sadd.s32 4294967295, %s2440_s29   ;;  %s1809_s8 = sadd.s32 4294967294, %s2440_s29   ;;  %s2440_s29 = sphi %s2554_s29, %s22_s29   ;;  %s2436_s28 = sphi %s2552_s28, %s3389_s28   ;;  %s2432_s27 = sphi %s2550_s27, %s3388_s27   ;;  %s2428_s26 = sphi %s2548_s26, %s3387_s26   ;;  %s2424_s25 = sphi %s2546_s25, %s3386_s25   ;;  %s2420_s24 = sphi %s2544_s24, %s3385_s24  }
   0x7   : > { %s34_s9 = sadd.s32 1, %s2436_s28  ;;  %s195_s10 = sadd.s32 1, %s2428_s26 }
   0x8   : > { %p36_p0 = scmp.ge.s32.totalorder %s34_s9, 2  ;;  %p205_p1 = scmp.ne.s32.totalorder %s2428_s26, %s2424_s25 }
   0x9   : > { %p206_p2 = scmp.eq.s32.totalorder %s1808_s30, 1  ;;  %p211_p3 = scmp.ne.s32.totalorder %s2424_s25, %s2420_s24 }
   0xa   : > { %s3391_s9 = smov (%p36_p0, %s34_s9), 0  ;;  %p212_p5 = scmp.eq.s32.totalorder %s1809_s8, 1 }
   0xb   : > { %p2584_p4 = por %p206_p2, %p205_p1  ;;  %s190_s12 = ssub.s32 %s2436_s28, %s3391_s9 }
   0xc   : > { %p1810_p6 = scmp.ge.s32.totalorder %s2440_s29, 1  ;;  %p193_p7 = scmp.eq.s32.totalorder %s190_s12, 0 }
   0xd   : > { %p2591_p8 = por %p212_p5, %p211_p3  ;;  %p219_p9 = scmp.lt.s32.totalorder %s2440_s29, 3 }
   0xe   : > { %s2597_s14 = scalar_select %p193_p7, %s2428_s26, %s195_s10  }
   0xf   : > { %p2599_p10 = pnand %p1810_p6, %p219_p9  ;;  %p2603_p11 = scmp.eq.s32.totalorder %s1808_s30, 0 }
  0x10   : > { %s242_s19 = sshll.u32 %s3352_s5, 4  ;;  %s2482_s20 = smov [#allocation5]   ;;  %s243_s19 = int_to_ptr.hbm [resolvable:$true] %s242_s19 }
  0x11   : > { %p2032_p12 = pneg %p2599_p10  ;;  %s244_s21 = sshll.u32 %s2482_s20, 4  ;;  %s245_s21 = int_to_ptr.vmem [resolvable:$true] %s244_s21 }
  0x12   : > { %s256_s30 = sshll.u32 %s3353_s6, 4  ;;  %s2483_s8 = smov 128   ;;  %s257_s30 = int_to_ptr.hbm [resolvable:$true] %s256_s30 }
  0x13   : > { %p2033_p13 = pnand %p2603_p11, %p2032_p12  ;;  %s2484_s10 = smov 8  }
  0x14   : > { %s2485_s12 = smov [#allocation8]   ;;  %282 = sbr.rel (%p2599_p10) target bundleno = 2034 (0x7f2), region = 48 }
  0x15   : > { %2035 = dma.hbm_to_vmem [thread:$0]  (!%p2033_p13), %s243_s19, 256, %s245_s21, [#allocation6], %s2483_s8, %s2483_s8, %s2484_s10  }
  0x16   : > { %s258_s17 = sshll.u32 %s2485_s12, 4  ;;  %s259_s17 = int_to_ptr.vmem [resolvable:$true] %s258_s17 }
  0x17   : > { %2038 = dma.hbm_to_vmem [thread:$0]  (!%p2033_p13), %s257_s30, 256, %s259_s17, [#allocation9], %s2483_s8, %s2483_s8, %s2484_s10  }
  0x19   : > { %2407 = dma.done.wait (%p2603_p11), [#allocation6], 256  }
  0x1a   : > { %2409 = vsyncadd (%p2603_p11), [#allocation6], 4294967040 }
  0x1b   : > { %2411 = dma.done.wait (%p2603_p11), [#allocation9], 256  }
  0x1c   : > { %2413 = vsyncadd (%p2603_p11), [#allocation9], 4294967040  ;;  %p320_p0 = scmp.lt.s32.totalorder %s2432_s27, 1  ;;  %vm339_vm0 = vcmask 523264   ;;  %s3355_s16 = sand.u32 1, %s2424_s25   ;;  %v2486_v6 = vmov 64.0  }
  0x1d   : > { %s2645_s22 = sshll.u32 %s3355_s16, 4  ;;  %2198 = vrcp.f32 %v2486_v6  ;;  %v2647_v7 = vld [vmem:[#allocation5 + $0x8] sm:$0xff]  ;;  %s3356_s23 = smov 64   ;;  %v1846_v10 = vld [vmem:[%s3348_s1 + $0x30] sm:$0xf]  ;;  %v2667_v17 = vld [vmem:[#allocation5] sm:$0xff] }
  0x1e   : > { %s321_s18 = scalar_select %p320_p0, %s2432_s27, 1  ;;  %v1990_v11 = vld [vmem:[%s3348_s1 + $0x34] sm:$0xf0]  ;;  %v1989_v12 = vld [vmem:[%s3348_s1 + $0x34] sm:$0xf]  ;;  %547 = vrot.lane.b32.xlu2 %v2667_v17, %s3356_s23  ;;  %vm528_vm8 = vcmask 125952  }
  0x1f   : > { %s2488_s30 = smov 16   ;;  %s3362_s8 = smov 80   ;;  %v1847_v14 = vor.u32 %v1990_v11, %v1846_v10  ;;  %v1848_v15 = vld [vmem:[%s3348_s1 + $0x38] sm:$0xf0]  ;;  %v1838_v18 = vld [vmem:[%s3348_s1 + $0x20] sm:$0xf] }
  0x20   : > { %s1982_s15 = sshll.u32 %s321_s18, 4  ;;  %635 = vrot.lane.b32.xlu1 %v2647_v7, %s2488_s30  ;;  %v1851_v16 = vor.u32 %v1989_v12, %v1848_v15  ;;  %v1988_v19 = vld [vmem:[%s3348_s1 + $0x24] sm:$0xf0]  ;;  %v1987_v22 = vld [vmem:[%s3348_s1 + $0x24] sm:$0xf]  ;;  %s3358_s10 = smov 96  }
  0x21   : > { %s324_s21 = scalar_lea.vmem %s3347_s0, %s1982_s15  ;;  %435 = vmatpush.bf16.msra.mxu0 %v1847_v14  ;;  %s2490_s15 = smov 32   ;;  %v1839_v21 = vor.u32 %v1988_v19, %v1838_v18  ;;  %v1840_v23 = vld [vmem:[%s3348_s1 + $0x28] sm:$0xf0]  ;;  %v1830_v25 = vld [vmem:[%s3348_s1 + $0x10] sm:$0xf]  ;;  %vm473_vm9 = vcmask 64512  }
  0x22   : > { %v2632_v0 = vld [vmem:[%s324_s21] sm:$0xff]  ;;  %v2636_v2 = vld [vmem:[%s324_s21 + $0x8] sm:$0xff]  ;;  %449 = vmatpush.bf16.msra.mxu1 %v1851_v16  ;;  %v1843_v24 = vor.u32 %v1987_v22, %v1840_v23  ;;  %v1986_v26 = vld [vmem:[%s3348_s1 + $0x14] sm:$0xf0]  ;;  %s2493_s21 = smov 112   ;;  %s3368_s12 = smov 96  }
  0x23   : > { %v337_v1 = vmul.f32 %v2632_v0, %v2632_v0  ;;  %v338_v4 = vmul.f32 %v2636_v2, %v2636_v2  ;;  %v2199_v8 = vpop.eup %2198  ;;  %v1985_v27 = vld [vmem:[%s3348_s1 + $0x14] sm:$0xf]  ;;  %v1831_v29 = vor.u32 %v1986_v26, %v1830_v25  ;;  %v1832_v30 = vld [vmem:[%s3348_s1 + $0x18] sm:$0xf0]  ;;  %v1822_v32 = vld [vmem:[%s3348_s1] sm:$0xf] }
  0x24   : > { %v347_v9 = vmul.f32 64.0, %v2199_v8  ;;  %vm351_vm1 = vweird.f32 %v2199_v8  ;;  %v1835_v31 = vor.u32 %v1985_v27, %v1832_v30  ;;  %v1984_v33 = vld [vmem:[%s3348_s1 + $0x4] sm:$0xf0]  ;;  %v1983_v34 = vld [vmem:[%s3348_s1 + $0x4] sm:$0xf]  ;;  %s2494_s17 = smov 120  }
  0x25   : > { %v340_v3 = vsel %vm339_vm0, %v337_v1, 0.0  ;;  %v343_v5 = vsel %vm339_vm0, %v338_v4, 0.0  ;;  %436 = vmatpush.bf16.msra.mxu0 %v1839_v21  ;;  %v1823_v35 = vor.u32 %v1984_v33, %v1822_v32  ;;  %v1824_v36 = vld [vmem:[%s3348_s1 + $0x8] sm:$0xf0]  ;;  %s2495_s18 = smov 8   ;;  %s2496_s19 = smov 104  }
  0x26   : > { %341 = vadd.xlane.f32.xlu0 %v340_v3  ;;  %v348_v13 = vsub.f32 1.0, %v347_v9  ;;  %450 = vmatpush.bf16.msra.mxu1 %v1843_v24  ;;  %v1827_v38 = vor.u32 %v1983_v34, %v1824_v36  ;;  %s2497_s16 = smov 56   ;;  %s2498_s20 = smov 88   ;;  %vm484_vm10 = vcmask 130048  }
  0x27   : > { %633 = vrot.lane.b32.xlu2 %v2667_v17, %s2488_s30 }
  0x28   : > { %v349_v20 = vmul.f32 %v2199_v8, %v348_v13  ;;  %903 = vrot.lane.b32.xlu1 %v2667_v17, %s3358_s10  ;;  %s3360_s10 = smov 48  }
  0x29   : > { %437 = vmatpush.bf16.msra.mxu0 %v1831_v29  ;;  %v333_v29 = vld [vmem:[#allocation8] sm:$0xff] }
  0x2a   : > { %v350_v28 = vadd.f32 %v2199_v8, %v349_v20  ;;  %451 = vmatpush.bf16.msra.mxu1 %v1835_v31 }
  0x2c   : > { %v2711_v37 = vsel %vm351_vm1, %v2199_v8, %v350_v28 }
  0x2d   : > { %438 = vmatpush.bf16.msra.mxu0 %v1823_v35 }
  0x2e   : > { %344 = vadd.xlane.f32.xlu0 %v343_v5  ;;  %452 = vmatpush.bf16.msra.mxu1 %v1827_v38 }
  0x2f   : > { %720 = vrot.lane.b32.xlu2 %v2667_v17, %s3362_s8 }
  0x37   : > { %991 = vrot.lane.b32.xlu2 %v2667_v17, %s3360_s10 }
  0x3f   : > { %905 = vrot.lane.b32.xlu2 %v2647_v7, %s3368_s12 }
  0x42   : > { %549 = vrot.lane.b32.xlu0 %v2647_v7, %s3356_s23  ;;  %s2499_s23 = smov 72  }
  0x47   : > { %1074 = vrot.lane.b32.xlu2 %v2647_v7, %s2493_s21 }
  0x4a   : > { %722 = vrot.lane.b32.xlu0 %v2647_v7, %s3362_s8  ;;  %s2501_s8 = smov 40  }
  0x52   : > { %816 = vrot.lane.b32.xlu0 %v2667_v17, %s2490_s15 }
  0x5a   : > { %818 = vrot.lane.b32.xlu0 %v2647_v7, %s2490_s15 }
  0x62   : > { %993 = vrot.lane.b32.xlu0 %v2647_v7, %s3360_s10  ;;  %s2500_s10 = smov 24  }
  0x6a   : > { %1072 = vrot.lane.b32.xlu0 %v2667_v17, %s2493_s21 }
  0x78   : > { %v2737_v63 = vpop.permute.xlu2 %547 }
  0x81   : > { %v2741_v3 = vpop.permute.xlu2 %633 }
  0x89   : > { %v721_v5 = vpop.permute.xlu2 %720 }
  0x91   : > { %v992_v8 = vpop.permute.xlu2 %991 }
  0x92   : > { %v636_v21 = vpop.permute.xlu1 %635 }
  0x99   : > { %v342_v39 = vpop.xlane.xlu0 %341  ;;  %v906_v19 = vpop.permute.xlu2 %905 }
  0x9a   : > { %v353_v40 = vmul.f32 %v2711_v37, %v342_v39  ;;  %v2806_v30 = vpop.permute.xlu1 %903 }
  0x9c   : > { %v355_v41 = vadd.f32 1.1920929e-07, %v353_v40 }
  0x9e   : > { %2200 = vrsqrt.f32 %v355_v41  ;;  %vm363_vm3 = vweird.f32 %v355_v41 }
  0xa1   : > { %v345_v42 = vpop.xlane.xlu0 %344  ;;  %v2804_v26 = vpop.permute.xlu2 %1074 }
  0xa2   : > { %v354_v43 = vmul.f32 %v2711_v37, %v345_v42 }
  0xa4   : > { %v2201_v44 = vpop.eup %2200  ;;  %v356_v45 = vadd.f32 1.1920929e-07, %v354_v43 }
  0xa5   : > { %v358_v46 = vmul.f32 %v2201_v44, %v355_v41  ;;  %vm364_vm2 = vweird.f32 %v2201_v44 }
  0xa6   : > { %2202 = vrsqrt.f32 %v356_v45  ;;  %vm365_vm5 = vmor %vm363_vm3, %vm364_vm2  ;;  %vm373_vm6 = vweird.f32 %v356_v45 }
  0xa7   : > { %v359_v47 = vmul.f32 %v2201_v44, %v358_v46 }
  0xa9   : > { %v360_v48 = vmul.f32 0.5, %v359_v47 }
  0xab   : > { %v361_v50 = vsub.f32 1.5, %v360_v48 }
  0xac   : > { %v2203_v49 = vpop.eup %2202 }
  0xad   : > { %v368_v51 = vmul.f32 %v2203_v49, %v356_v45  ;;  %v362_v53 = vmul.f32 %v2201_v44, %v361_v50  ;;  %vm374_vm4 = vweird.f32 %v2203_v49 }
  0xae   : > { %vm375_vm7 = vmor %vm373_vm6, %vm374_vm4 }
  0xaf   : > { %v369_v52 = vmul.f32 %v2203_v49, %v368_v51  ;;  %v366_v57 = vsel %vm365_vm5, %v2201_v44, %v362_v53 }
  0xb0   : > { %v377_v59 = vmul.f32 %v366_v57, %v2632_v0 }
  0xb1   : > { %v370_v54 = vmul.f32 0.5, %v369_v52 }
  0xb3   : > { %v371_v55 = vsub.f32 1.5, %v370_v54 }
  0xb4   : > { %v2735_v62 = vpop.permute.xlu0 %549 }
  0xb5   : > { %v372_v56 = vmul.f32 %v2203_v49, %v371_v55 }
  0xb7   : > { %v376_v58 = vsel %vm375_vm7, %v2203_v49, %v372_v56 }
  0xb8   : > { %v378_v60 = vmul.f32 %v2636_v2, %v376_v58 }
  0xba   : > { %v379_v61 = vpack.c.bf16 %v378_v60, %v377_v59 }
  0xbc   : > { %1852 = vmatmul.msk.bf16.vlgmr.msra.gmra.mxu0 %vm339_vm0, %v379_v61  ;;  %1853 = vmatmul.msk.bf16.vlgmr.msra.gmra.mxu1 %vm339_vm0, %v379_v61  ;;  %v2739_v1 = vpop.permute.xlu0 %722 }
  0xc4   : > { %v817_v4 = vpop.permute.xlu0 %816 }
  0xcc   : > { %v819_v6 = vpop.permute.xlu0 %818 }
  0xd4   : > { %v994_v18 = vpop.permute.xlu0 %993 }
  0xdc   : > { %v2809_v33 = vpop.permute.xlu0 %1072 }
 0x139   : > { %v2743_v9 = vpop.f32.mrf.mxu0  ;;  %v454_v10 = vpop.f32.mrf.mxu1 }
 0x13a   : > { %v2745_v11 = vpack.c.bf16 %v454_v10, %v454_v10  ;;  %461 = vrot.lane.b32.xlu1 %v2743_v9, %s2494_s17  ;;  %467 = vrot.lane.b32.xlu2 %v2743_v9, %s2495_s18  ;;  %v2752_v12 = vmul.f32 %v817_v4, %v2743_v9  ;;  %v2759_v13 = vmul.f32 %v721_v5, %v2743_v9  ;;  %v334_v4 = vld [vmem:[#allocation8 + $0x8] sm:$0xff] }
 0x13b   : > { %v2762_v14 = vmul.f32 %v992_v8, %v2743_v9  ;;  %v476_v41 = vmul.f32 %v2743_v9, %v2667_v17 }
 0x13c   : > { %623 = vst.msk [vmem:[#allocation4] sm:$0xf] %vm528_vm8, %v2745_v11  ;;  %979 = vrot.lane.b32.xlu0 %v2745_v11, %s3368_s12 }
 0x141   : > { %v2764_v15 = vpop.f32.mrf.mxu0  ;;  %v456_v16 = vpop.f32.mrf.mxu1 }
 0x142   : > { %v2766_v20 = vpack.c.bf16 %v456_v16, %v456_v16  ;;  %625 = vrot.lane.b32.xlu1 %v2743_v9, %s2496_s19  ;;  %531 = vrot.lane.b32.xlu2 %v2743_v9, %s2497_s16  ;;  %v2771_v22 = vmul.f32 %v994_v18, %v2764_v15  ;;  %v2774_v23 = vmul.f32 %v906_v19, %v2764_v15 }
 0x143   : > { %v2780_v24 = vmul.f32 %v636_v21, %v2764_v15  ;;  %v2783_v25 = vmul.f32 %v819_v6, %v2764_v15 }
 0x144   : > { %624 = vst.msk [vmem:[#allocation4 + $0x4] sm:$0xf] %vm528_vm8, %v2766_v20  ;;  %533 = vrot.lane.b32.xlu0 %v2764_v15, %s2497_s16 }
 0x14a   : > { %808 = vrot.lane.b32.xlu1 %v2743_v9, %s2498_s20  ;;  %537 = vrot.lane.b32.xlu2 %v2743_v9, %s2499_s23 }
 0x14c   : > { %627 = vrot.lane.b32.xlu0 %v2764_v15, %s2496_s19 }
 0x152   : > { %895 = vrot.lane.b32.xlu1 %v2743_v9, %s2500_s10  ;;  %712 = vrot.lane.b32.xlu2 %v2743_v9, %s2501_s8 }
 0x154   : > { %810 = vrot.lane.b32.xlu0 %v2764_v15, %s2498_s20 }
 0x15a   : > { %798 = vrot.lane.b32.xlu1 %v2745_v11, %s2493_s21  ;;  %469 = vrot.lane.b32.xlu2 %v2764_v15, %s2495_s18 }
 0x15c   : > { %897 = vrot.lane.b32.xlu0 %v2764_v15, %s2500_s10  ;;  %s3370_s10 = smov 80  }
 0x162   : > { %463 = vrot.lane.b32.xlu1 %v2764_v15, %s2494_s17  ;;  %539 = vrot.lane.b32.xlu2 %v2764_v15, %s2499_s23  ;;  %s3371_s17 = smov 48  }
 0x16a   : > { %714 = vrot.lane.b32.xlu2 %v2764_v15, %s2501_s8  ;;  %s3369_s8 = smov 64  }
 0x172   : > { %800 = vrot.lane.b32.xlu2 %v2766_v20, %s2493_s21 }
 0x17a   : > { %981 = vrot.lane.b32.xlu2 %v2766_v20, %s3368_s12 }
 0x194   : > { %v468_v27 = vpop.permute.xlu2 %467 }
 0x19c   : > { %v532_v28 = vpop.permute.xlu2 %531 }
 0x1a4   : > { %v538_v31 = vpop.permute.xlu2 %537 }
 0x1a5   : > { %v543_v32 = vsel %vm473_vm9, %v532_v28, %v538_v31 }
 0x1a6   : > { %v555_v34 = vmul.f32 %v543_v32, %v333_v29 }
 0x1a8   : > { %559 = vrot.lane.b32.xlu2 %v555_v34, %s3369_s8 }
 0x1ac   : > { %v462_v35 = vpop.permute.xlu1 %461  ;;  %v713_v36 = vpop.permute.xlu2 %712 }
 0x1ad   : > { %v474_v38 = vsel %vm473_vm9, %v462_v35, %v468_v27  ;;  %v718_v48 = vsel %vm473_vm9, %v713_v36, %v532_v28 }
 0x1ae   : > { %v478_v39 = vmul.f32 %v474_v38, %v333_v29  ;;  %v980_v40 = vpop.permute.xlu0 %979  ;;  %v728_v52 = vmul.f32 %v718_v48, %v333_v29 }
 0x1af   : > { %987 = vst.msk [vmem:[#allocation4 + $0x10] sm:$0xf] %vm528_vm8, %v980_v40 }
 0x1b0   : > { %v2816_v42 = vadd.f32 %v478_v39, %v476_v41 }
 0x1b4   : > { %v626_v43 = vpop.permute.xlu1 %625  ;;  %v470_v44 = vpop.permute.xlu2 %469 }
 0x1b5   : > { %v631_v45 = vsel %vm473_vm9, %v626_v43, %v462_v35 }
 0x1b6   : > { %v641_v46 = vmul.f32 %v631_v45, %v333_v29  ;;  %v534_v47 = vpop.permute.xlu0 %533  ;;  %v477_v45 = vmul.f32 %v2764_v15, %v2647_v7  ;;  %v553_v7 = vmul.f32 %v2737_v63, %v2743_v9  ;;  %v639_v63 = vmul.f32 %v2741_v3, %v2743_v9 }
 0x1b8   : > { %645 = vrot.lane.b32.xlu1 %v641_v46, %s2488_s30 }
 0x1bc   : > { %v809_v49 = vpop.permute.xlu1 %808  ;;  %v540_v50 = vpop.permute.xlu2 %539 }
 0x1bd   : > { %v814_v51 = vsel %vm473_vm9, %v809_v49, %v626_v43  ;;  %v544_v17 = vsel %vm473_vm9, %v534_v47, %v540_v50  ;;  %v989_v55 = vsel %vm473_vm9, %v538_v31, %v809_v49 }
 0x1be   : > { %v824_v53 = vmul.f32 %v814_v51, %v333_v29  ;;  %v628_v54 = vpop.permute.xlu0 %627  ;;  %v999_v59 = vmul.f32 %v989_v55, %v333_v29 }
 0x1c0   : > { %828 = vrot.lane.b32.xlu0 %v824_v53, %s2490_s15  ;;  %732 = vrot.lane.b32.xlu1 %v728_v52, %s3370_s10  ;;  %v556_v53 = vmul.f32 %v544_v17, %v334_v4 }
 0x1c4   : > { %v896_v56 = vpop.permute.xlu1 %895  ;;  %v715_v57 = vpop.permute.xlu2 %714 }
 0x1c5   : > { %v1070_v58 = vsel %vm473_vm9, %v468_v27, %v896_v56  ;;  %v901_v8 = vsel %vm473_vm9, %v896_v56, %v713_v36  ;;  %v719_v10 = vsel %vm473_vm9, %v715_v57, %v534_v47  ;;  %v482_v47 = vmul.f32 %v2816_v42, %v2816_v42 }
 0x1c6   : > { %v1080_v60 = vmul.f32 %v1070_v58, %v333_v29  ;;  %v811_v61 = vpop.permute.xlu0 %810  ;;  %v911_v19 = vmul.f32 %v901_v8, %v333_v29  ;;  %v729_v21 = vmul.f32 %v719_v10, %v334_v4 }
 0x1c7   : > { %v815_v5 = vsel %vm473_vm9, %v811_v61, %v628_v54  ;;  %v990_v35 = vsel %vm473_vm9, %v540_v50, %v811_v61  ;;  %v485_v48 = vsel %vm484_vm10, %v482_v47, 0.0 }
 0x1c8   : > { %v825_v6 = vmul.f32 %v815_v5, %v334_v4  ;;  %1003 = vrot.lane.b32.xlu0 %v999_v59, %s3371_s17  ;;  %1084 = vrot.lane.b32.xlu2 %v1080_v60, %s2493_s21  ;;  %v1000_v40 = vmul.f32 %v990_v35, %v334_v4 }
 0x1cc   : > { %v799_v16 = vpop.permute.xlu1 %798  ;;  %v801_v18 = vpop.permute.xlu2 %800 }
 0x1cd   : > { %806 = vst.msk [vmem:[#allocation4 + $0x8] sm:$0xf] %vm528_vm8, %v799_v16  ;;  %v909_v16 = vmul.f32 %v2806_v30, %v2743_v9  ;;  %v2502_v30 = vmov 16.0  }
 0x1ce   : > { %807 = vst.msk [vmem:[#allocation4 + $0xc] sm:$0xf] %vm528_vm8, %v801_v18  ;;  %v898_v27 = vpop.permute.xlu0 %897  ;;  %2204 = vrcp.f32 %v2502_v30 }
 0x1cf   : > { %v902_v28 = vsel %vm473_vm9, %v898_v27, %v715_v57  ;;  %v1071_v31 = vsel %vm473_vm9, %v470_v44, %v898_v27 }
 0x1d0   : > { %v912_v32 = vmul.f32 %v902_v28, %v334_v4  ;;  %v1081_v34 = vmul.f32 %v1071_v31, %v334_v4  ;;  %915 = vrot.lane.b32.xlu0 %v911_v19, %s3368_s12  ;;  %734 = vrot.lane.b32.xlu2 %v729_v21, %s3370_s10 }
 0x1d2   : > { %917 = vrot.lane.b32.xlu1 %v912_v32, %s3368_s12 }
 0x1d4   : > { %v464_v36 = vpop.permute.xlu1 %463  ;;  %v982_v29 = vpop.permute.xlu2 %981 }
 0x1d5   : > { %v475_v38 = vsel %vm473_vm9, %v464_v36, %v470_v44  ;;  %v632_v39 = vsel %vm473_vm9, %v628_v54, %v464_v36  ;;  %988 = vst.msk [vmem:[#allocation4 + $0x14] sm:$0xf] %vm528_vm8, %v982_v29  ;;  %v2205_v31 = vpop.eup %2204 }
 0x1d6   : > { %v479_v41 = vmul.f32 %v475_v38, %v334_v4  ;;  %v642_v43 = vmul.f32 %v632_v39, %v334_v4  ;;  %v1078_v4 = vmul.f32 %v2809_v33, %v2743_v9  ;;  %v727_v33 = vmul.f32 %v2739_v1, %v2764_v15 }
 0x1d7   : > { %v492_v32 = vmul.f32 16.0, %v2205_v31  ;;  %vm496_vm11 = vweird.f32 %v2205_v31 }
 0x1d8   : > { %1005 = vrot.lane.b32.xlu2 %v1000_v40, %s3371_s17  ;;  %v2846_v46 = vadd.f32 %v479_v41, %v477_v45 }
 0x1da   : > { %v483_v44 = vmul.f32 %v2846_v46, %v2846_v46 }
 0x1dc   : > { %v488_v49 = vsel %vm484_vm10, %v483_v44, 0.0 }
 0x1fa   : > { %486 = vadd.xlane.f32.xlu0 %v485_v48 }
 0x1fc   : > { %489 = vadd.xlane.f32.xlu1 %v488_v49 }
 0x202   : > { %v560_v50 = vpop.permute.xlu2 %559 }
 0x203   : > { %v2856_v51 = vadd.f32 %v560_v50, %v553_v7 }
 0x205   : > { %v567_v52 = vmul.f32 %v2856_v51, %v2856_v51 }
 0x207   : > { %571 = vrot.lane.b32.xlu2 %v567_v52, %s3369_s8 }
 0x20e   : > { %561 = vrot.lane.b32.xlu0 %v556_v53, %s3369_s8 }
 0x216   : > { %647 = vrot.lane.b32.xlu0 %v642_v43, %s2488_s30 }
 0x21e   : > { %830 = vrot.lane.b32.xlu0 %v825_v6, %s2490_s15 }
 0x222   : > { %v1085_v60 = vpop.permute.xlu2 %1084 }
 0x223   : > { %v2886_v5 = vadd.f32 %v1085_v60, %v1078_v4 }
 0x225   : > { %v1092_v6 = vmul.f32 %v2886_v5, %v2886_v5 }
 0x226   : > { %1086 = vrot.lane.b32.xlu0 %v1081_v34, %s2493_s21  ;;  %v493_v34 = vsub.f32 1.0, %v492_v32 }
 0x228   : > { %v494_v35 = vmul.f32 %v2205_v31, %v493_v34 }
 0x22a   : > { %v646_v54 = vpop.permute.xlu1 %645  ;;  %v735_v10 = vpop.permute.xlu2 %734  ;;  %v495_v36 = vadd.f32 %v2205_v31, %v494_v35 }
 0x22b   : > { %v2867_v55 = vadd.f32 %v646_v54, %v639_v63  ;;  %v2901_v18 = vadd.f32 %v735_v10, %v727_v33 }
 0x22c   : > { %v2917_v29 = vsel %vm496_vm11, %v2205_v31, %v495_v36  ;;  %v1079_v31 = vmul.f32 %v2804_v26, %v2764_v15 }
 0x22d   : > { %v653_v56 = vmul.f32 %v2867_v55, %v2867_v55  ;;  %v741_v21 = vmul.f32 %v2901_v18, %v2901_v18 }
 0x22f   : > { %657 = vrot.lane.b32.xlu1 %v653_v56, %s2493_s21 }
 0x232   : > { %v829_v17 = vpop.permute.xlu0 %828  ;;  %v733_v57 = vpop.permute.xlu1 %732 }
 0x233   : > { %v2873_v58 = vadd.f32 %v829_v17, %v2752_v12  ;;  %v2876_v59 = vadd.f32 %v733_v57, %v2759_v13  ;;  %v1006_v38 = vpop.permute.xlu2 %1005  ;;  %v554_v17 = vmul.f32 %v2735_v62, %v2764_v15 }
 0x235   : > { %v836_v3 = vmul.f32 %v2873_v58, %v2873_v58  ;;  %v740_v61 = vmul.f32 %v2876_v59, %v2876_v59 }
 0x237   : > { %840 = vrot.lane.b32.xlu1 %v836_v3, %s3368_s12  ;;  %744 = vrot.lane.b32.xlu2 %v740_v61, %s3371_s17 }
 0x23a   : > { %v1004_v12 = vpop.permute.xlu0 %1003 }
 0x23b   : > { %v2889_v13 = vadd.f32 %v1004_v12, %v2762_v14 }
 0x23d   : > { %v1011_v8 = vmul.f32 %v2889_v13, %v2889_v13 }
 0x23f   : > { %1096 = vrot.lane.b32.xlu1 %v1092_v6, %s2488_s30  ;;  %1015 = vrot.lane.b32.xlu0 %v1011_v8, %s3370_s10 }
 0x242   : > { %v916_v14 = vpop.permute.xlu0 %915 }
 0x243   : > { %v2903_v19 = vadd.f32 %v916_v14, %v909_v16  ;;  %v2932_v16 = vadd.f32 %v1006_v38, %v2771_v22 }
 0x244   : > { %v918_v28 = vpop.permute.xlu1 %917 }
 0x245   : > { %v923_v27 = vmul.f32 %v2903_v19, %v2903_v19  ;;  %v2912_v1 = vadd.f32 %v918_v28, %v2774_v23 }
 0x247   : > { %927 = vrot.lane.b32.xlu2 %v923_v27, %s2490_s15  ;;  %746 = vrot.lane.b32.xlu0 %v741_v21, %s3371_s17  ;;  %v924_v9 = vmul.f32 %v2912_v1, %v2912_v1 }
 0x24f   : > { %929 = vrot.lane.b32.xlu0 %v924_v9, %s2490_s15 }
 0x261   : > { %v572_v47 = vpop.permute.xlu2 %571 }
 0x262   : > { %v577_v48 = vsel %vm484_vm10, %v572_v47, 0.0 }
 0x26d   : > { %v487_v39 = vpop.xlane.xlu0 %486 }
 0x26e   : > { %v498_v23 = vmul.f32 %v2917_v29, %v487_v39 }
 0x26f   : > { %v490_v40 = vpop.xlane.xlu1 %489 }
 0x270   : > { %v500_v41 = vadd.f32 1.1920929e-07, %v498_v23  ;;  %v499_v43 = vmul.f32 %v2917_v29, %v490_v40 }
 0x272   : > { %2206 = vrsqrt.f32 %v500_v41  ;;  %v501_v45 = vadd.f32 1.1920929e-07, %v499_v43  ;;  %vm508_vm13 = vweird.f32 %v500_v41 }
 0x274   : > { %2208 = vrsqrt.f32 %v501_v45  ;;  %vm518_vm1 = vweird.f32 %v501_v45 }
 0x278   : > { %v2207_v44 = vpop.eup %2206 }
 0x279   : > { %v503_v49 = vmul.f32 %v2207_v44, %v500_v41  ;;  %578 = vadd.xlane.f32.xlu0 %v577_v48  ;;  %vm509_vm12 = vweird.f32 %v2207_v44 }
 0x27a   : > { %v2209_v7 = vpop.eup %2208  ;;  %vm510_vm15 = vmor %vm508_vm13, %vm509_vm12 }
 0x27b   : > { %v504_v50 = vmul.f32 %v2207_v44, %v503_v49  ;;  %v513_v52 = vmul.f32 %v2209_v7, %v501_v45  ;;  %vm519_vm14 = vweird.f32 %v2209_v7 }
 0x27c   : > { %vm520_vm2 = vmor %vm518_vm1, %vm519_vm14 }
 0x27d   : > { %v505_v53 = vmul.f32 0.5, %v504_v50  ;;  %v514_v63 = vmul.f32 %v2209_v7, %v513_v52 }
 0x27f   : > { %v506_v54 = vsub.f32 1.5, %v505_v53  ;;  %v515_v56 = vmul.f32 0.5, %v514_v63 }
 0x280   : > { %v562_v57 = vpop.permute.xlu0 %561 }
 0x281   : > { %v507_v60 = vmul.f32 %v2207_v44, %v506_v54  ;;  %v516_v3 = vsub.f32 1.5, %v515_v56  ;;  %v2924_v61 = vadd.f32 %v562_v57, %v554_v17 }
 0x283   : > { %v511_v4 = vsel %vm510_vm15, %v2207_v44, %v507_v60  ;;  %v517_v12 = vmul.f32 %v2209_v7, %v516_v3  ;;  %v568_v6 = vmul.f32 %v2924_v61, %v2924_v61 }
 0x284   : > { %v522_v8 = vmul.f32 %v511_v4, %v2816_v42  ;;  %v1012_v42 = vmul.f32 %v2932_v16, %v2932_v16 }
 0x285   : > { %v521_v10 = vsel %vm520_vm2, %v2209_v7, %v517_v12  ;;  %573 = vrot.lane.b32.xlu1 %v568_v6, %s3369_s8 }
 0x286   : > { %v524_v62 = vmul.f32 0.25, %v522_v8  ;;  %v523_v33 = vmul.f32 %v521_v10, %v2846_v46 }
 0x288   : > { %v526_v14 = vpack.c.bf16 %v524_v62, %v524_v62  ;;  %v525_v21 = vmul.f32 0.25, %v523_v33  ;;  %v648_v27 = vpop.permute.xlu0 %647 }
 0x289   : > { %v2935_v28 = vadd.f32 %v648_v27, %v2780_v24 }
 0x28a   : > { %529 = vst.msk [vmem:[#allocation2] sm:$0xf] %vm528_vm8, %v526_v14  ;;  %v527_v9 = vpack.c.bf16 %v525_v21, %v525_v21 }
 0x28b   : > { %v654_v30 = vmul.f32 %v2935_v28, %v2935_v28 }
 0x28c   : > { %530 = vst.msk [vmem:[#allocation2 + $0x4] sm:$0xf] %vm528_vm8, %v527_v9 }
 0x28d   : > { %1017 = vrot.lane.b32.xlu1 %v1012_v42, %s3370_s10  ;;  %659 = vrot.lane.b32.xlu2 %v654_v30, %s2493_s21 }
 0x290   : > { %v831_v22 = vpop.permute.xlu0 %830 }
 0x291   : > { %v2946_v46 = vadd.f32 %v831_v22, %v2783_v25  ;;  %v745_v23 = vpop.permute.xlu2 %744 }
 0x292   : > { %v750_v43 = vsel %vm484_vm10, %v745_v23, 0.0 }
 0x293   : > { %v837_v24 = vmul.f32 %v2946_v46, %v2946_v46 }
 0x295   : > { %842 = vrot.lane.b32.xlu2 %v837_v24, %s3368_s12 }
 0x298   : > { %v1087_v32 = vpop.permute.xlu0 %1086 }
 0x299   : > { %v2953_v34 = vadd.f32 %v1087_v32, %v1079_v31 }
 0x29b   : > { %v1093_v35 = vmul.f32 %v2953_v34, %v2953_v34 }
 0x29d   : > { %1098 = vrot.lane.b32.xlu2 %v1093_v35, %s2488_s30 }
 0x2a1   : > { %v658_v36 = vpop.permute.xlu1 %657  ;;  %v928_v26 = vpop.permute.xlu2 %927 }
 0x2a2   : > { %v663_v25 = vsel %vm484_vm10, %v658_v36, 0.0  ;;  %v933_v41 = vsel %vm484_vm10, %v928_v26, 0.0 }
 0x2a3   : > { %664 = vadd.xlane.f32.xlu0 %v663_v25 }
 0x2a9   : > { %v841_v38 = vpop.permute.xlu1 %840 }
 0x2aa   : > { %v846_v39 = vsel %vm484_vm10, %v841_v38, 0.0 }
 0x2ab   : > { %847 = vadd.xlane.f32.xlu0 %v846_v39 }
 0x2b1   : > { %v1097_v40 = vpop.permute.xlu1 %1096  ;;  %v1016_v45 = vpop.permute.xlu0 %1015 }
 0x2b2   : > { %v1102_v15 = vsel %vm484_vm10, %v1097_v40, 0.0  ;;  %v1021_v47 = vsel %vm484_vm10, %v1016_v45, 0.0 }
 0x2b3   : > { %1103 = vadd.xlane.f32.xlu0 %v1102_v15 }
 0x2b7   : > { %934 = vadd.xlane.f32.xlu1 %v933_v41 }
 0x2b9   : > { %v747_v44 = vpop.permute.xlu0 %746 }
 0x2ba   : > { %v753_v63 = vsel %vm484_vm10, %v747_v44, 0.0 }
 0x2c1   : > { %v930_v48 = vpop.permute.xlu0 %929 }
 0x2c2   : > { %v936_v62 = vsel %vm484_vm10, %v930_v48, 0.0 }
 0x2c6   : > { %751 = vadd.xlane.f32.xlu2 %v750_v43 }
 0x2ce   : > { %1022 = vadd.xlane.f32.xlu2 %v1021_v47 }
 0x2e7   : > { %v660_v49 = vpop.permute.xlu2 %659 }
 0x2e8   : > { %v666_v7 = vsel %vm484_vm10, %v660_v49, 0.0 }
 0x2e9   : > { %667 = vadd.xlane.f32.xlu1 %v666_v7 }
 0x2ec   : > { %v579_v50 = vpop.xlane.xlu0 %578 }
 0x2ed   : > { %v583_v52 = vmul.f32 %v579_v50, %v2917_v29 }
 0x2ef   : > { %v585_v53 = vadd.f32 1.1920929e-07, %v583_v52  ;;  %v843_v54 = vpop.permute.xlu2 %842 }
 0x2f0   : > { %v849_v57 = vsel %vm484_vm10, %v843_v54, 0.0 }
 0x2f1   : > { %754 = vadd.xlane.f32.xlu1 %v753_v63  ;;  %2210 = vrsqrt.f32 %v585_v53  ;;  %vm593_vm4 = vweird.f32 %v585_v53 }
 0x2f7   : > { %v574_v56 = vpop.permute.xlu1 %573  ;;  %v2211_v60 = vpop.eup %2210 }
 0x2f8   : > { %v580_v17 = vsel %vm484_vm10, %v574_v56, 0.0  ;;  %v588_v3 = vmul.f32 %v2211_v60, %v585_v53  ;;  %v1099_v4 = vpop.permute.xlu2 %1098  ;;  %vm594_vm3 = vweird.f32 %v2211_v60 }
 0x2f9   : > { %581 = vadd.xlane.f32.xlu2 %v580_v17  ;;  %850 = vadd.xlane.f32.xlu1 %v849_v57  ;;  %v1105_v8 = vsel %vm484_vm10, %v1099_v4, 0.0  ;;  %vm595_vm5 = vmor %vm593_vm4, %vm594_vm3 }
 0x2fa   : > { %v589_v10 = vmul.f32 %v2211_v60, %v588_v3 }
 0x2fc   : > { %v590_v33 = vmul.f32 0.5, %v589_v10 }
 0x2fe   : > { %v591_v14 = vsub.f32 1.5, %v590_v33 }
 0x2ff   : > { %v1018_v12 = vpop.permute.xlu1 %1017 }
 0x300   : > { %v1024_v6 = vsel %vm484_vm10, %v1018_v12, 0.0  ;;  %v592_v21 = vmul.f32 %v2211_v60, %v591_v14 }
 0x301   : > { %1025 = vadd.xlane.f32.xlu0 %v1024_v6  ;;  %1106 = vadd.xlane.f32.xlu1 %v1105_v8 }
 0x302   : > { %937 = vadd.xlane.f32.xlu2 %v936_v62  ;;  %v596_v27 = vsel %vm595_vm5, %v2211_v60, %v592_v21 }
 0x303   : > { %v607_v9 = vmul.f32 %v596_v27, %v2856_v51 }
 0x305   : > { %v609_v22 = vpack.c.bf16 %v607_v9, %v607_v9 }
 0x316   : > { %v665_v42 = vpop.xlane.xlu0 %664 }
 0x317   : > { %v669_v30 = vmul.f32 %v665_v42, %v2917_v29 }
 0x319   : > { %v671_v24 = vadd.f32 1.1920929e-07, %v669_v30 }
 0x31a   : > { %613 = vrot.lane.b32.xlu1 %v609_v22, %s3369_s8 }
 0x31b   : > { %2212 = vrsqrt.f32 %v671_v24  ;;  %vm679_vm9 = vweird.f32 %v671_v24 }
 0x31e   : > { %v848_v31 = vpop.xlane.xlu0 %847 }
 0x31f   : > { %v852_v32 = vmul.f32 %v848_v31, %v2917_v29 }
 0x321   : > { %v854_v35 = vadd.f32 1.1920929e-07, %v852_v32  ;;  %v2213_v36 = vpop.eup %2212 }
 0x322   : > { %v674_v38 = vmul.f32 %v2213_v36, %v671_v24  ;;  %vm680_vm6 = vweird.f32 %v2213_v36 }
 0x323   : > { %2214 = vrsqrt.f32 %v854_v35  ;;  %vm2978_vm11 = vmor %vm679_vm9, %vm680_vm6  ;;  %vm862_vm3 = vweird.f32 %v854_v35 }
 0x324   : > { %v675_v40 = vmul.f32 %v2213_v36, %v674_v38 }
 0x326   : > { %v1104_v25 = vpop.xlane.xlu0 %1103  ;;  %v676_v43 = vmul.f32 0.5, %v675_v40 }
 0x327   : > { %v1108_v39 = vmul.f32 %v1104_v25, %v2917_v29 }
 0x328   : > { %v677_v48 = vsub.f32 1.5, %v676_v43 }
 0x329   : > { %v1110_v23 = vadd.f32 1.1920929e-07, %v1108_v39  ;;  %v2215_v26 = vpop.eup %2214 }
 0x32a   : > { %v935_v51 = vpop.xlane.xlu1 %934  ;;  %v857_v45 = vmul.f32 %v2215_v26, %v854_v35  ;;  %v678_v54 = vmul.f32 %v2213_v36, %v677_v48  ;;  %vm863_vm2 = vweird.f32 %v2215_v26 }
 0x32b   : > { %2216 = vrsqrt.f32 %v1110_v23  ;;  %v939_v15 = vmul.f32 %v935_v51, %v2917_v29  ;;  %vm1118_vm12 = vweird.f32 %v1110_v23  ;;  %vm864_vm4 = vmor %vm862_vm3, %vm863_vm2 }
 0x32c   : > { %v858_v49 = vmul.f32 %v2215_v26, %v857_v45  ;;  %v682_v8 = vsel %vm2978_vm11, %v2213_v36, %v678_v54 }
 0x32d   : > { %v941_v41 = vadd.f32 1.1920929e-07, %v939_v15  ;;  %v693_v9 = vmul.f32 %v682_v8, %v2867_v55 }
 0x32e   : > { %v859_v63 = vmul.f32 0.5, %v858_v49 }
 0x32f   : > { %2218 = vrsqrt.f32 %v941_v41  ;;  %vm949_vm15 = vweird.f32 %v941_v41  ;;  %v695_v32 = vmul.f32 0.25, %v693_v9 }
 0x330   : > { %v860_v6 = vsub.f32 1.5, %v859_v63 }
 0x331   : > { %v2217_v47 = vpop.eup %2216 }
 0x332   : > { %v1113_v44 = vmul.f32 %v2217_v47, %v1110_v23  ;;  %vm1119_vm7 = vweird.f32 %v2217_v47  ;;  %v861_v30 = vmul.f32 %v2215_v26, %v860_v6  ;;  %v697_v23 = vpack.c.bf16 %v695_v32, %v695_v32 }
 0x333   : > { %vm1120_vm13 = vmor %vm1118_vm12, %vm1119_vm7 }
 0x334   : > { %v1114_v7 = vmul.f32 %v2217_v47, %v1113_v44  ;;  %v865_v38 = vsel %vm864_vm4, %v2215_v26, %v861_v30 }
 0x335   : > { %v2219_v50 = vpop.eup %2218  ;;  %v876_v51 = vmul.f32 %v865_v38, %v2873_v58 }
 0x336   : > { %v1115_v52 = vmul.f32 0.5, %v1114_v7  ;;  %v944_v53 = vmul.f32 %v2219_v50, %v941_v41  ;;  %vm950_vm14 = vweird.f32 %v2219_v50 }
 0x337   : > { %vm951_vm1 = vmor %vm949_vm15, %vm950_vm14  ;;  %v878_v35 = vmul.f32 0.25, %v876_v51 }
 0x338   : > { %v1116_v56 = vsub.f32 1.5, %v1115_v52  ;;  %v945_v17 = vmul.f32 %v2219_v50, %v944_v53 }
 0x339   : > { %v752_v57 = vpop.xlane.xlu2 %751  ;;  %v880_v45 = vpack.c.bf16 %v878_v35, %v878_v35 }
 0x33a   : > { %v946_v3 = vmul.f32 0.5, %v945_v17  ;;  %v756_v4 = vmul.f32 %v752_v57, %v2917_v29  ;;  %v1117_v12 = vmul.f32 %v2217_v47, %v1116_v56 }
 0x33c   : > { %v947_v10 = vsub.f32 1.5, %v946_v3  ;;  %v758_v62 = vadd.f32 1.1920929e-07, %v756_v4  ;;  %v1121_v33 = vsel %vm1120_vm13, %v2217_v47, %v1117_v12 }
 0x33d   : > { %v1132_v14 = vmul.f32 %v1121_v33, %v2886_v5 }
 0x33e   : > { %2220 = vrsqrt.f32 %v758_v62  ;;  %v948_v21 = vmul.f32 %v2219_v50, %v947_v10  ;;  %vm766_vm6 = vweird.f32 %v758_v62 }
 0x33f   : > { %v1134_v27 = vpack.c.bf16 %v1132_v14, %v1132_v14 }
 0x340   : > { %v952_v42 = vsel %vm951_vm1, %v2219_v50, %v948_v21 }
 0x341   : > { %v1023_v22 = vpop.xlane.xlu2 %1022  ;;  %1138 = vrot.lane.b32.xlu2 %v1134_v27, %s2488_s30  ;;  %v963_v24 = vmul.f32 %v952_v42, %v2903_v19 }
 0x342   : > { %v1027_v31 = vmul.f32 %v1023_v22, %v2917_v29 }
 0x343   : > { %v965_v5 = vpack.c.bf16 %v963_v24, %v963_v24 }
 0x344   : > { %v2221_v36 = vpop.eup %2220  ;;  %v1029_v25 = vadd.f32 1.1920929e-07, %v1027_v31 }
 0x345   : > { %v761_v39 = vmul.f32 %v2221_v36, %v758_v62  ;;  %969 = vrot.lane.b32.xlu1 %v965_v5, %s2490_s15  ;;  %vm767_vm5 = vweird.f32 %v2221_v36 }
 0x346   : > { %2222 = vrsqrt.f32 %v1029_v25  ;;  %vm768_vm7 = vmor %vm766_vm6, %vm767_vm5  ;;  %vm1037_vm11 = vweird.f32 %v1029_v25 }
 0x347   : > { %v762_v55 = vmul.f32 %v2221_v36, %v761_v39 }
 0x349   : > { %v763_v40 = vmul.f32 0.5, %v762_v55  ;;  %701 = vrot.lane.b32.xlu2 %v697_v23, %s2493_s21 }
 0x34b   : > { %v764_v19 = vsub.f32 1.5, %v763_v40 }
 0x34c   : > { %v2223_v15 = vpop.eup %2222 }
 0x34d   : > { %v1032_v41 = vmul.f32 %v2223_v15, %v1029_v25  ;;  %v765_v43 = vmul.f32 %v2221_v36, %v764_v19  ;;  %vm1038_vm9 = vweird.f32 %v2223_v15 }
 0x34e   : > { %vm1039_vm12 = vmor %vm1037_vm11, %vm1038_vm9 }
 0x34f   : > { %v1033_v26 = vmul.f32 %v2223_v15, %v1032_v41  ;;  %v769_v47 = vsel %vm768_vm7, %v2221_v36, %v765_v43 }
 0x350   : > { %v780_v44 = vmul.f32 %v769_v47, %v2876_v59 }
 0x351   : > { %v1034_v48 = vmul.f32 0.5, %v1033_v26  ;;  %884 = vrot.lane.b32.xlu2 %v880_v45, %s3368_s12 }
 0x352   : > { %v782_v58 = vpack.c.bf16 %v780_v44, %v780_v44 }
 0x353   : > { %v1035_v49 = vsub.f32 1.5, %v1034_v48 }
 0x354   : > { %786 = vrot.lane.b32.xlu0 %v782_v58, %s3371_s17 }
 0x355   : > { %v1036_v7 = vmul.f32 %v2223_v15, %v1035_v49 }
 0x357   : > { %v1040_v50 = vsel %vm1039_vm12, %v2223_v15, %v1036_v7 }
 0x358   : > { %v1051_v52 = vmul.f32 %v1040_v50, %v2889_v13 }
 0x35a   : > { %v1053_v53 = vmul.f32 0.25, %v1051_v52 }
 0x35c   : > { %v668_v63 = vpop.xlane.xlu1 %667  ;;  %v1055_v54 = vpack.c.bf16 %v1053_v53, %v1053_v53 }
 0x35d   : > { %v670_v17 = vmul.f32 %v668_v63, %v2917_v29 }
 0x35e   : > { %1059 = vrot.lane.b32.xlu1 %v1055_v54, %s3370_s10 }
 0x35f   : > { %v3000_v60 = vadd.f32 1.1920929e-07, %v670_v17 }
 0x361   : > { %vm689_vm7 = vweird.f32 %v3000_v60 }
 0x364   : > { %v755_v59 = vpop.xlane.xlu1 %754 }
 0x365   : > { %v757_v56 = vmul.f32 %v755_v59, %v2917_v29 }
 0x367   : > { %v759_v57 = vadd.f32 1.1920929e-07, %v757_v56 }
 0x369   : > { %2224 = vrsqrt.f32 %v759_v57  ;;  %vm776_vm14 = vweird.f32 %v759_v57 }
 0x36a   : > { %2226 = vrsqrt.f32 %v3000_v60 }
 0x36c   : > { %v582_v3 = vpop.xlane.xlu2 %581  ;;  %v851_v4 = vpop.xlane.xlu1 %850 }
 0x36d   : > { %v584_v12 = vmul.f32 %v582_v3, %v2917_v29  ;;  %v853_v13 = vmul.f32 %v851_v4, %v2917_v29 }
 0x36f   : > { %v2225_v6 = vpop.eup %2224  ;;  %v586_v8 = vadd.f32 1.1920929e-07, %v584_v12  ;;  %v855_v10 = vadd.f32 1.1920929e-07, %v853_v13 }
 0x370   : > { %v771_v62 = vmul.f32 %v2225_v6, %v759_v57  ;;  %v3005_v14 = vpop.eup %2226  ;;  %vm777_vm13 = vweird.f32 %v2225_v6 }
 0x371   : > { %2228 = vrsqrt.f32 %v586_v8  ;;  %v684_v32 = vmul.f32 %v3005_v14, %v3000_v60  ;;  %vm778_vm15 = vmor %vm776_vm14, %vm777_vm13  ;;  %vm603_vm3 = vweird.f32 %v586_v8  ;;  %vm872_vm5 = vweird.f32 %v855_v10 }
 0x372   : > { %v772_v33 = vmul.f32 %v2225_v6, %v771_v62  ;;  %2230 = vrsqrt.f32 %v855_v10  ;;  %vm690_vm9 = vweird.f32 %v3005_v14 }
 0x373   : > { %v685_v40 = vmul.f32 %v3005_v14, %v684_v32  ;;  %vm3034_vm14 = vmor %vm689_vm7, %vm690_vm9 }
 0x374   : > { %v773_v21 = vmul.f32 0.5, %v772_v33  ;;  %v1107_v27 = vpop.xlane.xlu1 %1106  ;;  %v1026_v9 = vpop.xlane.xlu0 %1025 }
 0x375   : > { %v1109_v42 = vmul.f32 %v1107_v27, %v2917_v29  ;;  %v938_v30 = vpop.xlane.xlu2 %937  ;;  %v1028_v22 = vmul.f32 %v1026_v9, %v2917_v29  ;;  %v686_v44 = vmul.f32 0.5, %v685_v40 }
 0x376   : > { %v774_v24 = vsub.f32 1.5, %v773_v21  ;;  %v940_v31 = vmul.f32 %v938_v30, %v2917_v29 }
 0x377   : > { %v2229_v5 = vpop.eup %2228  ;;  %v3012_v36 = vadd.f32 1.1920929e-07, %v1109_v42  ;;  %v3014_v25 = vadd.f32 1.1920929e-07, %v1028_v22  ;;  %v687_v59 = vsub.f32 1.5, %v686_v44 }
 0x378   : > { %v2231_v38 = vpop.eup %2230  ;;  %v598_v39 = vmul.f32 %v2229_v5, %v586_v8  ;;  %v3016_v55 = vadd.f32 1.1920929e-07, %v940_v31  ;;  %v775_v23 = vmul.f32 %v2225_v6, %v774_v24  ;;  %vm604_vm1 = vweird.f32 %v2229_v5 }
 0x379   : > { %v867_v51 = vmul.f32 %v2231_v38, %v855_v10  ;;  %2232 = vrsqrt.f32 %v3012_v36  ;;  %vm873_vm2 = vweird.f32 %v2231_v38  ;;  %vm605_vm4 = vmor %vm603_vm3, %vm604_vm1  ;;  %vm1128_vm12 = vweird.f32 %v3012_v36 }
 0x37a   : > { %v599_v29 = vmul.f32 %v2229_v5, %v598_v39  ;;  %2234 = vrsqrt.f32 %v3016_v55  ;;  %v779_v35 = vsel %vm778_vm15, %v2225_v6, %v775_v23  ;;  %vm874_vm6 = vmor %vm872_vm5, %vm873_vm2  ;;  %vm959_vm2 = vweird.f32 %v3016_v55 }
 0x37b   : > { %v868_v19 = vmul.f32 %v2231_v38, %v867_v51  ;;  %2236 = vrsqrt.f32 %v3014_v25  ;;  %v781_v41 = vmul.f32 %v779_v35, %v2901_v18 }
 0x37c   : > { %v600_v15 = vmul.f32 0.5, %v599_v29 }
 0x37d   : > { %v869_v43 = vmul.f32 0.5, %v868_v19  ;;  %v783_v45 = vpack.c.bf16 %v781_v41, %v781_v41 }
 0x37e   : > { %v601_v26 = vsub.f32 1.5, %v600_v15 }
 0x37f   : > { %v2233_v47 = vpop.eup %2232  ;;  %v870_v48 = vsub.f32 1.5, %v869_v43  ;;  %788 = vrot.lane.b32.xlu0 %v783_v45, %s3371_s17 }
 0x380   : > { %v2235_v58 = vpop.eup %2234  ;;  %v1123_v49 = vmul.f32 %v2233_v47, %v3012_v36  ;;  %v602_v7 = vmul.f32 %v2229_v5, %v601_v26  ;;  %vm1129_vm11 = vweird.f32 %v2233_v47 }
 0x381   : > { %v2237_v50 = vpop.eup %2236  ;;  %v954_v18 = vmul.f32 %v2235_v58, %v3016_v55  ;;  %v871_v52 = vmul.f32 %v2231_v38, %v870_v48  ;;  %vm960_vm13 = vweird.f32 %v2235_v58  ;;  %vm1130_vm1 = vmor %vm1128_vm12, %vm1129_vm11 }
 0x382   : > { %v1124_v53 = vmul.f32 %v2233_v47, %v1123_v49  ;;  %v1042_v63 = vmul.f32 %v2237_v50, %v3014_v25  ;;  %v606_v54 = vsel %vm605_vm4, %v2229_v5, %v602_v7  ;;  %vm1048_vm15 = vweird.f32 %v2237_v50  ;;  %vm961_vm3 = vmor %vm959_vm2, %vm960_vm13 }
 0x383   : > { %v955_v56 = vmul.f32 %v2235_v58, %v954_v18  ;;  %v608_v17 = vmul.f32 %v606_v54, %v2924_v61  ;;  %v875_v57 = vsel %vm874_vm6, %v2231_v38, %v871_v52  ;;  %v688_v61 = vmul.f32 %v3005_v14, %v687_v59 }
 0x384   : > { %v1125_v3 = vmul.f32 0.5, %v1124_v53  ;;  %v1043_v4 = vmul.f32 %v2237_v50, %v1042_v63  ;;  %v877_v12 = vmul.f32 %v875_v57, %v2946_v46  ;;  %vm1047_vm4 = vweird.f32 %v3014_v25 }
 0x385   : > { %v956_v13 = vmul.f32 0.5, %v955_v56  ;;  %v610_v6 = vpack.c.bf16 %v608_v17, %v608_v17  ;;  %vm1049_vm5 = vmor %vm1047_vm4, %vm1048_vm15  ;;  %v692_v31 = vsel %vm3034_vm14, %v3005_v14, %v688_v61  ;;  %v3086_v7 = vmov 0.0  }
 0x386   : > { %v1126_v8 = vsub.f32 1.5, %v1125_v3  ;;  %v1044_v10 = vmul.f32 0.5, %v1043_v4  ;;  %v879_v62 = vmul.f32 0.25, %v877_v12  ;;  %v694_v55 = vmul.f32 %v692_v31, %v2935_v28 }
 0x387   : > { %v957_v33 = vsub.f32 1.5, %v956_v13  ;;  %615 = vrot.lane.b32.xlu1 %v610_v6, %s3369_s8 }
 0x388   : > { %v1045_v60 = vsub.f32 1.5, %v1044_v10  ;;  %v881_v21 = vpack.c.bf16 %v879_v62, %v879_v62  ;;  %v1127_v27 = vmul.f32 %v2233_v47, %v1126_v8  ;;  %v696_v51 = vmul.f32 0.25, %v694_v55 }
 0x389   : > { %v958_v9 = vmul.f32 %v2235_v58, %v957_v33 }
 0x38a   : > { %886 = vrot.lane.b32.xlu0 %v881_v21, %s3368_s12  ;;  %v1131_v42 = vsel %vm1130_vm1, %v2233_v47, %v1127_v27  ;;  %v1046_v30 = vmul.f32 %v2237_v50, %v1045_v60  ;;  %v698_v14 = vpack.c.bf16 %v696_v51, %v696_v51 }
 0x38b   : > { %v1133_v22 = vmul.f32 %v1131_v42, %v2953_v34  ;;  %v962_v24 = vsel %vm961_vm3, %v2235_v58, %v958_v9 }
 0x38c   : > { %v614_v5 = vpop.permute.xlu1 %613  ;;  %v964_v32 = vmul.f32 %v962_v24, %v2912_v1  ;;  %v1050_v36 = vsel %vm1049_vm5, %v2237_v50, %v1046_v30  ;;  %v3088_v50 = vmov 0.0  }
 0x38d   : > { %619 = vst.msk [vmem:[#allocation3] sm:$0xf] %vm528_vm8, %v614_v5  ;;  %v1135_v38 = vpack.c.bf16 %v1133_v22, %v1133_v22  ;;  %v1052_v25 = vmul.f32 %v1050_v36, %v2932_v16 }
 0x38e   : > { %v966_v39 = vpack.c.bf16 %v964_v32, %v964_v32 }
 0x38f   : > { %1140 = vrot.lane.b32.xlu1 %v1135_v38, %s2488_s30  ;;  %v1054_v34 = vmul.f32 0.25, %v1052_v25  ;;  %s3084_s30 = scalar_lea.vmem [#allocation10], %s2645_s22 }
 0x390   : > { %971 = vrot.lane.b32.xlu2 %v966_v39, %s2490_s15  ;;  %s3090_s15 = smov 0  }
 0x391   : > { %v1056_v23 = vpack.c.bf16 %v1054_v34, %v1054_v34 }
 0x393   : > { %1061 = vrot.lane.b32.xlu0 %v1056_v23, %s3370_s10 }
 0x398   : > { %703 = vrot.lane.b32.xlu2 %v698_v14, %s2493_s21 }
 0x39b   : > { %1148 = vrot.lane.b32.xlu0 %v2745_v11, %s3370_s10  ;;  %v1139_v1 = vpop.permute.xlu2 %1138  ;;  %v1162_v11 = vlaneseq }
 0x39c   : > { %1146 = vst.msk [vmem:[#allocation3 + $0x18] sm:$0xf] %vm528_vm8, %v1139_v1 }
 0x39d   : > { %v3063_v15 = vshrl.u32 %v1162_v11, 7  ;;  %v3069_v41 = vand.u32 127, %v1162_v11 }
 0x39f   : > { %vm1167_vm6 = vcmp.ge.s32.totalorder %v3063_v15, %v3069_v41 }
 0x3a0   : > { %1150 = vrot.lane.b32.xlu2 %v2766_v20, %s3370_s10  ;;  %v3067_v20 = vadd.s32 8, %v3063_v15 }
 0x3a2   : > { %vm1168_vm7 = vcmp.ge.s32.totalorder %v3067_v20, %v3069_v41 }
 0x3a3   : > { %v702_v16 = vpop.permute.xlu2 %701 }
 0x3a4   : > { %710 = vst.msk [vmem:[#allocation2 + $0x8] sm:$0xf] %vm528_vm8, %v702_v16 }
 0x3ab   : > { %v885_v28 = vpop.permute.xlu2 %884 }
 0x3ac   : > { %893 = vst.msk [vmem:[#allocation2 + $0x10] sm:$0xf] %vm528_vm8, %v885_v28 }
 0x3b7   : > { %v970_v29 = vpop.permute.xlu1 %969 }
 0x3b8   : > { %977 = vst.msk [vmem:[#allocation3 + $0x10] sm:$0xf] %vm528_vm8, %v970_v29 }
 0x3c6   : > { %v787_v40 = vpop.permute.xlu0 %786 }
 0x3c7   : > { %794 = vst.msk [vmem:[#allocation3 + $0x8] sm:$0xf] %vm528_vm8, %v787_v40 }
 0x3d0   : > { %v1060_v19 = vpop.permute.xlu1 %1059 }
 0x3d1   : > { %1068 = vst.msk [vmem:[#allocation2 + $0x18] sm:$0xf] %vm528_vm8, %v1060_v19 }
 0x3ea   : > { %v972_v35 = vpop.permute.xlu2 %971 }
 0x3eb   : > { %978 = vst.msk [vmem:[#allocation3 + $0x14] sm:$0xf] %vm528_vm8, %v972_v35 }
 0x3f1   : > { %v789_v26 = vpop.permute.xlu0 %788 }
 0x3f2   : > { %v704_v43 = vpop.permute.xlu2 %703  ;;  %795 = vst.msk [vmem:[#allocation3 + $0xc] sm:$0xf] %vm528_vm8, %v789_v26 }
 0x3f3   : > { %711 = vst.msk [vmem:[#allocation2 + $0xc] sm:$0xf] %vm528_vm8, %v704_v43 }
 0x3f9   : > { %v616_v45 = vpop.permute.xlu1 %615 }
 0x3fa   : > { %620 = vst.msk [vmem:[#allocation3 + $0x4] sm:$0xf] %vm528_vm8, %v616_v45  ;;  %v1151_v47 = vpop.permute.xlu2 %1150 }
 0x3fb   : > { %1157 = vst.msk [vmem:[#allocation4 + $0x1c] sm:$0xf] %vm528_vm8, %v1151_v47 }
 0x3fc   : > { %v887_v44 = vpop.permute.xlu0 %886 }
 0x3fd   : > { %894 = vst.msk [vmem:[#allocation2 + $0x14] sm:$0xf] %vm528_vm8, %v887_v44 }
 0x401   : > { %v1141_v48 = vpop.permute.xlu1 %1140 }
 0x402   : > { %1147 = vst.msk [vmem:[#allocation3 + $0x1c] sm:$0xf] %vm528_vm8, %v1141_v48 }
 0x405   : > { %v1062_v58 = vpop.permute.xlu0 %1061 }
 0x406   : > { %1069 = vst.msk [vmem:[#allocation2 + $0x1c] sm:$0xf] %vm528_vm8, %v1062_v58 }
 0x40d   : > { %v1149_v49 = vpop.permute.xlu0 %1148 }
 0x40e   : > { %1156 = vst.msk [vmem:[#allocation4 + $0x18] sm:$0xf] %vm528_vm8, %v1149_v49 }
 0x40f LB: >> { %s1854_s22 = sshll.u32 %s2452_s15, 1  ;;  %s1991_s21 = sshll.u32 %s2452_s15, 3  ;;  %v3109_v53 = vmov 0.0   ;;  %v3111_v63 = vmov 0.0   ;;  %v3113_v54 = vmov 0.0   ;;  %v3115_v59 = vmov 0.0   ;;  %s2452_s15 = sphi %s3090_s15, %s1175_s15   ;;  %v2448_v50 = vphi %v3088_v50, %v3383_v50   ;;  %v2444_v7 = vphi %v3086_v7, %v3382_v7  }
 0x410   : >> { %s1183_s12 = scalar_lea.vmem [#allocation2], %s1991_s21  ;;  %v3117_v56 = vmov -1e+30   ;;  %v3119_v17 = vmov -1e+30   ;;  %s3121_s19 = smov 0  }
 0x411   : >> { %v3105_v18 = vld [vmem:[%s1183_s12] sm:$0xf]  ;;  %v3107_v52 = vld [vmem:[%s1183_s12] sm:$0xf0] }
 0x412 LB: >>> { %s1856_s16 = sshll.u32 %s2480_s19, 4  ;;  %v1862_v4 = vor.u32 %v3107_v52, %v3105_v18  ;;  %p1241_p1 = scmp.lt.s32.totalorder %s2480_s19, 0  ;;  %s2480_s19 = sphi %s3121_s19, %s1189_s19   ;;  %v2476_v17 = vphi %v3119_v17, %v3381_v17   ;;  %v2472_v56 = vphi %v3117_v56, %v3380_v56   ;;  %v2468_v59 = vphi %v3115_v59, %v3379_v59   ;;  %v2464_v54 = vphi %v3113_v54, %v3378_v54   ;;  %v2460_v63 = vphi %v3111_v63, %v3377_v63   ;;  %v2456_v53 = vphi %v3109_v53, %v3376_v53  }
 0x413   : >>> { %s1199_s20 = sshra.s32 %s1856_s16, 3  ;;  %s1189_s19 = sadd.s32 1, %s2480_s19  }
 0x414   : >>> { %s1201_s23 = sadd.s32 %s1854_s22, %s1199_s20  ;;  %p1188_p2 = scmp.ge.s32.totalorder %s1189_s19, 1 }
 0x415   : >>> { %s1857_s8 = sshll.u32 %s1201_s23, 2  ;;  %s1313_s23 = scalar_lea.vmem (%p1188_p2), %s3349_s2, %s1991_s21 }
 0x416   : >>> { %s1203_s10 = scalar_lea.vmem [#allocation3], %s1857_s8  ;;  %s1207_s12 = scalar_lea.vmem [#allocation4], %s1857_s8  ;;  %v1996_v45 = vld [vmem:[%s1313_s23] sm:$0xff] (%p1188_p2) }
 0x417   : >>> { %v1993_v57 = vld [vmem:[%s1203_s10] sm:$0xff]  ;;  %s1242_s17 = scalar_select %p1241_p1, 1, 0 }
 0x418   : >>> { %v1225_v3 = vsel %vm484_vm10, %v1993_v57, 0  ;;  %v1994_v61 = vld [vmem:[%s1207_s12] sm:$0xff]  ;;  %s1175_s15 = sadd.s32 (%p1188_p2), 1, %s2452_s15  }
 0x419   : >>> { %1234 = vmatpush.bf16.xpose.msra.mxu0 %v1225_v3  ;;  %v1243_v12 = vstv %s1242_s17  ;;  %1298 = vmatpush.bf16.msra.mxu1 %v1994_v61  ;;  %p1172_p3 = scmp.ge.s32.totalorder (%p1188_p2), %s1175_s15, 4  }
 0x41a   : >>> { %vm1244_vm8 = vcmp.eq.s32.totalorder %v1243_v12, 1 }
 0x41b   : >>> { %vm1245_vm9 = vmor %vm1244_vm8, %vm1167_vm6 }
 0x41c   : >>> { %vm1246_vm11 = vmor %vm1244_vm8, %vm1168_vm7 }
 0x420   : >>> { %1867 = vmatmul.msk.bf16.vlgmr.msra.gmra.mxu0 %vm484_vm10, %v1862_v4 }
 0x421   : >> { %1333 = vmatpush.bf16.msra.mxu0 (%p1188_p2), %v1996_v45 }
 0x49d   : >>> { %v1236_v13 = vpop.f32.mrf.mxu0 }
 0x49e   : >>> { %v1247_v6 = vsel %vm1245_vm9, %v1236_v13, -1e+30 }
 0x49f   : >>> { %v1249_v8 = vsel %vm484_vm10, %v1247_v6, -inf }
 0x4a0   : >>> { %1250 = vmax.xlane.f32.xlu0 %v1249_v8 }
 0x4a5   : >>> { %v1238_v10 = vpop.f32.mrf.mxu0 }
 0x4a6   : >>> { %v1248_v62 = vsel %vm1246_vm11, %v1238_v10, -1e+30 }
 0x4a7   : >>> { %v1252_v33 = vsel %vm484_vm10, %v1248_v62, -inf }
 0x4a8   : >>> { %1253 = vmax.xlane.f32.xlu0 %v1252_v33 }
 0x513   : >>> { %v1251_v46 = vpop.xlane.xlu0 %1250 }
 0x514   : >>> { %v1255_v60 = vmax.f32 %v2476_v17, %v1251_v46  }
 0x516   : >>> { %v1257_v21 = vsub.f32 %v2476_v17, %v1255_v60  ;;  %v1263_v27 = vsub.f32 %v1247_v6, %v1255_v60  ;;  %v3381_v17 = vmov %v1255_v60 }
 0x518   : >>> { %v1265_v9 = vmul.f32 1.442695, %v1263_v27  ;;  %v1259_v39 = vmul.f32 1.442695, %v1257_v21 }
 0x51a   : >>> { %2238 = vpow2.f32 %v1265_v9 }
 0x51b   : >>> { %v1254_v42 = vpop.xlane.xlu0 %1253 }
 0x51c   : >>> { %v1256_v30 = vmax.f32 %v2472_v56, %v1254_v42  }
 0x51e   : >>> { %v1258_v22 = vsub.f32 %v2472_v56, %v1256_v30  ;;  %v1264_v24 = vsub.f32 %v1248_v62, %v1256_v30  ;;  %v3380_v56 = vmov %v1256_v30 }
 0x520   : >>> { %v1267_v31 = vmul.f32 1.442695, %v1264_v24  ;;  %v2239_v5 = vpop.eup %2238  ;;  %v1261_v55 = vmul.f32 1.442695, %v1258_v22 }
 0x521   : >>> { %v1271_v32 = vsel %vm484_vm10, %v2239_v5, 0.0 }
 0x522   : >>> { %2240 = vpow2.f32 %v1267_v31  ;;  %1272 = vadd.xlane.f32.xlu1 %v1271_v32 }
 0x523   : >>> { %2242 = vpow2.f32 %v1259_v39 }
 0x524   : >>> { %2244 = vpow2.f32 %v1261_v55 }
 0x528   : >>> { %v2241_v36 = vpop.eup %2240 }
 0x529   : >>> { %v1274_v38 = vsel %vm484_vm10, %v2241_v36, 0.0  ;;  %v1281_v25 = vpack.c.bf16 %v2241_v36, %v2239_v5  ;;  %v2243_v34 = vpop.eup %2242 }
 0x52a   : >>> { %1275 = vadd.xlane.f32.xlu1 %v1274_v38  ;;  %v1269_v23 = vmul.f32 %v2468_v59, %v2243_v34  ;;  %v2245_v1 = vpop.eup %2244  ;;  %v1279_v40 = vmul.f32 %v2460_v63, %v2243_v34 }
 0x52b   : >>> { %1872 = vmatmul.msk.bf16.vlgmr.msra.gmra.mxu1 %vm484_vm10, %v1281_v25  ;;  %v1270_v16 = vmul.f32 %v2464_v54, %v2245_v1  ;;  %v1280_v35 = vmul.f32 %v2456_v53, %v2245_v1 }
 0x595   : >>> { %v1273_v51 = vpop.xlane.xlu1 %1272 }
 0x596   : >>> { %v1277_v14 = vadd.f32 %v1273_v51, %v1269_v23  }
 0x598   : >>> { %v3379_v59 = vmov %v1277_v14  ;;  %2246 = vrcp.f32 (%p1188_p2), %v1277_v14 }
 0x59d   : >>> { %v1276_v28 = vpop.xlane.xlu1 %1275 }
 0x59e   : >>> { %v1278_v29 = vadd.f32 %v1276_v28, %v1270_v16   ;;  %v2247_v47 = vpop.eup (%p1188_p2), %2246 }
 0x5a0   : >>> { %v3378_v54 = vmov %v1278_v29  ;;  %2248 = vrcp.f32 (%p1188_p2), %v1278_v29 }
 0x5a6   : >> { %v2249_v44 = vpop.eup (%p1188_p2), %2248 }
 0x5a8   : >>> { %v1300_v19 = vpop.f32.mrf.mxu1 }
 0x5a9   : >>> { %v1305_v11 = vadd.f32 %v1300_v19, %v1279_v40  }
 0x5ab   : >>> { %v3377_v63 = vmov %v1305_v11  ;;  %v1309_v48 = vmul.f32 (%p1188_p2), %v2247_v47, %v1305_v11 }
 0x5af   : >> { %1191 = sbr.rel (!%p1188_p2) target bundleno = 1042 (0x412), region = 124 }
 0x5b0   : >>> { %v1302_v43 = vpop.f32.mrf.mxu1 }
 0x5b1   : >>> { %v1306_v26 = vadd.f32 %v1302_v43, %v1280_v35  }
 0x5b3   : >>> { %v3376_v53 = vmov %v1306_v26  ;;  %v1310_v58 = vmul.f32 (%p1188_p2), %v2249_v44, %v1306_v26 }
 0x5b4   : > { %v2004_v15 = vld [vmem:[%s3350_s3 + $0x34] sm:$0xf0] (%p1172_p3)  ;;  %v1907_v41 = vld [vmem:[%s3350_s3 + $0x38] sm:$0xf0] (%p1172_p3)  ;;  %v1897_v3 = vld [vmem:[%s3350_s3 + $0x20] sm:$0xf] (%p1172_p3) }
 0x5b5   : >> { %v1311_v49 = vpack.c.bf16 %v1310_v58, %v1309_v48  ;;  %v2002_v4 = vld [vmem:[%s3350_s3 + $0x24] sm:$0xf0] (%p1172_p3)  ;;  %v2001_v12 = vld [vmem:[%s3350_s3 + $0x24] sm:$0xf] (%p1172_p3)  ;;  %v1899_v6 = vld [vmem:[%s3350_s3 + $0x28] sm:$0xf0] (%p1172_p3) }
 0x5b6   : > { %v1898_v13 = vor.u32 (%p1172_p3), %v2002_v4, %v1897_v3  ;;  %v1902_v8 = vor.u32 (%p1172_p3), %v2001_v12, %v1899_v6  ;;  %v1889_v10 = vld [vmem:[%s3350_s3 + $0x10] sm:$0xf] (%p1172_p3)  ;;  %v2000_v62 = vld [vmem:[%s3350_s3 + $0x14] sm:$0xf0] (%p1172_p3)  ;;  %v1999_v33 = vld [vmem:[%s3350_s3 + $0x14] sm:$0xf] (%p1172_p3) }
 0x5b7   : >> { %1878 = vmatmul.msk.bf16.vlgmr.msra.gmra.mxu0 %vm484_vm10, %v1311_v49  ;;  %v1890_v61 = vor.u32 (%p1172_p3), %v2000_v62, %v1889_v10  ;;  %v1891_v46 = vld [vmem:[%s3350_s3 + $0x18] sm:$0xf0] (%p1172_p3)  ;;  %v1881_v60 = vld [vmem:[%s3350_s3] sm:$0xf] (%p1172_p3)  ;;  %v1998_v21 = vld [vmem:[%s3350_s3 + $0x4] sm:$0xf0] (%p1172_p3) }
 0x5b8   : > { %v1894_v27 = vor.u32 (%p1172_p3), %v1999_v33, %v1891_v46  ;;  %v1997_v9 = vld [vmem:[%s3350_s3 + $0x4] sm:$0xf] (%p1172_p3)  ;;  %v1883_v42 = vld [vmem:[%s3350_s3 + $0x8] sm:$0xf0] (%p1172_p3)  ;;  %v1882_v30 = vor.u32 (%p1172_p3), %v1998_v21, %v1881_v60  ;;  %v2012_v32 = vld [vmem:[%s3351_s4 + $0x38] sm:$0xff] (%p1172_p3)  ;;  %s2021_s20 = sshll.u32 (%p1172_p3), %s2432_s27, 4 }
 0x5b9   : > { %v1886_v22 = vor.u32 (%p1172_p3), %v1997_v9, %v1883_v42  ;;  %v2020_v36 = vld [vmem:[%s3351_s4 + $0x78] sm:$0xff] (%p1172_p3)  ;;  %1604 = vmatpush.bf16.msra.mxu2 (%p1172_p3), %v2012_v32  ;;  %v2011_v38 = vld [vmem:[%s3351_s4 + $0x30] sm:$0xff] (%p1172_p3)  ;;  %v2010_v34 = vld [vmem:[%s3351_s4 + $0x28] sm:$0xff] (%p1172_p3)  ;;  %s1650_s22 = scalar_lea.hbm (%p1172_p3), %s3354_s7, %s2021_s20  ;;  %s1651_s21 = sshll.u32 (%p1172_p3), %s3084_s30, 4  ;;  %s1652_s21 = int_to_ptr.vmem [resolvable:$true] %s1651_s21 }
 0x5ba   : > { %1618 = vmatpush.bf16.msra.mxu3 (%p1172_p3), %v2020_v36  ;;  %v2019_v25 = vld [vmem:[%s3351_s4 + $0x70] sm:$0xff] (%p1172_p3)  ;;  %v2018_v23 = vld [vmem:[%s3351_s4 + $0x68] sm:$0xff] (%p1172_p3)  ;;  %v2017_v16 = vld [vmem:[%s3351_s4 + $0x60] sm:$0xff] (%p1172_p3)  ;;  %s1653_s19 = sshll.u32 (%p1172_p3), %s1650_s22, 4  ;;  %s3384_s27 = sand.u32 (%p1172_p3), 1, %s2424_s25   ;;  %s1654_s19 = int_to_ptr.hbm [resolvable:$true] %s1653_s19 }
 0x5bb   : > { %s1637_s8 = scalar_lea.sflag (%p1172_p3), [#allocation7], %s3384_s27  ;;  %s2328_s10 = sshra.s32 (%p1172_p3), %s1654_s19, 4  ;;  %s2329_s10 = int_to_ptr.hbm [resolvable:$true] %s2328_s10 }
 0x5bc   : > { %s2330_s17 = scalar_lea.hbm (%p1172_p3), %s2329_s10, 16  ;;  %s2334_s20 = scalar_lea.hbm (%p1172_p3), %s3354_s7, 32 }
 0x5bd   : > { %1605 = vmatpush.bf16.msra.mxu2 (%p1172_p3), %v2011_v38  ;;  %p2331_p5 = scmp.ne.s32.totalorder (%p1172_p3), %s2329_s10, %s2330_s17  ;;  %p2335_p9 = scmp.lt.s32.totalorder (%p1172_p3), %s2329_s10, %s3354_s7 }
 0x5be   : > { %1619 = vmatpush.bf16.msra.mxu3 (%p1172_p3), %v2019_v25  ;;  %p2336_p10 = scmp.lt.s32.totalorder (%p1172_p3), %s2334_s20, %s2330_s17 }
 0x5bf   : > { %p2332_p6 = pnand (%p1172_p3), %p2331_p5, %p2584_p4 }
 0x5c0   : > { %p2337_p11 = por (%p1172_p3), %p2336_p10, %p2335_p9 }
 0x5c1   : > { %1606 = vmatpush.bf16.msra.mxu2 (%p1172_p3), %v2010_v34  ;;  %p2333_p7 = pneg (%p1172_p3), %p2332_p6 }
 0x5c2   : > { %1620 = vmatpush.bf16.msra.mxu3 (%p1172_p3), %v2018_v23 }
 0x5c3   : > { %p2338_p12 = pnand (%p1172_p3), %p2337_p11, %p2333_p7 }
 0x5c6   : > { %1621 = vmatpush.bf16.msra.mxu3 (%p1172_p3), %v2017_v16 }
 0x634   : >> { %v1335_v17 = vpop.f32.mrf.mxu0 }
 0x635   : >> { %v1340_v57 = vadd.f32 %v2448_v50, %v1335_v17  }
 0x637   : >> { %v3383_v50 = vmov %v1340_v57  ;;  %v3188_v53 = vadd.f32 (%p1172_p3), %v1340_v57, %v2632_v0  ;;  %v1905_v0 = vld [vmem:[%s3350_s3 + $0x30] sm:$0xf] (%p1172_p3)  ;;  %v2008_v57 = vld [vmem:[%s3351_s4 + $0x18] sm:$0xff] (%p1172_p3) }
 0x638   : > { %v1906_v20 = vor.u32 (%p1172_p3), %v2004_v15, %v1905_v0  ;;  %v2013_v0 = vld [vmem:[%s3351_s4 + $0x40] sm:$0xff] (%p1172_p3) }
 0x639   : > { %v1344_v63 = vmul.f32 (%p1172_p3), %v3188_v53, %v3188_v53 }
 0x63a   : > { %1442 = vmatpush.bf16.msra.mxu0 (%p1172_p3), %v1906_v20 }
 0x63b   : > { %1174 = sbr.rel (!%p1172_p3) target bundleno = 1039 (0x40f), region = 135  ;;  %v1347_v54 = vsel (%p1172_p3), %vm339_vm0, %v1344_v63, 0.0  ;;  %v2015_v63 = vld [vmem:[%s3351_s4 + $0x50] sm:$0xff] (%p1172_p3) }
 0x63c   : >> { %v1337_v18 = vpop.f32.mrf.mxu0  ;;  %1348 = vadd.xlane.f32.xlu0 (%p1172_p3), %v1347_v54  ;;  %v2006_v54 = vld [vmem:[%s3351_s4 + $0x8] sm:$0xff] (%p1172_p3) }
 0x63d   : >> { %v1341_v52 = vadd.f32 %v2444_v7, %v1337_v18   ;;  %v2016_v18 = vld [vmem:[%s3351_s4 + $0x58] sm:$0xff] (%p1172_p3) }
 0x63e   : > { %1443 = vmatpush.bf16.msra.mxu0 (%p1172_p3), %v1898_v13  ;;  %1622 = vmatpush.bf16.msra.mxu3 (%p1172_p3), %v2016_v18 }
 0x63f   : >> { %v3382_v7 = vmov %v1341_v52  ;;  %v3193_v50 = vadd.f32 (%p1172_p3), %v1341_v52, %v2636_v2  ;;  %v2003_v2 = vld [vmem:[%s3350_s3 + $0x34] sm:$0xf] (%p1172_p3) }
 0x640   : > { %v1910_v7 = vor.u32 %v2003_v2, %v1907_v41  ;;  %v2007_v52 = vld [vmem:[%s3351_s4 + $0x10] sm:$0xff] }
 0x641   : > { %v1345_v59 = vmul.f32 %v3193_v50, %v3193_v50 }
 0x642   : > { %1456 = vmatpush.bf16.msra.mxu1 %v1910_v7  ;;  %1444 = vmatpush.bf16.msra.mxu0 %v1890_v61 }
 0x643   : > { %v1350_v56 = vsel %vm339_vm0, %v1345_v59, 0.0  ;;  %1623 = vmatpush.bf16.msra.mxu3 %v2015_v63  ;;  %v2014_v59 = vld [vmem:[%s3351_s4 + $0x48] sm:$0xff] }
 0x644   : > { %1351 = vadd.xlane.f32.xlu0 %v1350_v56  ;;  %v2005_v56 = vld [vmem:[%s3351_s4] sm:$0xff] }
 0x646   : > { %1457 = vmatpush.bf16.msra.mxu1 %v1902_v8  ;;  %1445 = vmatpush.bf16.msra.mxu0 %v1882_v30 }
 0x647   : > { %1624 = vmatpush.bf16.msra.mxu3 %v2014_v59 }
 0x64a   : > { %1458 = vmatpush.bf16.msra.mxu1 %v1894_v27 }
 0x64b   : > { %1625 = vmatpush.bf16.msra.mxu3 %v2013_v0 }
 0x64e   : > { %1459 = vmatpush.bf16.msra.mxu1 %v1886_v22 }
 0x6af   : > { %v1349_v24 = vpop.xlane.xlu0 %1348 }
 0x6b0   : > { %v1360_v31 = vmul.f32 %v1349_v24, %v2711_v37 }
 0x6b2   : > { %v1362_v5 = vadd.f32 1.1920929e-07, %v1360_v31 }
 0x6b4   : > { %2250 = vrsqrt.f32 %v1362_v5  ;;  %vm1370_vm12 = vweird.f32 %v1362_v5 }
 0x6b7   : > { %v1352_v39 = vpop.xlane.xlu0 %1351 }
 0x6b8   : > { %v1361_v55 = vmul.f32 %v1352_v39, %v2711_v37  ;;  %v2009_v37 = vld [vmem:[%s3351_s4 + $0x20] sm:$0xff] }
 0x6b9   : > { %1607 = vmatpush.bf16.msra.mxu2 %v2009_v37 }
 0x6ba   : > { %v2251_v51 = vpop.eup %2250  ;;  %v1363_v14 = vadd.f32 1.1920929e-07, %v1361_v55 }
 0x6bb   : > { %v1365_v1 = vmul.f32 %v2251_v51, %v1362_v5  ;;  %vm1371_vm10 = vweird.f32 %v2251_v51 }
 0x6bc   : > { %2252 = vrsqrt.f32 %v1363_v14  ;;  %vm1372_vm14 = vmor %vm1370_vm12, %vm1371_vm10  ;;  %vm1380_vm15 = vweird.f32 %v1363_v14 }
 0x6bd   : > { %v1366_v28 = vmul.f32 %v2251_v51, %v1365_v1  ;;  %1608 = vmatpush.bf16.msra.mxu2 %v2008_v57 }
 0x6bf   : > { %v1367_v29 = vmul.f32 0.5, %v1366_v28 }
 0x6c1   : > { %v1368_v19 = vsub.f32 1.5, %v1367_v29  ;;  %1609 = vmatpush.bf16.msra.mxu2 %v2007_v52 }
 0x6c2   : > { %v2253_v40 = vpop.eup %2252 }
 0x6c3   : > { %v1375_v11 = vmul.f32 %v2253_v40, %v1363_v14  ;;  %v1369_v26 = vmul.f32 %v2251_v51, %v1368_v19  ;;  %vm1381_vm13 = vweird.f32 %v2253_v40 }
 0x6c4   : > { %vm1382_vm1 = vmor %vm1380_vm15, %vm1381_vm13 }
 0x6c5   : > { %v1376_v35 = vmul.f32 %v2253_v40, %v1375_v11  ;;  %v1373_v47 = vsel %vm1372_vm14, %v2251_v51, %v1369_v26  ;;  %1610 = vmatpush.bf16.msra.mxu2 %v2006_v54 }
 0x6c6   : > { %v1384_v58 = vmul.f32 %v1373_v47, %v3188_v53 }
 0x6c7   : > { %v1377_v43 = vmul.f32 0.5, %v1376_v35 }
 0x6c9   : > { %v1378_v45 = vsub.f32 1.5, %v1377_v43  ;;  %1611 = vmatpush.bf16.msra.mxu2 %v2005_v56 }
 0x6cb   : > { %v1379_v44 = vmul.f32 %v2253_v40, %v1378_v45 }
 0x6cd   : > { %v1383_v48 = vsel %vm1382_vm1, %v2253_v40, %v1379_v44 }
 0x6ce   : > { %v1385_v49 = vmul.f32 %v1383_v48, %v3193_v50 }
 0x6d0   : > { %v1386_v17 = vpack.c.bf16 %v1385_v49, %v1384_v58 }
 0x6d2   : > { %1911 = vmatmul.msk.bf16.vlgmr.msra.gmra.mxu0 %vm339_vm0, %v1386_v17  ;;  %1912 = vmatmul.msk.bf16.vlgmr.msra.gmra.mxu1 %vm339_vm0, %v1386_v17 }
 0x74f   : > { %v1447_v15 = vpop.f32.mrf.mxu0  ;;  %v1461_v2 = vpop.f32.mrf.mxu1 }
 0x750   : > { %v1466_v20 = vmax.f32 %v1447_v15, 0.0  ;;  %v1467_v41 = vmax.f32 %v1461_v2, 0.0 }
 0x752   : > { %v1470_v13 = vmul.f32 %v1466_v20, %v1466_v20  ;;  %v1471_v6 = vmul.f32 %v1467_v41, %v1467_v41 }
 0x757   : > { %v1449_v7 = vpop.f32.mrf.mxu0  ;;  %v1463_v3 = vpop.f32.mrf.mxu1 }
 0x758   : > { %v1468_v4 = vmax.f32 %v1449_v7, 0.0  ;;  %v1469_v12 = vmax.f32 %v1463_v3, 0.0 }
 0x75a   : > { %v1472_v8 = vmul.f32 %v1468_v4, %v1468_v4  ;;  %v1473_v10 = vmul.f32 %v1469_v12, %v1469_v12 }
 0x75c   : > { %v1474_v62 = vpack.c.bf16 %v1472_v8, %v1470_v13  ;;  %v1475_v33 = vpack.c.bf16 %v1473_v10, %v1471_v6 }
 0x75e   : > { %1612 = vmatmul.bf16.vlgmr.msra.gmra.mxu2 %v1474_v62  ;;  %1626 = vmatmul.bf16.vlgmr.msra.gmra.mxu3 %v1475_v33 }
 0x7e1   : > { %v1613_v61 = vpop.f32.mrf.mxu2  ;;  %v1627_v46 = vpop.f32.mrf.mxu3 }
 0x7e2   : > { %v1628_v60 = vadd.f32 %v1627_v46, %v1613_v61 }
 0x7e4   : > { %v1632_v21 = vadd.f32 %v1628_v60, %v3188_v53 }
 0x7e6   : > { %1634 = vst.msk [vmem:[%s3084_s30] sm:$0xff] %vm339_vm0, %v1632_v21 }
 0x7e9   : > { %v1615_v27 = vpop.f32.mrf.mxu2  ;;  %v1629_v9 = vpop.f32.mrf.mxu3 }
 0x7ea   : > { %v1630_v42 = vadd.f32 %v1629_v9, %v1615_v27 }
 0x7ec   : > { %v1633_v30 = vadd.f32 %v1630_v42, %v3193_v50 }
 0x7ee   : > { %1635 = vst.msk [vmem:[%s3084_s30 + $0x8] sm:$0xff] %vm339_vm0, %v1633_v30 }
 0x7ef   : > { %2341 = shalt.err (!%p2338_p12)
}
 0x7f0   : > { %s2503_s30 = smov 128  }
 0x7f1   : > { %2030 = dma.vmem_to_hbm [thread:$0]  (%p2584_p4), %s1652_s21, 256, %s1654_s19, %s1637_s8, %s2503_s30, %s2503_s30, %s2495_s18  }
 0x7f2 PF: > { %p2047_p13 = scmp.ge.s32.totalorder %s2440_s29, 2  ;;  %s1668_s22 = sand.u32 1, %s2420_s24  }
 0x7f3   : > { %s1669_s27 = scalar_lea.sflag [#allocation7], %s1668_s22 }
 0x7f4   : > { %p2040_p0 = pnand %p2047_p13, %p2591_p8 }
 0x7f6   : > { %p2041_p1 = pneg %p2040_p0 }
 0x7f8   : > { %2415 = dma.done.wait (%p2041_p1), %s1669_s27, 256  }
 0x7f9   : > { %2417 = vsyncadd (%p2041_p1), %s1669_s27, 4294967040  ;;  %s22_s29 = sadd.s32 1, %s2440_s29   ;;  %s3385_s24 = smov %s2424_s25 }
 0x7fa   : > { %p19_p2 = scmp.ge.s32.totalorder %s22_s29, 4   ;;  %s3386_s25 = smov %s2428_s26 }
 0x7fb   : > { %s3387_s26 = smov %s2597_s14  ;;  %s3388_s27 = smov %s2436_s28 }
 0x7fc   : > { %s3389_s28 = smov %s3391_s9  ;;  %21 = sbr.rel (!%p19_p2) target bundleno = 6 (0x6), region = 146 }
 0x801   :  { %1675 = vsyncpa [#allocation6], 1 }
 0x802   :  { %1677 = vsyncpa [#allocation6 + $0x1], 1 }
 0x803   :  { %1678 = vsyncpa [#allocation9], 1 }
 0x804   :  { %1679 = vsyncpa [#allocation7], 1 }
 0x805   :  { %1681 = vsyncpa [#allocation7 + $0x1], 1 }

// kernel: tpu_custom_call.1
= control target key start
LH: loop header
LB: loop body
LE: loop exit
PB: predicated region body
PF: predicated region fallthrough
CT: control target
= control target key end

     0   :  { %12 = vsyncpa [#allocation6], 0  ;;  %s3347_s0 = inlined_call_operand.vmem [shape: f32[2,16,64], index: 0, kind: input, shape index: {}]   ;;  %s3348_s1 = inlined_call_operand.vmem [shape: bf16[64,192], index: 1, kind: input, shape index: {}]   ;;  %s3349_s2 = inlined_call_operand.vmem [shape: bf16[4,16,64], index: 2, kind: input, shape index: {}]   ;;  %s3350_s3 = inlined_call_operand.vmem [shape: bf16[64,256], index: 3, kind: input, shape index: {}]   ;;  %s3351_s4 = inlined_call_operand.vmem [shape: bf16[256,64], index: 4, kind: input, shape index: {}]   ;;  %s3352_s5 = inlined_call_operand.hbm [shape: f32[16,16], index: 5, kind: input, shape index: {}]   ;;  %s3353_s6 = inlined_call_operand.hbm [shape: f32[16,16], index: 6, kind: input, shape index: {}]   ;;  %s3354_s7 = inlined_call_operand.hbm [shape: f32[2,16,64], index: 7, kind: output, shape index: {}]  }
   0x1   :  { %13 = vsyncpa [#allocation9], 0 }
   0x2   :  { %14 = vsyncpa [#allocation7], 0 }
   0x3   :  { %16 = vsyncpa [#allocation7 + $0x1], 0  ;;  %s2544_s24 = smov 0   ;;  %s2546_s25 = smov 0  }
   0x4   :  { %s2548_s26 = smov 0   ;;  %s2550_s27 = smov 0  }
   0x5   :  { %s2552_s28 = smov 0   ;;  %s2554_s29 = smov 0  }
   0x6 LB: > { %s1808_s30 = sadd.s32 4294967295, %s2440_s29   ;;  %s1809_s8 = sadd.s32 4294967294, %s2440_s29   ;;  %s2440_s29 = sphi %s2554_s29, %s22_s29   ;;  %s2436_s28 = sphi %s2552_s28, %s3389_s28   ;;  %s2432_s27 = sphi %s2550_s27, %s3388_s27   ;;  %s2428_s26 = sphi %s2548_s26, %s3387_s26   ;;  %s2424_s25 = sphi %s2546_s25, %s3386_s25   ;;  %s2420_s24 = sphi %s2544_s24, %s3385_s24  }
   0x7   : > { %s34_s9 = sadd.s32 1, %s2436_s28  ;;  %s195_s10 = sadd.s32 1, %s2428_s26 }
   0x8   : > { %p36_p0 = scmp.ge.s32.totalorder %s34_s9, 2  ;;  %p205_p1 = scmp.ne.s32.totalorder %s2428_s26, %s2424_s25 }
   0x9   : > { %p206_p2 = scmp.eq.s32.totalorder %s1808_s30, 1  ;;  %p211_p3 = scmp.ne.s32.totalorder %s2424_s25, %s2420_s24 }
   0xa   : > { %s3391_s9 = smov (%p36_p0, %s34_s9), 0  ;;  %p212_p5 = scmp.eq.s32.totalorder %s1809_s8, 1 }
   0xb   : > { %p2584_p4 = por %p206_p2, %p205_p1  ;;  %s190_s12 = ssub.s32 %s2436_s28, %s3391_s9 }
   0xc   : > { %p1810_p6 = scmp.ge.s32.totalorder %s2440_s29, 1  ;;  %p193_p7 = scmp.eq.s32.totalorder %s190_s12, 0 }
   0xd   : > { %p2591_p8 = por %p212_p5, %p211_p3  ;;  %p219_p9 = scmp.lt.s32.totalorder %s2440_s29, 3 }
   0xe   : > { %s2597_s14 = scalar_select %p193_p7, %s2428_s26, %s195_s10  }
   0xf   : > { %p2599_p10 = pnand %p1810_p6, %p219_p9  ;;  %p2603_p11 = scmp.eq.s32.totalorder %s1808_s30, 0 }
  0x10   : > { %s242_s19 = sshll.u32 %s3352_s5, 4  ;;  %s2482_s20 = smov [#allocation5]   ;;  %s243_s19 = int_to_ptr.hbm [resolvable:$true] %s242_s19 }
  0x11   : > { %p2032_p12 = pneg %p2599_p10  ;;  %s244_s21 = sshll.u32 %s2482_s20, 4  ;;  %s245_s21 = int_to_ptr.vmem [resolvable:$true] %s244_s21 }
  0x12   : > { %s256_s30 = sshll.u32 %s3353_s6, 4  ;;  %s2483_s8 = smov 128   ;;  %s257_s30 = int_to_ptr.hbm [resolvable:$true] %s256_s30 }
  0x13   : > { %p2033_p13 = pnand %p2603_p11, %p2032_p12  ;;  %s2484_s10 = smov 8  }
  0x14   : > { %s2485_s12 = smov [#allocation8]   ;;  %282 = sbr.rel (%p2599_p10) target bundleno = 2034 (0x7f2), region = 48 }
  0x15   : > { %2035 = dma.hbm_to_vmem [thread:$0]  (!%p2033_p13), %s243_s19, 256, %s245_s21, [#allocation6], %s2483_s8, %s2483_s8, %s2484_s10  }
  0x16   : > { %s258_s17 = sshll.u32 %s2485_s12, 4  ;;  %s259_s17 = int_to_ptr.vmem [resolvable:$true] %s258_s17 }
  0x17   : > { %2038 = dma.hbm_to_vmem [thread:$0]  (!%p2033_p13), %s257_s30, 256, %s259_s17, [#allocation9], %s2483_s8, %s2483_s8, %s2484_s10  }
  0x19   : > { %2407 = dma.done.wait (%p2603_p11), [#allocation6], 256  }
  0x1a   : > { %2409 = vsyncadd (%p2603_p11), [#allocation6], 4294967040 }
  0x1b   : > { %2411 = dma.done.wait (%p2603_p11), [#allocation9], 256  }
  0x1c   : > { %2413 = vsyncadd (%p2603_p11), [#allocation9], 4294967040  ;;  %p320_p0 = scmp.lt.s32.totalorder %s2432_s27, 1  ;;  %vm339_vm0 = vcmask 523264   ;;  %s3355_s16 = sand.u32 1, %s2424_s25   ;;  %v2486_v6 = vmov 64.0  }
  0x1d   : > { %s2645_s22 = sshll.u32 %s3355_s16, 4  ;;  %2198 = vrcp.f32 %v2486_v6  ;;  %v2647_v7 = vld [vmem:[#allocation5 + $0x8] sm:$0xff]  ;;  %s3356_s23 = smov 64   ;;  %v1846_v10 = vld [vmem:[%s3348_s1 + $0x30] sm:$0xf]  ;;  %v2667_v17 = vld [vmem:[#allocation5] sm:$0xff] }
  0x1e   : > { %s321_s18 = scalar_select %p320_p0, %s2432_s27, 1  ;;  %v1990_v11 = vld [vmem:[%s3348_s1 + $0x34] sm:$0xf0]  ;;  %v1989_v12 = vld [vmem:[%s3348_s1 + $0x34] sm:$0xf]  ;;  %547 = vrot.lane.b32.xlu2 %v2667_v17, %s3356_s23  ;;  %vm528_vm8 = vcmask 125952  }
  0x1f   : > { %s2488_s30 = smov 16   ;;  %s3362_s8 = smov 80   ;;  %v1847_v14 = vor.u32 %v1990_v11, %v1846_v10  ;;  %v1848_v15 = vld [vmem:[%s3348_s1 + $0x38] sm:$0xf0]  ;;  %v1838_v18 = vld [vmem:[%s3348_s1 + $0x20] sm:$0xf] }
  0x20   : > { %s1982_s15 = sshll.u32 %s321_s18, 4  ;;  %635 = vrot.lane.b32.xlu1 %v2647_v7, %s2488_s30  ;;  %v1851_v16 = vor.u32 %v1989_v12, %v1848_v15  ;;  %v1988_v19 = vld [vmem:[%s3348_s1 + $0x24] sm:$0xf0]  ;;  %v1987_v22 = vld [vmem:[%s3348_s1 + $0x24] sm:$0xf]  ;;  %s3358_s10 = smov 96  }
  0x21   : > { %s324_s21 = scalar_lea.vmem %s3347_s0, %s1982_s15  ;;  %435 = vmatpush.bf16.msra.mxu0 %v1847_v14  ;;  %s2490_s15 = smov 32   ;;  %v1839_v21 = vor.u32 %v1988_v19, %v1838_v18  ;;  %v1840_v23 = vld [vmem:[%s3348_s1 + $0x28] sm:$0xf0]  ;;  %v1830_v25 = vld [vmem:[%s3348_s1 + $0x10] sm:$0xf]  ;;  %vm473_vm9 = vcmask 64512  }
  0x22   : > { %v2632_v0 = vld [vmem:[%s324_s21] sm:$0xff]  ;;  %v2636_v2 = vld [vmem:[%s324_s21 + $0x8] sm:$0xff]  ;;  %449 = vmatpush.bf16.msra.mxu1 %v1851_v16  ;;  %v1843_v24 = vor.u32 %v1987_v22, %v1840_v23  ;;  %v1986_v26 = vld [vmem:[%s3348_s1 + $0x14] sm:$0xf0]  ;;  %s2493_s21 = smov 112   ;;  %s3368_s12 = smov 96  }
  0x23   : > { %v337_v1 = vmul.f32 %v2632_v0, %v2632_v0  ;;  %v338_v4 = vmul.f32 %v2636_v2, %v2636_v2  ;;  %v2199_v8 = vpop.eup %2198  ;;  %v1985_v27 = vld [vmem:[%s3348_s1 + $0x14] sm:$0xf]  ;;  %v1831_v29 = vor.u32 %v1986_v26, %v1830_v25  ;;  %v1832_v30 = vld [vmem:[%s3348_s1 + $0x18] sm:$0xf0]  ;;  %v1822_v32 = vld [vmem:[%s3348_s1] sm:$0xf] }
  0x24   : > { %v347_v9 = vmul.f32 64.0, %v2199_v8  ;;  %vm351_vm1 = vweird.f32 %v2199_v8  ;;  %v1835_v31 = vor.u32 %v1985_v27, %v1832_v30  ;;  %v1984_v33 = vld [vmem:[%s3348_s1 + $0x4] sm:$0xf0]  ;;  %v1983_v34 = vld [vmem:[%s3348_s1 + $0x4] sm:$0xf]  ;;  %s2494_s17 = smov 120  }
  0x25   : > { %v340_v3 = vsel %vm339_vm0, %v337_v1, 0.0  ;;  %v343_v5 = vsel %vm339_vm0, %v338_v4, 0.0  ;;  %436 = vmatpush.bf16.msra.mxu0 %v1839_v21  ;;  %v1823_v35 = vor.u32 %v1984_v33, %v1822_v32  ;;  %v1824_v36 = vld [vmem:[%s3348_s1 + $0x8] sm:$0xf0]  ;;  %s2495_s18 = smov 8   ;;  %s2496_s19 = smov 104  }
  0x26   : > { %341 = vadd.xlane.f32.xlu0 %v340_v3  ;;  %v348_v13 = vsub.f32 1.0, %v347_v9  ;;  %450 = vmatpush.bf16.msra.mxu1 %v1843_v24  ;;  %v1827_v38 = vor.u32 %v1983_v34, %v1824_v36  ;;  %s2497_s16 = smov 56   ;;  %s2498_s20 = smov 88   ;;  %vm484_vm10 = vcmask 130048  }
  0x27   : > { %633 = vrot.lane.b32.xlu2 %v2667_v17, %s2488_s30 }
  0x28   : > { %v349_v20 = vmul.f32 %v2199_v8, %v348_v13  ;;  %903 = vrot.lane.b32.xlu1 %v2667_v17, %s3358_s10  ;;  %s3360_s10 = smov 48  }
  0x29   : > { %437 = vmatpush.bf16.msra.mxu0 %v1831_v29  ;;  %v333_v29 = vld [vmem:[#allocation8] sm:$0xff] }
  0x2a   : > { %v350_v28 = vadd.f32 %v2199_v8, %v349_v20  ;;  %451 = vmatpush.bf16.msra.mxu1 %v1835_v31 }
  0x2c   : > { %v2711_v37 = vsel %vm351_vm1, %v2199_v8, %v350_v28 }
  0x2d   : > { %438 = vmatpush.bf16.msra.mxu0 %v1823_v35 }
  0x2e   : > { %344 = vadd.xlane.f32.xlu0 %v343_v5  ;;  %452 = vmatpush.bf16.msra.mxu1 %v1827_v38 }
  0x2f   : > { %720 = vrot.lane.b32.xlu2 %v2667_v17, %s3362_s8 }
  0x37   : > { %991 = vrot.lane.b32.xlu2 %v2667_v17, %s3360_s10 }
  0x3f   : > { %905 = vrot.lane.b32.xlu2 %v2647_v7, %s3368_s12 }
  0x42   : > { %549 = vrot.lane.b32.xlu0 %v2647_v7, %s3356_s23  ;;  %s2499_s23 = smov 72  }
  0x47   : > { %1074 = vrot.lane.b32.xlu2 %v2647_v7, %s2493_s21 }
  0x4a   : > { %722 = vrot.lane.b32.xlu0 %v2647_v7, %s3362_s8  ;;  %s2501_s8 = smov 40  }
  0x52   : > { %816 = vrot.lane.b32.xlu0 %v2667_v17, %s2490_s15 }
  0x5a   : > { %818 = vrot.lane.b32.xlu0 %v2647_v7, %s2490_s15 }
  0x62   : > { %993 = vrot.lane.b32.xlu0 %v2647_v7, %s3360_s10  ;;  %s2500_s10 = smov 24  }
  0x6a   : > { %1072 = vrot.lane.b32.xlu0 %v2667_v17, %s2493_s21 }
  0x78   : > { %v2737_v63 = vpop.permute.xlu2 %547 }
  0x81   : > { %v2741_v3 = vpop.permute.xlu2 %633 }
  0x89   : > { %v721_v5 = vpop.permute.xlu2 %720 }
  0x91   : > { %v992_v8 = vpop.permute.xlu2 %991 }
  0x92   : > { %v636_v21 = vpop.permute.xlu1 %635 }
  0x99   : > { %v342_v39 = vpop.xlane.xlu0 %341  ;;  %v906_v19 = vpop.permute.xlu2 %905 }
  0x9a   : > { %v353_v40 = vmul.f32 %v2711_v37, %v342_v39  ;;  %v2806_v30 = vpop.permute.xlu1 %903 }
  0x9c   : > { %v355_v41 = vadd.f32 1.1920929e-07, %v353_v40 }
  0x9e   : > { %2200 = vrsqrt.f32 %v355_v41  ;;  %vm363_vm3 = vweird.f32 %v355_v41 }
  0xa1   : > { %v345_v42 = vpop.xlane.xlu0 %344  ;;  %v2804_v26 = vpop.permute.xlu2 %1074 }
  0xa2   : > { %v354_v43 = vmul.f32 %v2711_v37, %v345_v42 }
  0xa4   : > { %v2201_v44 = vpop.eup %2200  ;;  %v356_v45 = vadd.f32 1.1920929e-07, %v354_v43 }
  0xa5   : > { %v358_v46 = vmul.f32 %v2201_v44, %v355_v41  ;;  %vm364_vm2 = vweird.f32 %v2201_v44 }
  0xa6   : > { %2202 = vrsqrt.f32 %v356_v45  ;;  %vm365_vm5 = vmor %vm363_vm3, %vm364_vm2  ;;  %vm373_vm6 = vweird.f32 %v356_v45 }
  0xa7   : > { %v359_v47 = vmul.f32 %v2201_v44, %v358_v46 }
  0xa9   : > { %v360_v48 = vmul.f32 0.5, %v359_v47 }
  0xab   : > { %v361_v50 = vsub.f32 1.5, %v360_v48 }
  0xac   : > { %v2203_v49 = vpop.eup %2202 }
  0xad   : > { %v368_v51 = vmul.f32 %v2203_v49, %v356_v45  ;;  %v362_v53 = vmul.f32 %v2201_v44, %v361_v50  ;;  %vm374_vm4 = vweird.f32 %v2203_v49 }
  0xae   : > { %vm375_vm7 = vmor %vm373_vm6, %vm374_vm4 }
  0xaf   : > { %v369_v52 = vmul.f32 %v2203_v49, %v368_v51  ;;  %v366_v57 = vsel %vm365_vm5, %v2201_v44, %v362_v53 }
  0xb0   : > { %v377_v59 = vmul.f32 %v366_v57, %v2632_v0 }
  0xb1   : > { %v370_v54 = vmul.f32 0.5, %v369_v52 }
  0xb3   : > { %v371_v55 = vsub.f32 1.5, %v370_v54 }
  0xb4   : > { %v2735_v62 = vpop.permute.xlu0 %549 }
  0xb5   : > { %v372_v56 = vmul.f32 %v2203_v49, %v371_v55 }
  0xb7   : > { %v376_v58 = vsel %vm375_vm7, %v2203_v49, %v372_v56 }
  0xb8   : > { %v378_v60 = vmul.f32 %v2636_v2, %v376_v58 }
  0xba   : > { %v379_v61 = vpack.c.bf16 %v378_v60, %v377_v59 }
  0xbc   : > { %1852 = vmatmul.msk.bf16.vlgmr.msra.gmra.mxu0 %vm339_vm0, %v379_v61  ;;  %1853 = vmatmul.msk.bf16.vlgmr.msra.gmra.mxu1 %vm339_vm0, %v379_v61  ;;  %v2739_v1 = vpop.permute.xlu0 %722 }
  0xc4   : > { %v817_v4 = vpop.permute.xlu0 %816 }
  0xcc   : > { %v819_v6 = vpop.permute.xlu0 %818 }
  0xd4   : > { %v994_v18 = vpop.permute.xlu0 %993 }
  0xdc   : > { %v2809_v33 = vpop.permute.xlu0 %1072 }
 0x139   : > { %v2743_v9 = vpop.f32.mrf.mxu0  ;;  %v454_v10 = vpop.f32.mrf.mxu1 }
 0x13a   : > { %v2745_v11 = vpack.c.bf16 %v454_v10, %v454_v10  ;;  %461 = vrot.lane.b32.xlu1 %v2743_v9, %s2494_s17  ;;  %467 = vrot.lane.b32.xlu2 %v2743_v9, %s2495_s18  ;;  %v2752_v12 = vmul.f32 %v817_v4, %v2743_v9  ;;  %v2759_v13 = vmul.f32 %v721_v5, %v2743_v9  ;;  %v334_v4 = vld [vmem:[#allocation8 + $0x8] sm:$0xff] }
 0x13b   : > { %v2762_v14 = vmul.f32 %v992_v8, %v2743_v9  ;;  %v476_v41 = vmul.f32 %v2743_v9, %v2667_v17 }
 0x13c   : > { %623 = vst.msk [vmem:[#allocation4] sm:$0xf] %vm528_vm8, %v2745_v11  ;;  %979 = vrot.lane.b32.xlu0 %v2745_v11, %s3368_s12 }
 0x141   : > { %v2764_v15 = vpop.f32.mrf.mxu0  ;;  %v456_v16 = vpop.f32.mrf.mxu1 }
 0x142   : > { %v2766_v20 = vpack.c.bf16 %v456_v16, %v456_v16  ;;  %625 = vrot.lane.b32.xlu1 %v2743_v9, %s2496_s19  ;;  %531 = vrot.lane.b32.xlu2 %v2743_v9, %s2497_s16  ;;  %v2771_v22 = vmul.f32 %v994_v18, %v2764_v15  ;;  %v2774_v23 = vmul.f32 %v906_v19, %v2764_v15 }
 0x143   : > { %v2780_v24 = vmul.f32 %v636_v21, %v2764_v15  ;;  %v2783_v25 = vmul.f32 %v819_v6, %v2764_v15 }
 0x144   : > { %624 = vst.msk [vmem:[#allocation4 + $0x4] sm:$0xf] %vm528_vm8, %v2766_v20  ;;  %533 = vrot.lane.b32.xlu0 %v2764_v15, %s2497_s16 }
 0x14a   : > { %808 = vrot.lane.b32.xlu1 %v2743_v9, %s2498_s20  ;;  %537 = vrot.lane.b32.xlu2 %v2743_v9, %s2499_s23 }
 0x14c   : > { %627 = vrot.lane.b32.xlu0 %v2764_v15, %s2496_s19 }
 0x152   : > { %895 = vrot.lane.b32.xlu1 %v2743_v9, %s2500_s10  ;;  %712 = vrot.lane.b32.xlu2 %v2743_v9, %s2501_s8 }
 0x154   : > { %810 = vrot.lane.b32.xlu0 %v2764_v15, %s2498_s20 }
 0x15a   : > { %798 = vrot.lane.b32.xlu1 %v2745_v11, %s2493_s21  ;;  %469 = vrot.lane.b32.xlu2 %v2764_v15, %s2495_s18 }
 0x15c   : > { %897 = vrot.lane.b32.xlu0 %v2764_v15, %s2500_s10  ;;  %s3370_s10 = smov 80  }
 0x162   : > { %463 = vrot.lane.b32.xlu1 %v2764_v15, %s2494_s17  ;;  %539 = vrot.lane.b32.xlu2 %v2764_v15, %s2499_s23  ;;  %s3371_s17 = smov 48  }
 0x16a   : > { %714 = vrot.lane.b32.xlu2 %v2764_v15, %s2501_s8  ;;  %s3369_s8 = smov 64  }
 0x172   : > { %800 = vrot.lane.b32.xlu2 %v2766_v20, %s2493_s21 }
 0x17a   : > { %981 = vrot.lane.b32.xlu2 %v2766_v20, %s3368_s12 }
 0x194   : > { %v468_v27 = vpop.permute.xlu2 %467 }
 0x19c   : > { %v532_v28 = vpop.permute.xlu2 %531 }
 0x1a4   : > { %v538_v31 = vpop.permute.xlu2 %537 }
 0x1a5   : > { %v543_v32 = vsel %vm473_vm9, %v532_v28, %v538_v31 }
 0x1a6   : > { %v555_v34 = vmul.f32 %v543_v32, %v333_v29 }
 0x1a8   : > { %559 = vrot.lane.b32.xlu2 %v555_v34, %s3369_s8 }
 0x1ac   : > { %v462_v35 = vpop.permute.xlu1 %461  ;;  %v713_v36 = vpop.permute.xlu2 %712 }
 0x1ad   : > { %v474_v38 = vsel %vm473_vm9, %v462_v35, %v468_v27  ;;  %v718_v48 = vsel %vm473_vm9, %v713_v36, %v532_v28 }
 0x1ae   : > { %v478_v39 = vmul.f32 %v474_v38, %v333_v29  ;;  %v980_v40 = vpop.permute.xlu0 %979  ;;  %v728_v52 = vmul.f32 %v718_v48, %v333_v29 }
 0x1af   : > { %987 = vst.msk [vmem:[#allocation4 + $0x10] sm:$0xf] %vm528_vm8, %v980_v40 }
 0x1b0   : > { %v2816_v42 = vadd.f32 %v478_v39, %v476_v41 }
 0x1b4   : > { %v626_v43 = vpop.permute.xlu1 %625  ;;  %v470_v44 = vpop.permute.xlu2 %469 }
 0x1b5   : > { %v631_v45 = vsel %vm473_vm9, %v626_v43, %v462_v35 }
 0x1b6   : > { %v641_v46 = vmul.f32 %v631_v45, %v333_v29  ;;  %v534_v47 = vpop.permute.xlu0 %533  ;;  %v477_v45 = vmul.f32 %v2764_v15, %v2647_v7  ;;  %v553_v7 = vmul.f32 %v2737_v63, %v2743_v9  ;;  %v639_v63 = vmul.f32 %v2741_v3, %v2743_v9 }
 0x1b8   : > { %645 = vrot.lane.b32.xlu1 %v641_v46, %s2488_s30 }
 0x1bc   : > { %v809_v49 = vpop.permute.xlu1 %808  ;;  %v540_v50 = vpop.permute.xlu2 %539 }
 0x1bd   : > { %v814_v51 = vsel %vm473_vm9, %v809_v49, %v626_v43  ;;  %v544_v17 = vsel %vm473_vm9, %v534_v47, %v540_v50  ;;  %v989_v55 = vsel %vm473_vm9, %v538_v31, %v809_v49 }
 0x1be   : > { %v824_v53 = vmul.f32 %v814_v51, %v333_v29  ;;  %v628_v54 = vpop.permute.xlu0 %627  ;;  %v999_v59 = vmul.f32 %v989_v55, %v333_v29 }
 0x1c0   : > { %828 = vrot.lane.b32.xlu0 %v824_v53, %s2490_s15  ;;  %732 = vrot.lane.b32.xlu1 %v728_v52, %s3370_s10  ;;  %v556_v53 = vmul.f32 %v544_v17, %v334_v4 }
 0x1c4   : > { %v896_v56 = vpop.permute.xlu1 %895  ;;  %v715_v57 = vpop.permute.xlu2 %714 }
 0x1c5   : > { %v1070_v58 = vsel %vm473_vm9, %v468_v27, %v896_v56  ;;  %v901_v8 = vsel %vm473_vm9, %v896_v56, %v713_v36  ;;  %v719_v10 = vsel %vm473_vm9, %v715_v57, %v534_v47  ;;  %v482_v47 = vmul.f32 %v2816_v42, %v2816_v42 }
 0x1c6   : > { %v1080_v60 = vmul.f32 %v1070_v58, %v333_v29  ;;  %v811_v61 = vpop.permute.xlu0 %810  ;;  %v911_v19 = vmul.f32 %v901_v8, %v333_v29  ;;  %v729_v21 = vmul.f32 %v719_v10, %v334_v4 }
 0x1c7   : > { %v815_v5 = vsel %vm473_vm9, %v811_v61, %v628_v54  ;;  %v990_v35 = vsel %vm473_vm9, %v540_v50, %v811_v61  ;;  %v485_v48 = vsel %vm484_vm10, %v482_v47, 0.0 }
 0x1c8   : > { %v825_v6 = vmul.f32 %v815_v5, %v334_v4  ;;  %1003 = vrot.lane.b32.xlu0 %v999_v59, %s3371_s17  ;;  %1084 = vrot.lane.b32.xlu2 %v1080_v60, %s2493_s21  ;;  %v1000_v40 = vmul.f32 %v990_v35, %v334_v4 }
 0x1cc   : > { %v799_v16 = vpop.permute.xlu1 %798  ;;  %v801_v18 = vpop.permute.xlu2 %800 }
 0x1cd   : > { %806 = vst.msk [vmem:[#allocation4 + $0x8] sm:$0xf] %vm528_vm8, %v799_v16  ;;  %v909_v16 = vmul.f32 %v2806_v30, %v2743_v9  ;;  %v2502_v30 = vmov 16.0  }
 0x1ce   : > { %807 = vst.msk [vmem:[#allocation4 + $0xc] sm:$0xf] %vm528_vm8, %v801_v18  ;;  %v898_v27 = vpop.permute.xlu0 %897  ;;  %2204 = vrcp.f32 %v2502_v30 }
 0x1cf   : > { %v902_v28 = vsel %vm473_vm9, %v898_v27, %v715_v57  ;;  %v1071_v31 = vsel %vm473_vm9, %v470_v44, %v898_v27 }
 0x1d0   : > { %v912_v32 = vmul.f32 %v902_v28, %v334_v4  ;;  %v1081_v34 = vmul.f32 %v1071_v31, %v334_v4  ;;  %915 = vrot.lane.b32.xlu0 %v911_v19, %s3368_s12  ;;  %734 = vrot.lane.b32.xlu2 %v729_v21, %s3370_s10 }
 0x1d2   : > { %917 = vrot.lane.b32.xlu1 %v912_v32, %s3368_s12 }
 0x1d4   : > { %v464_v36 = vpop.permute.xlu1 %463  ;;  %v982_v29 = vpop.permute.xlu2 %981 }
 0x1d5   : > { %v475_v38 = vsel %vm473_vm9, %v464_v36, %v470_v44  ;;  %v632_v39 = vsel %vm473_vm9, %v628_v54, %v464_v36  ;;  %988 = vst.msk [vmem:[#allocation4 + $0x14] sm:$0xf] %vm528_vm8, %v982_v29  ;;  %v2205_v31 = vpop.eup %2204 }
 0x1d6   : > { %v479_v41 = vmul.f32 %v475_v38, %v334_v4  ;;  %v642_v43 = vmul.f32 %v632_v39, %v334_v4  ;;  %v1078_v4 = vmul.f32 %v2809_v33, %v2743_v9  ;;  %v727_v33 = vmul.f32 %v2739_v1, %v2764_v15 }
 0x1d7   : > { %v492_v32 = vmul.f32 16.0, %v2205_v31  ;;  %vm496_vm11 = vweird.f32 %v2205_v31 }
 0x1d8   : > { %1005 = vrot.lane.b32.xlu2 %v1000_v40, %s3371_s17  ;;  %v2846_v46 = vadd.f32 %v479_v41, %v477_v45 }
 0x1da   : > { %v483_v44 = vmul.f32 %v2846_v46, %v2846_v46 }
 0x1dc   : > { %v488_v49 = vsel %vm484_vm10, %v483_v44, 0.0 }
 0x1fa   : > { %486 = vadd.xlane.f32.xlu0 %v485_v48 }
 0x1fc   : > { %489 = vadd.xlane.f32.xlu1 %v488_v49 }
 0x202   : > { %v560_v50 = vpop.permute.xlu2 %559 }
 0x203   : > { %v2856_v51 = vadd.f32 %v560_v50, %v553_v7 }
 0x205   : > { %v567_v52 = vmul.f32 %v2856_v51, %v2856_v51 }
 0x207   : > { %571 = vrot.lane.b32.xlu2 %v567_v52, %s3369_s8 }
 0x20e   : > { %561 = vrot.lane.b32.xlu0 %v556_v53, %s3369_s8 }
 0x216   : > { %647 = vrot.lane.b32.xlu0 %v642_v43, %s2488_s30 }
 0x21e   : > { %830 = vrot.lane.b32.xlu0 %v825_v6, %s2490_s15 }
 0x222   : > { %v1085_v60 = vpop.permute.xlu2 %1084 }
 0x223   : > { %v2886_v5 = vadd.f32 %v1085_v60, %v1078_v4 }
 0x225   : > { %v1092_v6 = vmul.f32 %v2886_v5, %v2886_v5 }
 0x226   : > { %1086 = vrot.lane.b32.xlu0 %v1081_v34, %s2493_s21  ;;  %v493_v34 = vsub.f32 1.0, %v492_v32 }
 0x228   : > { %v494_v35 = vmul.f32 %v2205_v31, %v493_v34 }
 0x22a   : > { %v646_v54 = vpop.permute.xlu1 %645  ;;  %v735_v10 = vpop.permute.xlu2 %734  ;;  %v495_v36 = vadd.f32 %v2205_v31, %v494_v35 }
 0x22b   : > { %v2867_v55 = vadd.f32 %v646_v54, %v639_v63  ;;  %v2901_v18 = vadd.f32 %v735_v10, %v727_v33 }
 0x22c   : > { %v2917_v29 = vsel %vm496_vm11, %v2205_v31, %v495_v36  ;;  %v1079_v31 = vmul.f32 %v2804_v26, %v2764_v15 }
 0x22d   : > { %v653_v56 = vmul.f32 %v2867_v55, %v2867_v55  ;;  %v741_v21 = vmul.f32 %v2901_v18, %v2901_v18 }
 0x22f   : > { %657 = vrot.lane.b32.xlu1 %v653_v56, %s2493_s21 }
 0x232   : > { %v829_v17 = vpop.permute.xlu0 %828  ;;  %v733_v57 = vpop.permute.xlu1 %732 }
 0x233   : > { %v2873_v58 = vadd.f32 %v829_v17, %v2752_v12  ;;  %v2876_v59 = vadd.f32 %v733_v57, %v2759_v13  ;;  %v1006_v38 = vpop.permute.xlu2 %1005  ;;  %v554_v17 = vmul.f32 %v2735_v62, %v2764_v15 }
 0x235   : > { %v836_v3 = vmul.f32 %v2873_v58, %v2873_v58  ;;  %v740_v61 = vmul.f32 %v2876_v59, %v2876_v59 }
 0x237   : > { %840 = vrot.lane.b32.xlu1 %v836_v3, %s3368_s12  ;;  %744 = vrot.lane.b32.xlu2 %v740_v61, %s3371_s17 }
 0x23a   : > { %v1004_v12 = vpop.permute.xlu0 %1003 }
 0x23b   : > { %v2889_v13 = vadd.f32 %v1004_v12, %v2762_v14 }
 0x23d   : > { %v1011_v8 = vmul.f32 %v2889_v13, %v2889_v13 }
 0x23f   : > { %1096 = vrot.lane.b32.xlu1 %v1092_v6, %s2488_s30  ;;  %1015 = vrot.lane.b32.xlu0 %v1011_v8, %s3370_s10 }
 0x242   : > { %v916_v14 = vpop.permute.xlu0 %915 }
 0x243   : > { %v2903_v19 = vadd.f32 %v916_v14, %v909_v16  ;;  %v2932_v16 = vadd.f32 %v1006_v38, %v2771_v22 }
 0x244   : > { %v918_v28 = vpop.permute.xlu1 %917 }
 0x245   : > { %v923_v27 = vmul.f32 %v2903_v19, %v2903_v19  ;;  %v2912_v1 = vadd.f32 %v918_v28, %v2774_v23 }
 0x247   : > { %927 = vrot.lane.b32.xlu2 %v923_v27, %s2490_s15  ;;  %746 = vrot.lane.b32.xlu0 %v741_v21, %s3371_s17  ;;  %v924_v9 = vmul.f32 %v2912_v1, %v2912_v1 }
 0x24f   : > { %929 = vrot.lane.b32.xlu0 %v924_v9, %s2490_s15 }
 0x261   : > { %v572_v47 = vpop.permute.xlu2 %571 }
 0x262   : > { %v577_v48 = vsel %vm484_vm10, %v572_v47, 0.0 }
 0x26d   : > { %v487_v39 = vpop.xlane.xlu0 %486 }
 0x26e   : > { %v498_v23 = vmul.f32 %v2917_v29, %v487_v39 }
 0x26f   : > { %v490_v40 = vpop.xlane.xlu1 %489 }
 0x270   : > { %v500_v41 = vadd.f32 1.1920929e-07, %v498_v23  ;;  %v499_v43 = vmul.f32 %v2917_v29, %v490_v40 }
 0x272   : > { %2206 = vrsqrt.f32 %v500_v41  ;;  %v501_v45 = vadd.f32 1.1920929e-07, %v499_v43  ;;  %vm508_vm13 = vweird.f32 %v500_v41 }
 0x274   : > { %2208 = vrsqrt.f32 %v501_v45  ;;  %vm518_vm1 = vweird.f32 %v501_v45 }
 0x278   : > { %v2207_v44 = vpop.eup %2206 }
 0x279   : > { %v503_v49 = vmul.f32 %v2207_v44, %v500_v41  ;;  %578 = vadd.xlane.f32.xlu0 %v577_v48  ;;  %vm509_vm12 = vweird.f32 %v2207_v44 }
 0x27a   : > { %v2209_v7 = vpop.eup %2208  ;;  %vm510_vm15 = vmor %vm508_vm13, %vm509_vm12 }
 0x27b   : > { %v504_v50 = vmul.f32 %v2207_v44, %v503_v49  ;;  %v513_v52 = vmul.f32 %v2209_v7, %v501_v45  ;;  %vm519_vm14 = vweird.f32 %v2209_v7 }
 0x27c   : > { %vm520_vm2 = vmor %vm518_vm1, %vm519_vm14 }
 0x27d   : > { %v505_v53 = vmul.f32 0.5, %v504_v50  ;;  %v514_v63 = vmul.f32 %v2209_v7, %v513_v52 }
 0x27f   : > { %v506_v54 = vsub.f32 1.5, %v505_v53  ;;  %v515_v56 = vmul.f32 0.5, %v514_v63 }
 0x280   : > { %v562_v57 = vpop.permute.xlu0 %561 }
 0x281   : > { %v507_v60 = vmul.f32 %v2207_v44, %v506_v54  ;;  %v516_v3 = vsub.f32 1.5, %v515_v56  ;;  %v2924_v61 = vadd.f32 %v562_v57, %v554_v17 }
 0x283   : > { %v511_v4 = vsel %vm510_vm15, %v2207_v44, %v507_v60  ;;  %v517_v12 = vmul.f32 %v2209_v7, %v516_v3  ;;  %v568_v6 = vmul.f32 %v2924_v61, %v2924_v61 }
 0x284   : > { %v522_v8 = vmul.f32 %v511_v4, %v2816_v42  ;;  %v1012_v42 = vmul.f32 %v2932_v16, %v2932_v16 }
 0x285   : > { %v521_v10 = vsel %vm520_vm2, %v2209_v7, %v517_v12  ;;  %573 = vrot.lane.b32.xlu1 %v568_v6, %s3369_s8 }
 0x286   : > { %v524_v62 = vmul.f32 0.25, %v522_v8  ;;  %v523_v33 = vmul.f32 %v521_v10, %v2846_v46 }
 0x288   : > { %v526_v14 = vpack.c.bf16 %v524_v62, %v524_v62  ;;  %v525_v21 = vmul.f32 0.25, %v523_v33  ;;  %v648_v27 = vpop.permute.xlu0 %647 }
 0x289   : > { %v2935_v28 = vadd.f32 %v648_v27, %v2780_v24 }
 0x28a   : > { %529 = vst.msk [vmem:[#allocation2] sm:$0xf] %vm528_vm8, %v526_v14  ;;  %v527_v9 = vpack.c.bf16 %v525_v21, %v525_v21 }
 0x28b   : > { %v654_v30 = vmul.f32 %v2935_v28, %v2935_v28 }
 0x28c   : > { %530 = vst.msk [vmem:[#allocation2 + $0x4] sm:$0xf] %vm528_vm8, %v527_v9 }
 0x28d   : > { %1017 = vrot.lane.b32.xlu1 %v1012_v42, %s3370_s10  ;;  %659 = vrot.lane.b32.xlu2 %v654_v30, %s2493_s21 }
 0x290   : > { %v831_v22 = vpop.permute.xlu0 %830 }
 0x291   : > { %v2946_v46 = vadd.f32 %v831_v22, %v2783_v25  ;;  %v745_v23 = vpop.permute.xlu2 %744 }
 0x292   : > { %v750_v43 = vsel %vm484_vm10, %v745_v23, 0.0 }
 0x293   : > { %v837_v24 = vmul.f32 %v2946_v46, %v2946_v46 }
 0x295   : > { %842 = vrot.lane.b32.xlu2 %v837_v24, %s3368_s12 }
 0x298   : > { %v1087_v32 = vpop.permute.xlu0 %1086 }
 0x299   : > { %v2953_v34 = vadd.f32 %v1087_v32, %v1079_v31 }
 0x29b   : > { %v1093_v35 = vmul.f32 %v2953_v34, %v2953_v34 }
 0x29d   : > { %1098 = vrot.lane.b32.xlu2 %v1093_v35, %s2488_s30 }
 0x2a1   : > { %v658_v36 = vpop.permute.xlu1 %657  ;;  %v928_v26 = vpop.permute.xlu2 %927 }
 0x2a2   : > { %v663_v25 = vsel %vm484_vm10, %v658_v36, 0.0  ;;  %v933_v41 = vsel %vm484_vm10, %v928_v26, 0.0 }
 0x2a3   : > { %664 = vadd.xlane.f32.xlu0 %v663_v25 }
 0x2a9   : > { %v841_v38 = vpop.permute.xlu1 %840 }
 0x2aa   : > { %v846_v39 = vsel %vm484_vm10, %v841_v38, 0.0 }
 0x2ab   : > { %847 = vadd.xlane.f32.xlu0 %v846_v39 }
 0x2b1   : > { %v1097_v40 = vpop.permute.xlu1 %1096  ;;  %v1016_v45 = vpop.permute.xlu0 %1015 }
 0x2b2   : > { %v1102_v15 = vsel %vm484_vm10, %v1097_v40, 0.0  ;;  %v1021_v47 = vsel %vm484_vm10, %v1016_v45, 0.0 }
 0x2b3   : > { %1103 = vadd.xlane.f32.xlu0 %v1102_v15 }
 0x2b7   : > { %934 = vadd.xlane.f32.xlu1 %v933_v41 }
 0x2b9   : > { %v747_v44 = vpop.permute.xlu0 %746 }
 0x2ba   : > { %v753_v63 = vsel %vm484_vm10, %v747_v44, 0.0 }
 0x2c1   : > { %v930_v48 = vpop.permute.xlu0 %929 }
 0x2c2   : > { %v936_v62 = vsel %vm484_vm10, %v930_v48, 0.0 }
 0x2c6   : > { %751 = vadd.xlane.f32.xlu2 %v750_v43 }
 0x2ce   : > { %1022 = vadd.xlane.f32.xlu2 %v1021_v47 }
 0x2e7   : > { %v660_v49 = vpop.permute.xlu2 %659 }
 0x2e8   : > { %v666_v7 = vsel %vm484_vm10, %v660_v49, 0.0 }
 0x2e9   : > { %667 = vadd.xlane.f32.xlu1 %v666_v7 }
 0x2ec   : > { %v579_v50 = vpop.xlane.xlu0 %578 }
 0x2ed   : > { %v583_v52 = vmul.f32 %v579_v50, %v2917_v29 }
 0x2ef   : > { %v585_v53 = vadd.f32 1.1920929e-07, %v583_v52  ;;  %v843_v54 = vpop.permute.xlu2 %842 }
 0x2f0   : > { %v849_v57 = vsel %vm484_vm10, %v843_v54, 0.0 }
 0x2f1   : > { %754 = vadd.xlane.f32.xlu1 %v753_v63  ;;  %2210 = vrsqrt.f32 %v585_v53  ;;  %vm593_vm4 = vweird.f32 %v585_v53 }
 0x2f7   : > { %v574_v56 = vpop.permute.xlu1 %573  ;;  %v2211_v60 = vpop.eup %2210 }
 0x2f8   : > { %v580_v17 = vsel %vm484_vm10, %v574_v56, 0.0  ;;  %v588_v3 = vmul.f32 %v2211_v60, %v585_v53  ;;  %v1099_v4 = vpop.permute.xlu2 %1098  ;;  %vm594_vm3 = vweird.f32 %v2211_v60 }
 0x2f9   : > { %581 = vadd.xlane.f32.xlu2 %v580_v17  ;;  %850 = vadd.xlane.f32.xlu1 %v849_v57  ;;  %v1105_v8 = vsel %vm484_vm10, %v1099_v4, 0.0  ;;  %vm595_vm5 = vmor %vm593_vm4, %vm594_vm3 }
 0x2fa   : > { %v589_v10 = vmul.f32 %v2211_v60, %v588_v3 }
 0x2fc   : > { %v590_v33 = vmul.f32 0.5, %v589_v10 }
 0x2fe   : > { %v591_v14 = vsub.f32 1.5, %v590_v33 }
 0x2ff   : > { %v1018_v12 = vpop.permute.xlu1 %1017 }
 0x300   : > { %v1024_v6 = vsel %vm484_vm10, %v1018_v12, 0.0  ;;  %v592_v21 = vmul.f32 %v2211_v60, %v591_v14 }
 0x301   : > { %1025 = vadd.xlane.f32.xlu0 %v1024_v6  ;;  %1106 = vadd.xlane.f32.xlu1 %v1105_v8 }
 0x302   : > { %937 = vadd.xlane.f32.xlu2 %v936_v62  ;;  %v596_v27 = vsel %vm595_vm5, %v2211_v60, %v592_v21 }
 0x303   : > { %v607_v9 = vmul.f32 %v596_v27, %v2856_v51 }
 0x305   : > { %v609_v22 = vpack.c.bf16 %v607_v9, %v607_v9 }
 0x316   : > { %v665_v42 = vpop.xlane.xlu0 %664 }
 0x317   : > { %v669_v30 = vmul.f32 %v665_v42, %v2917_v29 }
 0x319   : > { %v671_v24 = vadd.f32 1.1920929e-07, %v669_v30 }
 0x31a   : > { %613 = vrot.lane.b32.xlu1 %v609_v22, %s3369_s8 }
 0x31b   : > { %2212 = vrsqrt.f32 %v671_v24  ;;  %vm679_vm9 = vweird.f32 %v671_v24 }
 0x31e   : > { %v848_v31 = vpop.xlane.xlu0 %847 }
 0x31f   : > { %v852_v32 = vmul.f32 %v848_v31, %v2917_v29 }
 0x321   : > { %v854_v35 = vadd.f32 1.1920929e-07, %v852_v32  ;;  %v2213_v36 = vpop.eup %2212 }
 0x322   : > { %v674_v38 = vmul.f32 %v2213_v36, %v671_v24  ;;  %vm680_vm6 = vweird.f32 %v2213_v36 }
 0x323   : > { %2214 = vrsqrt.f32 %v854_v35  ;;  %vm2978_vm11 = vmor %vm679_vm9, %vm680_vm6  ;;  %vm862_vm3 = vweird.f32 %v854_v35 }
 0x324   : > { %v675_v40 = vmul.f32 %v2213_v36, %v674_v38 }
 0x326   : > { %v1104_v25 = vpop.xlane.xlu0 %1103  ;;  %v676_v43 = vmul.f32 0.5, %v675_v40 }
 0x327   : > { %v1108_v39 = vmul.f32 %v1104_v25, %v2917_v29 }
 0x328   : > { %v677_v48 = vsub.f32 1.5, %v676_v43 }
 0x329   : > { %v1110_v23 = vadd.f32 1.1920929e-07, %v1108_v39  ;;  %v2215_v26 = vpop.eup %2214 }
 0x32a   : > { %v935_v51 = vpop.xlane.xlu1 %934  ;;  %v857_v45 = vmul.f32 %v2215_v26, %v854_v35  ;;  %v678_v54 = vmul.f32 %v2213_v36, %v677_v48  ;;  %vm863_vm2 = vweird.f32 %v2215_v26 }
 0x32b   : > { %2216 = vrsqrt.f32 %v1110_v23  ;;  %v939_v15 = vmul.f32 %v935_v51, %v2917_v29  ;;  %vm1118_vm12 = vweird.f32 %v1110_v23  ;;  %vm864_vm4 = vmor %vm862_vm3, %vm863_vm2 }
 0x32c   : > { %v858_v49 = vmul.f32 %v2215_v26, %v857_v45  ;;  %v682_v8 = vsel %vm2978_vm11, %v2213_v36, %v678_v54 }
 0x32d   : > { %v941_v41 = vadd.f32 1.1920929e-07, %v939_v15  ;;  %v693_v9 = vmul.f32 %v682_v8, %v2867_v55 }
 0x32e   : > { %v859_v63 = vmul.f32 0.5, %v858_v49 }
 0x32f   : > { %2218 = vrsqrt.f32 %v941_v41  ;;  %vm949_vm15 = vweird.f32 %v941_v41  ;;  %v695_v32 = vmul.f32 0.25, %v693_v9 }
 0x330   : > { %v860_v6 = vsub.f32 1.5, %v859_v63 }
 0x331   : > { %v2217_v47 = vpop.eup %2216 }
 0x332   : > { %v1113_v44 = vmul.f32 %v2217_v47, %v1110_v23  ;;  %vm1119_vm7 = vweird.f32 %v2217_v47  ;;  %v861_v30 = vmul.f32 %v2215_v26, %v860_v6  ;;  %v697_v23 = vpack.c.bf16 %v695_v32, %v695_v32 }
 0x333   : > { %vm1120_vm13 = vmor %vm1118_vm12, %vm1119_vm7 }
 0x334   : > { %v1114_v7 = vmul.f32 %v2217_v47, %v1113_v44  ;;  %v865_v38 = vsel %vm864_vm4, %v2215_v26, %v861_v30 }
 0x335   : > { %v2219_v50 = vpop.eup %2218  ;;  %v876_v51 = vmul.f32 %v865_v38, %v2873_v58 }
 0x336   : > { %v1115_v52 = vmul.f32 0.5, %v1114_v7  ;;  %v944_v53 = vmul.f32 %v2219_v50, %v941_v41  ;;  %vm950_vm14 = vweird.f32 %v2219_v50 }
 0x337   : > { %vm951_vm1 = vmor %vm949_vm15, %vm950_vm14  ;;  %v878_v35 = vmul.f32 0.25, %v876_v51 }
 0x338   : > { %v1116_v56 = vsub.f32 1.5, %v1115_v52  ;;  %v945_v17 = vmul.f32 %v2219_v50, %v944_v53 }
 0x339   : > { %v752_v57 = vpop.xlane.xlu2 %751  ;;  %v880_v45 = vpack.c.bf16 %v878_v35, %v878_v35 }
 0x33a   : > { %v946_v3 = vmul.f32 0.5, %v945_v17  ;;  %v756_v4 = vmul.f32 %v752_v57, %v2917_v29  ;;  %v1117_v12 = vmul.f32 %v2217_v47, %v1116_v56 }
 0x33c   : > { %v947_v10 = vsub.f32 1.5, %v946_v3  ;;  %v758_v62 = vadd.f32 1.1920929e-07, %v756_v4  ;;  %v1121_v33 = vsel %vm1120_vm13, %v2217_v47, %v1117_v12 }
 0x33d   : > { %v1132_v14 = vmul.f32 %v1121_v33, %v2886_v5 }
 0x33e   : > { %2220 = vrsqrt.f32 %v758_v62  ;;  %v948_v21 = vmul.f32 %v2219_v50, %v947_v10  ;;  %vm766_vm6 = vweird.f32 %v758_v62 }
 0x33f   : > { %v1134_v27 = vpack.c.bf16 %v1132_v14, %v1132_v14 }
 0x340   : > { %v952_v42 = vsel %vm951_vm1, %v2219_v50, %v948_v21 }
 0x341   : > { %v1023_v22 = vpop.xlane.xlu2 %1022  ;;  %1138 = vrot.lane.b32.xlu2 %v1134_v27, %s2488_s30  ;;  %v963_v24 = vmul.f32 %v952_v42, %v2903_v19 }
 0x342   : > { %v1027_v31 = vmul.f32 %v1023_v22, %v2917_v29 }
 0x343   : > { %v965_v5 = vpack.c.bf16 %v963_v24, %v963_v24 }
 0x344   : > { %v2221_v36 = vpop.eup %2220  ;;  %v1029_v25 = vadd.f32 1.1920929e-07, %v1027_v31 }
 0x345   : > { %v761_v39 = vmul.f32 %v2221_v36, %v758_v62  ;;  %969 = vrot.lane.b32.xlu1 %v965_v5, %s2490_s15  ;;  %vm767_vm5 = vweird.f32 %v2221_v36 }
 0x346   : > { %2222 = vrsqrt.f32 %v1029_v25  ;;  %vm768_vm7 = vmor %vm766_vm6, %vm767_vm5  ;;  %vm1037_vm11 = vweird.f32 %v1029_v25 }
 0x347   : > { %v762_v55 = vmul.f32 %v2221_v36, %v761_v39 }
 0x349   : > { %v763_v40 = vmul.f32 0.5, %v762_v55  ;;  %701 = vrot.lane.b32.xlu2 %v697_v23, %s2493_s21 }
 0x34b   : > { %v764_v19 = vsub.f32 1.5, %v763_v40 }
 0x34c   : > { %v2223_v15 = vpop.eup %2222 }
 0x34d   : > { %v1032_v41 = vmul.f32 %v2223_v15, %v1029_v25  ;;  %v765_v43 = vmul.f32 %v2221_v36, %v764_v19  ;;  %vm1038_vm9 = vweird.f32 %v2223_v15 }
 0x34e   : > { %vm1039_vm12 = vmor %vm1037_vm11, %vm1038_vm9 }
 0x34f   : > { %v1033_v26 = vmul.f32 %v2223_v15, %v1032_v41  ;;  %v769_v47 = vsel %vm768_vm7, %v2221_v36, %v765_v43 }
 0x350   : > { %v780_v44 = vmul.f32 %v769_v47, %v2876_v59 }
 0x351   : > { %v1034_v48 = vmul.f32 0.5, %v1033_v26  ;;  %884 = vrot.lane.b32.xlu2 %v880_v45, %s3368_s12 }
 0x352   : > { %v782_v58 = vpack.c.bf16 %v780_v44, %v780_v44 }
 0x353   : > { %v1035_v49 = vsub.f32 1.5, %v1034_v48 }
 0x354   : > { %786 = vrot.lane.b32.xlu0 %v782_v58, %s3371_s17 }
 0x355   : > { %v1036_v7 = vmul.f32 %v2223_v15, %v1035_v49 }
 0x357   : > { %v1040_v50 = vsel %vm1039_vm12, %v2223_v15, %v1036_v7 }
 0x358   : > { %v1051_v52 = vmul.f32 %v1040_v50, %v2889_v13 }
 0x35a   : > { %v1053_v53 = vmul.f32 0.25, %v1051_v52 }
 0x35c   : > { %v668_v63 = vpop.xlane.xlu1 %667  ;;  %v1055_v54 = vpack.c.bf16 %v1053_v53, %v1053_v53 }
 0x35d   : > { %v670_v17 = vmul.f32 %v668_v63, %v2917_v29 }
 0x35e   : > { %1059 = vrot.lane.b32.xlu1 %v1055_v54, %s3370_s10 }
 0x35f   : > { %v3000_v60 = vadd.f32 1.1920929e-07, %v670_v17 }
 0x361   : > { %vm689_vm7 = vweird.f32 %v3000_v60 }
 0x364   : > { %v755_v59 = vpop.xlane.xlu1 %754 }
 0x365   : > { %v757_v56 = vmul.f32 %v755_v59, %v2917_v29 }
 0x367   : > { %v759_v57 = vadd.f32 1.1920929e-07, %v757_v56 }
 0x369   : > { %2224 = vrsqrt.f32 %v759_v57  ;;  %vm776_vm14 = vweird.f32 %v759_v57 }
 0x36a   : > { %2226 = vrsqrt.f32 %v3000_v60 }
 0x36c   : > { %v582_v3 = vpop.xlane.xlu2 %581  ;;  %v851_v4 = vpop.xlane.xlu1 %850 }
 0x36d   : > { %v584_v12 = vmul.f32 %v582_v3, %v2917_v29  ;;  %v853_v13 = vmul.f32 %v851_v4, %v2917_v29 }
 0x36f   : > { %v2225_v6 = vpop.eup %2224  ;;  %v586_v8 = vadd.f32 1.1920929e-07, %v584_v12  ;;  %v855_v10 = vadd.f32 1.1920929e-07, %v853_v13 }
 0x370   : > { %v771_v62 = vmul.f32 %v2225_v6, %v759_v57  ;;  %v3005_v14 = vpop.eup %2226  ;;  %vm777_vm13 = vweird.f32 %v2225_v6 }
 0x371   : > { %2228 = vrsqrt.f32 %v586_v8  ;;  %v684_v32 = vmul.f32 %v3005_v14, %v3000_v60  ;;  %vm778_vm15 = vmor %vm776_vm14, %vm777_vm13  ;;  %vm603_vm3 = vweird.f32 %v586_v8  ;;  %vm872_vm5 = vweird.f32 %v855_v10 }
 0x372   : > { %v772_v33 = vmul.f32 %v2225_v6, %v771_v62  ;;  %2230 = vrsqrt.f32 %v855_v10  ;;  %vm690_vm9 = vweird.f32 %v3005_v14 }
 0x373   : > { %v685_v40 = vmul.f32 %v3005_v14, %v684_v32  ;;  %vm3034_vm14 = vmor %vm689_vm7, %vm690_vm9 }
 0x374   : > { %v773_v21 = vmul.f32 0.5, %v772_v33  ;;  %v1107_v27 = vpop.xlane.xlu1 %1106  ;;  %v1026_v9 = vpop.xlane.xlu0 %1025 }
 0x375   : > { %v1109_v42 = vmul.f32 %v1107_v27, %v2917_v29  ;;  %v938_v30 = vpop.xlane.xlu2 %937  ;;  %v1028_v22 = vmul.f32 %v1026_v9, %v2917_v29  ;;  %v686_v44 = vmul.f32 0.5, %v685_v40 }
 0x376   : > { %v774_v24 = vsub.f32 1.5, %v773_v21  ;;  %v940_v31 = vmul.f32 %v938_v30, %v2917_v29 }
 0x377   : > { %v2229_v5 = vpop.eup %2228  ;;  %v3012_v36 = vadd.f32 1.1920929e-07, %v1109_v42  ;;  %v3014_v25 = vadd.f32 1.1920929e-07, %v1028_v22  ;;  %v687_v59 = vsub.f32 1.5, %v686_v44 }
 0x378   : > { %v2231_v38 = vpop.eup %2230  ;;  %v598_v39 = vmul.f32 %v2229_v5, %v586_v8  ;;  %v3016_v55 = vadd.f32 1.1920929e-07, %v940_v31  ;;  %v775_v23 = vmul.f32 %v2225_v6, %v774_v24  ;;  %vm604_vm1 = vweird.f32 %v2229_v5 }
 0x379   : > { %v867_v51 = vmul.f32 %v2231_v38, %v855_v10  ;;  %2232 = vrsqrt.f32 %v3012_v36  ;;  %vm873_vm2 = vweird.f32 %v2231_v38  ;;  %vm605_vm4 = vmor %vm603_vm3, %vm604_vm1  ;;  %vm1128_vm12 = vweird.f32 %v3012_v36 }
 0x37a   : > { %v599_v29 = vmul.f32 %v2229_v5, %v598_v39  ;;  %2234 = vrsqrt.f32 %v3016_v55  ;;  %v779_v35 = vsel %vm778_vm15, %v2225_v6, %v775_v23  ;;  %vm874_vm6 = vmor %vm872_vm5, %vm873_vm2  ;;  %vm959_vm2 = vweird.f32 %v3016_v55 }
 0x37b   : > { %v868_v19 = vmul.f32 %v2231_v38, %v867_v51  ;;  %2236 = vrsqrt.f32 %v3014_v25  ;;  %v781_v41 = vmul.f32 %v779_v35, %v2901_v18 }
 0x37c   : > { %v600_v15 = vmul.f32 0.5, %v599_v29 }
 0x37d   : > { %v869_v43 = vmul.f32 0.5, %v868_v19  ;;  %v783_v45 = vpack.c.bf16 %v781_v41, %v781_v41 }
 0x37e   : > { %v601_v26 = vsub.f32 1.5, %v600_v15 }
 0x37f   : > { %v2233_v47 = vpop.eup %2232  ;;  %v870_v48 = vsub.f32 1.5, %v869_v43  ;;  %788 = vrot.lane.b32.xlu0 %v783_v45, %s3371_s17 }
 0x380   : > { %v2235_v58 = vpop.eup %2234  ;;  %v1123_v49 = vmul.f32 %v2233_v47, %v3012_v36  ;;  %v602_v7 = vmul.f32 %v2229_v5, %v601_v26  ;;  %vm1129_vm11 = vweird.f32 %v2233_v47 }
 0x381   : > { %v2237_v50 = vpop.eup %2236  ;;  %v954_v18 = vmul.f32 %v2235_v58, %v3016_v55  ;;  %v871_v52 = vmul.f32 %v2231_v38, %v870_v48  ;;  %vm960_vm13 = vweird.f32 %v2235_v58  ;;  %vm1130_vm1 = vmor %vm1128_vm12, %vm1129_vm11 }
 0x382   : > { %v1124_v53 = vmul.f32 %v2233_v47, %v1123_v49  ;;  %v1042_v63 = vmul.f32 %v2237_v50, %v3014_v25  ;;  %v606_v54 = vsel %vm605_vm4, %v2229_v5, %v602_v7  ;;  %vm1048_vm15 = vweird.f32 %v2237_v50  ;;  %vm961_vm3 = vmor %vm959_vm2, %vm960_vm13 }
 0x383   : > { %v955_v56 = vmul.f32 %v2235_v58, %v954_v18  ;;  %v608_v17 = vmul.f32 %v606_v54, %v2924_v61  ;;  %v875_v57 = vsel %vm874_vm6, %v2231_v38, %v871_v52  ;;  %v688_v61 = vmul.f32 %v3005_v14, %v687_v59 }
 0x384   : > { %v1125_v3 = vmul.f32 0.5, %v1124_v53  ;;  %v1043_v4 = vmul.f32 %v2237_v50, %v1042_v63  ;;  %v877_v12 = vmul.f32 %v875_v57, %v2946_v46  ;;  %vm1047_vm4 = vweird.f32 %v3014_v25 }
 0x385   : > { %v956_v13 = vmul.f32 0.5, %v955_v56  ;;  %v610_v6 = vpack.c.bf16 %v608_v17, %v608_v17  ;;  %vm1049_vm5 = vmor %vm1047_vm4, %vm1048_vm15  ;;  %v692_v31 = vsel %vm3034_vm14, %v3005_v14, %v688_v61  ;;  %v3086_v7 = vmov 0.0  }
 0x386   : > { %v1126_v8 = vsub.f32 1.5, %v1125_v3  ;;  %v1044_v10 = vmul.f32 0.5, %v1043_v4  ;;  %v879_v62 = vmul.f32 0.25, %v877_v12  ;;  %v694_v55 = vmul.f32 %v692_v31, %v2935_v28 }
 0x387   : > { %v957_v33 = vsub.f32 1.5, %v956_v13  ;;  %615 = vrot.lane.b32.xlu1 %v610_v6, %s3369_s8 }
 0x388   : > { %v1045_v60 = vsub.f32 1.5, %v1044_v10  ;;  %v881_v21 = vpack.c.bf16 %v879_v62, %v879_v62  ;;  %v1127_v27 = vmul.f32 %v2233_v47, %v1126_v8  ;;  %v696_v51 = vmul.f32 0.25, %v694_v55 }
 0x389   : > { %v958_v9 = vmul.f32 %v2235_v58, %v957_v33 }
 0x38a   : > { %886 = vrot.lane.b32.xlu0 %v881_v21, %s3368_s12  ;;  %v1131_v42 = vsel %vm1130_vm1, %v2233_v47, %v1127_v27  ;;  %v1046_v30 = vmul.f32 %v2237_v50, %v1045_v60  ;;  %v698_v14 = vpack.c.bf16 %v696_v51, %v696_v51 }
 0x38b   : > { %v1133_v22 = vmul.f32 %v1131_v42, %v2953_v34  ;;  %v962_v24 = vsel %vm961_vm3, %v2235_v58, %v958_v9 }
 0x38c   : > { %v614_v5 = vpop.permute.xlu1 %613  ;;  %v964_v32 = vmul.f32 %v962_v24, %v2912_v1  ;;  %v1050_v36 = vsel %vm1049_vm5, %v2237_v50, %v1046_v30  ;;  %v3088_v50 = vmov 0.0  }
 0x38d   : > { %619 = vst.msk [vmem:[#allocation3] sm:$0xf] %vm528_vm8, %v614_v5  ;;  %v1135_v38 = vpack.c.bf16 %v1133_v22, %v1133_v22  ;;  %v1052_v25 = vmul.f32 %v1050_v36, %v2932_v16 }
 0x38e   : > { %v966_v39 = vpack.c.bf16 %v964_v32, %v964_v32 }
 0x38f   : > { %1140 = vrot.lane.b32.xlu1 %v1135_v38, %s2488_s30  ;;  %v1054_v34 = vmul.f32 0.25, %v1052_v25  ;;  %s3084_s30 = scalar_lea.vmem [#allocation10], %s2645_s22 }
 0x390   : > { %971 = vrot.lane.b32.xlu2 %v966_v39, %s2490_s15  ;;  %s3090_s15 = smov 0  }
 0x391   : > { %v1056_v23 = vpack.c.bf16 %v1054_v34, %v1054_v34 }
 0x393   : > { %1061 = vrot.lane.b32.xlu0 %v1056_v23, %s3370_s10 }
 0x398   : > { %703 = vrot.lane.b32.xlu2 %v698_v14, %s2493_s21 }
 0x39b   : > { %1148 = vrot.lane.b32.xlu0 %v2745_v11, %s3370_s10  ;;  %v1139_v1 = vpop.permute.xlu2 %1138  ;;  %v1162_v11 = vlaneseq }
 0x39c   : > { %1146 = vst.msk [vmem:[#allocation3 + $0x18] sm:$0xf] %vm528_vm8, %v1139_v1 }
 0x39d   : > { %v3063_v15 = vshrl.u32 %v1162_v11, 7  ;;  %v3069_v41 = vand.u32 127, %v1162_v11 }
 0x39f   : > { %vm1167_vm6 = vcmp.ge.s32.totalorder %v3063_v15, %v3069_v41 }
 0x3a0   : > { %1150 = vrot.lane.b32.xlu2 %v2766_v20, %s3370_s10  ;;  %v3067_v20 = vadd.s32 8, %v3063_v15 }
 0x3a2   : > { %vm1168_vm7 = vcmp.ge.s32.totalorder %v3067_v20, %v3069_v41 }
 0x3a3   : > { %v702_v16 = vpop.permute.xlu2 %701 }
 0x3a4   : > { %710 = vst.msk [vmem:[#allocation2 + $0x8] sm:$0xf] %vm528_vm8, %v702_v16 }
 0x3ab   : > { %v885_v28 = vpop.permute.xlu2 %884 }
 0x3ac   : > { %893 = vst.msk [vmem:[#allocation2 + $0x10] sm:$0xf] %vm528_vm8, %v885_v28 }
 0x3b7   : > { %v970_v29 = vpop.permute.xlu1 %969 }
 0x3b8   : > { %977 = vst.msk [vmem:[#allocation3 + $0x10] sm:$0xf] %vm528_vm8, %v970_v29 }
 0x3c6   : > { %v787_v40 = vpop.permute.xlu0 %786 }
 0x3c7   : > { %794 = vst.msk [vmem:[#allocation3 + $0x8] sm:$0xf] %vm528_vm8, %v787_v40 }
 0x3d0   : > { %v1060_v19 = vpop.permute.xlu1 %1059 }
 0x3d1   : > { %1068 = vst.msk [vmem:[#allocation2 + $0x18] sm:$0xf] %vm528_vm8, %v1060_v19 }
 0x3ea   : > { %v972_v35 = vpop.permute.xlu2 %971 }
 0x3eb   : > { %978 = vst.msk [vmem:[#allocation3 + $0x14] sm:$0xf] %vm528_vm8, %v972_v35 }
 0x3f1   : > { %v789_v26 = vpop.permute.xlu0 %788 }
 0x3f2   : > { %v704_v43 = vpop.permute.xlu2 %703  ;;  %795 = vst.msk [vmem:[#allocation3 + $0xc] sm:$0xf] %vm528_vm8, %v789_v26 }
 0x3f3   : > { %711 = vst.msk [vmem:[#allocation2 + $0xc] sm:$0xf] %vm528_vm8, %v704_v43 }
 0x3f9   : > { %v616_v45 = vpop.permute.xlu1 %615 }
 0x3fa   : > { %620 = vst.msk [vmem:[#allocation3 + $0x4] sm:$0xf] %vm528_vm8, %v616_v45  ;;  %v1151_v47 = vpop.permute.xlu2 %1150 }
 0x3fb   : > { %1157 = vst.msk [vmem:[#allocation4 + $0x1c] sm:$0xf] %vm528_vm8, %v1151_v47 }
 0x3fc   : > { %v887_v44 = vpop.permute.xlu0 %886 }
 0x3fd   : > { %894 = vst.msk [vmem:[#allocation2 + $0x14] sm:$0xf] %vm528_vm8, %v887_v44 }
 0x401   : > { %v1141_v48 = vpop.permute.xlu1 %1140 }
 0x402   : > { %1147 = vst.msk [vmem:[#allocation3 + $0x1c] sm:$0xf] %vm528_vm8, %v1141_v48 }
 0x405   : > { %v1062_v58 = vpop.permute.xlu0 %1061 }
 0x406   : > { %1069 = vst.msk [vmem:[#allocation2 + $0x1c] sm:$0xf] %vm528_vm8, %v1062_v58 }
 0x40d   : > { %v1149_v49 = vpop.permute.xlu0 %1148 }
 0x40e   : > { %1156 = vst.msk [vmem:[#allocation4 + $0x18] sm:$0xf] %vm528_vm8, %v1149_v49 }
 0x40f LB: >> { %s1854_s22 = sshll.u32 %s2452_s15, 1  ;;  %s1991_s21 = sshll.u32 %s2452_s15, 3  ;;  %v3109_v53 = vmov 0.0   ;;  %v3111_v63 = vmov 0.0   ;;  %v3113_v54 = vmov 0.0   ;;  %v3115_v59 = vmov 0.0   ;;  %s2452_s15 = sphi %s3090_s15, %s1175_s15   ;;  %v2448_v50 = vphi %v3088_v50, %v3383_v50   ;;  %v2444_v7 = vphi %v3086_v7, %v3382_v7  }
 0x410   : >> { %s1183_s12 = scalar_lea.vmem [#allocation2], %s1991_s21  ;;  %v3117_v56 = vmov -1e+30   ;;  %v3119_v17 = vmov -1e+30   ;;  %s3121_s19 = smov 0  }
 0x411   : >> { %v3105_v18 = vld [vmem:[%s1183_s12] sm:$0xf]  ;;  %v3107_v52 = vld [vmem:[%s1183_s12] sm:$0xf0] }
 0x412 LB: >>> { %s1856_s16 = sshll.u32 %s2480_s19, 4  ;;  %v1862_v4 = vor.u32 %v3107_v52, %v3105_v18  ;;  %p1241_p1 = scmp.lt.s32.totalorder %s2480_s19, 0  ;;  %s2480_s19 = sphi %s3121_s19, %s1189_s19   ;;  %v2476_v17 = vphi %v3119_v17, %v3381_v17   ;;  %v2472_v56 = vphi %v3117_v56, %v3380_v56   ;;  %v2468_v59 = vphi %v3115_v59, %v3379_v59   ;;  %v2464_v54 = vphi %v3113_v54, %v3378_v54   ;;  %v2460_v63 = vphi %v3111_v63, %v3377_v63   ;;  %v2456_v53 = vphi %v3109_v53, %v3376_v53  }
 0x413   : >>> { %s1199_s20 = sshra.s32 %s1856_s16, 3  ;;  %s1189_s19 = sadd.s32 1, %s2480_s19  }
 0x414   : >>> { %s1201_s23 = sadd.s32 %s1854_s22, %s1199_s20  ;;  %p1188_p2 = scmp.ge.s32.totalorder %s1189_s19, 1 }
 0x415   : >>> { %s1857_s8 = sshll.u32 %s1201_s23, 2  ;;  %s1313_s23 = scalar_lea.vmem (%p1188_p2), %s3349_s2, %s1991_s21 }
 0x416   : >>> { %s1203_s10 = scalar_lea.vmem [#allocation3], %s1857_s8  ;;  %s1207_s12 = scalar_lea.vmem [#allocation4], %s1857_s8  ;;  %v1996_v45 = vld [vmem:[%s1313_s23] sm:$0xff] (%p1188_p2) }
 0x417   : >>> { %v1993_v57 = vld [vmem:[%s1203_s10] sm:$0xff]  ;;  %s1242_s17 = scalar_select %p1241_p1, 1, 0 }
 0x418   : >>> { %v1225_v3 = vsel %vm484_vm10, %v1993_v57, 0  ;;  %v1994_v61 = vld [vmem:[%s1207_s12] sm:$0xff]  ;;  %s1175_s15 = sadd.s32 (%p1188_p2), 1, %s2452_s15  }
 0x419   : >>> { %1234 = vmatpush.bf16.xpose.msra.mxu0 %v1225_v3  ;;  %v1243_v12 = vstv %s1242_s17  ;;  %1298 = vmatpush.bf16.msra.mxu1 %v1994_v61  ;;  %p1172_p3 = scmp.ge.s32.totalorder (%p1188_p2), %s1175_s15, 4  }
 0x41a   : >>> { %vm1244_vm8 = vcmp.eq.s32.totalorder %v1243_v12, 1 }
 0x41b   : >>> { %vm1245_vm9 = vmor %vm1244_vm8, %vm1167_vm6 }
 0x41c   : >>> { %vm1246_vm11 = vmor %vm1244_vm8, %vm1168_vm7 }
 0x420   : >>> { %1867 = vmatmul.msk.bf16.vlgmr.msra.gmra.mxu0 %vm484_vm10, %v1862_v4 }
 0x421   : >> { %1333 = vmatpush.bf16.msra.mxu0 (%p1188_p2), %v1996_v45 }
 0x49d   : >>> { %v1236_v13 = vpop.f32.mrf.mxu0 }
 0x49e   : >>> { %v1247_v6 = vsel %vm1245_vm9, %v1236_v13, -1e+30 }
 0x49f   : >>> { %v1249_v8 = vsel %vm484_vm10, %v1247_v6, -inf }
 0x4a0   : >>> { %1250 = vmax.xlane.f32.xlu0 %v1249_v8 }
 0x4a5   : >>> { %v1238_v10 = vpop.f32.mrf.mxu0 }
 0x4a6   : >>> { %v1248_v62 = vsel %vm1246_vm11, %v1238_v10, -1e+30 }
 0x4a7   : >>> { %v1252_v33 = vsel %vm484_vm10, %v1248_v62, -inf }
 0x4a8   : >>> { %1253 = vmax.xlane.f32.xlu0 %v1252_v33 }
 0x513   : >>> { %v1251_v46 = vpop.xlane.xlu0 %1250 }
 0x514   : >>> { %v1255_v60 = vmax.f32 %v2476_v17, %v1251_v46  }
 0x516   : >>> { %v1257_v21 = vsub.f32 %v2476_v17, %v1255_v60  ;;  %v1263_v27 = vsub.f32 %v1247_v6, %v1255_v60  ;;  %v3381_v17 = vmov %v1255_v60 }
 0x518   : >>> { %v1265_v9 = vmul.f32 1.442695, %v1263_v27  ;;  %v1259_v39 = vmul.f32 1.442695, %v1257_v21 }
 0x51a   : >>> { %2238 = vpow2.f32 %v1265_v9 }
 0x51b   : >>> { %v1254_v42 = vpop.xlane.xlu0 %1253 }
 0x51c   : >>> { %v1256_v30 = vmax.f32 %v2472_v56, %v1254_v42  }
 0x51e   : >>> { %v1258_v22 = vsub.f32 %v2472_v56, %v1256_v30  ;;  %v1264_v24 = vsub.f32 %v1248_v62, %v1256_v30  ;;  %v3380_v56 = vmov %v1256_v30 }
 0x520   : >>> { %v1267_v31 = vmul.f32 1.442695, %v1264_v24  ;;  %v2239_v5 = vpop.eup %2238  ;;  %v1261_v55 = vmul.f32 1.442695, %v1258_v22 }
 0x521   : >>> { %v1271_v32 = vsel %vm484_vm10, %v2239_v5, 0.0 }
 0x522   : >>> { %2240 = vpow2.f32 %v1267_v31  ;;  %1272 = vadd.xlane.f32.xlu1 %v1271_v32 }
 0x523   : >>> { %2242 = vpow2.f32 %v1259_v39 }
 0x524   : >>> { %2244 = vpow2.f32 %v1261_v55 }
 0x528   : >>> { %v2241_v36 = vpop.eup %2240 }
 0x529   : >>> { %v1274_v38 = vsel %vm484_vm10, %v2241_v36, 0.0  ;;  %v1281_v25 = vpack.c.bf16 %v2241_v36, %v2239_v5  ;;  %v2243_v34 = vpop.eup %2242 }
 0x52a   : >>> { %1275 = vadd.xlane.f32.xlu1 %v1274_v38  ;;  %v1269_v23 = vmul.f32 %v2468_v59, %v2243_v34  ;;  %v2245_v1 = vpop.eup %2244  ;;  %v1279_v40 = vmul.f32 %v2460_v63, %v2243_v34 }
 0x52b   : >>> { %1872 = vmatmul.msk.bf16.vlgmr.msra.gmra.mxu1 %vm484_vm10, %v1281_v25  ;;  %v1270_v16 = vmul.f32 %v2464_v54, %v2245_v1  ;;  %v1280_v35 = vmul.f32 %v2456_v53, %v2245_v1 }
 0x595   : >>> { %v1273_v51 = vpop.xlane.xlu1 %1272 }
 0x596   : >>> { %v1277_v14 = vadd.f32 %v1273_v51, %v1269_v23  }
 0x598   : >>> { %v3379_v59 = vmov %v1277_v14  ;;  %2246 = vrcp.f32 (%p1188_p2), %v1277_v14 }
 0x59d   : >>> { %v1276_v28 = vpop.xlane.xlu1 %1275 }
 0x59e   : >>> { %v1278_v29 = vadd.f32 %v1276_v28, %v1270_v16   ;;  %v2247_v47 = vpop.eup (%p1188_p2), %2246 }
 0x5a0   : >>> { %v3378_v54 = vmov %v1278_v29  ;;  %2248 = vrcp.f32 (%p1188_p2), %v1278_v29 }
 0x5a6   : >> { %v2249_v44 = vpop.eup (%p1188_p2), %2248 }
 0x5a8   : >>> { %v1300_v19 = vpop.f32.mrf.mxu1 }
 0x5a9   : >>> { %v1305_v11 = vadd.f32 %v1300_v19, %v1279_v40  }
 0x5ab   : >>> { %v3377_v63 = vmov %v1305_v11  ;;  %v1309_v48 = vmul.f32 (%p1188_p2), %v2247_v47, %v1305_v11 }
 0x5af   : >> { %1191 = sbr.rel (!%p1188_p2) target bundleno = 1042 (0x412), region = 124 }
 0x5b0   : >>> { %v1302_v43 = vpop.f32.mrf.mxu1 }
 0x5b1   : >>> { %v1306_v26 = vadd.f32 %v1302_v43, %v1280_v35  }
 0x5b3   : >>> { %v3376_v53 = vmov %v1306_v26  ;;  %v1310_v58 = vmul.f32 (%p1188_p2), %v2249_v44, %v1306_v26 }
 0x5b4   : > { %v2004_v15 = vld [vmem:[%s3350_s3 + $0x34] sm:$0xf0] (%p1172_p3)  ;;  %v1907_v41 = vld [vmem:[%s3350_s3 + $0x38] sm:$0xf0] (%p1172_p3)  ;;  %v1897_v3 = vld [vmem:[%s3350_s3 + $0x20] sm:$0xf] (%p1172_p3) }
 0x5b5   : >> { %v1311_v49 = vpack.c.bf16 %v1310_v58, %v1309_v48  ;;  %v2002_v4 = vld [vmem:[%s3350_s3 + $0x24] sm:$0xf0] (%p1172_p3)  ;;  %v2001_v12 = vld [vmem:[%s3350_s3 + $0x24] sm:$0xf] (%p1172_p3)  ;;  %v1899_v6 = vld [vmem:[%s3350_s3 + $0x28] sm:$0xf0] (%p1172_p3) }
 0x5b6   : > { %v1898_v13 = vor.u32 (%p1172_p3), %v2002_v4, %v1897_v3  ;;  %v1902_v8 = vor.u32 (%p1172_p3), %v2001_v12, %v1899_v6  ;;  %v1889_v10 = vld [vmem:[%s3350_s3 + $0x10] sm:$0xf] (%p1172_p3)  ;;  %v2000_v62 = vld [vmem:[%s3350_s3 + $0x14] sm:$0xf0] (%p1172_p3)  ;;  %v1999_v33 = vld [vmem:[%s3350_s3 + $0x14] sm:$0xf] (%p1172_p3) }
 0x5b7   : >> { %1878 = vmatmul.msk.bf16.vlgmr.msra.gmra.mxu0 %vm484_vm10, %v1311_v49  ;;  %v1890_v61 = vor.u32 (%p1172_p3), %v2000_v62, %v1889_v10  ;;  %v1891_v46 = vld [vmem:[%s3350_s3 + $0x18] sm:$0xf0] (%p1172_p3)  ;;  %v1881_v60 = vld [vmem:[%s3350_s3] sm:$0xf] (%p1172_p3)  ;;  %v1998_v21 = vld [vmem:[%s3350_s3 + $0x4] sm:$0xf0] (%p1172_p3) }
 0x5b8   : > { %v1894_v27 = vor.u32 (%p1172_p3), %v1999_v33, %v1891_v46  ;;  %v1997_v9 = vld [vmem:[%s3350_s3 + $0x4] sm:$0xf] (%p1172_p3)  ;;  %v1883_v42 = vld [vmem:[%s3350_s3 + $0x8] sm:$0xf0] (%p1172_p3)  ;;  %v1882_v30 = vor.u32 (%p1172_p3), %v1998_v21, %v1881_v60  ;;  %v2012_v32 = vld [vmem:[%s3351_s4 + $0x38] sm:$0xff] (%p1172_p3)  ;;  %s2021_s20 = sshll.u32 (%p1172_p3), %s2432_s27, 4 }
 0x5b9   : > { %v1886_v22 = vor.u32 (%p1172_p3), %v1997_v9, %v1883_v42  ;;  %v2020_v36 = vld [vmem:[%s3351_s4 + $0x78] sm:$0xff] (%p1172_p3)  ;;  %1604 = vmatpush.bf16.msra.mxu2 (%p1172_p3), %v2012_v32  ;;  %v2011_v38 = vld [vmem:[%s3351_s4 + $0x30] sm:$0xff] (%p1172_p3)  ;;  %v2010_v34 = vld [vmem:[%s3351_s4 + $0x28] sm:$0xff] (%p1172_p3)  ;;  %s1650_s22 = scalar_lea.hbm (%p1172_p3), %s3354_s7, %s2021_s20  ;;  %s1651_s21 = sshll.u32 (%p1172_p3), %s3084_s30, 4  ;;  %s1652_s21 = int_to_ptr.vmem [resolvable:$true] %s1651_s21 }
 0x5ba   : > { %1618 = vmatpush.bf16.msra.mxu3 (%p1172_p3), %v2020_v36  ;;  %v2019_v25 = vld [vmem:[%s3351_s4 + $0x70] sm:$0xff] (%p1172_p3)  ;;  %v2018_v23 = vld [vmem:[%s3351_s4 + $0x68] sm:$0xff] (%p1172_p3)  ;;  %v2017_v16 = vld [vmem:[%s3351_s4 + $0x60] sm:$0xff] (%p1172_p3)  ;;  %s1653_s19 = sshll.u32 (%p1172_p3), %s1650_s22, 4  ;;  %s3384_s27 = sand.u32 (%p1172_p3), 1, %s2424_s25   ;;  %s1654_s19 = int_to_ptr.hbm [resolvable:$true] %s1653_s19 }
 0x5bb   : > { %s1637_s8 = scalar_lea.sflag (%p1172_p3), [#allocation7], %s3384_s27  ;;  %s2328_s10 = sshra.s32 (%p1172_p3), %s1654_s19, 4  ;;  %s2329_s10 = int_to_ptr.hbm [resolvable:$true] %s2328_s10 }
 0x5bc   : > { %s2330_s17 = scalar_lea.hbm (%p1172_p3), %s2329_s10, 16  ;;  %s2334_s20 = scalar_lea.hbm (%p1172_p3), %s3354_s7, 32 }
 0x5bd   : > { %1605 = vmatpush.bf16.msra.mxu2 (%p1172_p3), %v2011_v38  ;;  %p2331_p5 = scmp.ne.s32.totalorder (%p1172_p3), %s2329_s10, %s2330_s17  ;;  %p2335_p9 = scmp.lt.s32.totalorder (%p1172_p3), %s2329_s10, %s3354_s7 }
 0x5be   : > { %1619 = vmatpush.bf16.msra.mxu3 (%p1172_p3), %v2019_v25  ;;  %p2336_p10 = scmp.lt.s32.totalorder (%p1172_p3), %s2334_s20, %s2330_s17 }
 0x5bf   : > { %p2332_p6 = pnand (%p1172_p3), %p2331_p5, %p2584_p4 }
 0x5c0   : > { %p2337_p11 = por (%p1172_p3), %p2336_p10, %p2335_p9 }
 0x5c1   : > { %1606 = vmatpush.bf16.msra.mxu2 (%p1172_p3), %v2010_v34  ;;  %p2333_p7 = pneg (%p1172_p3), %p2332_p6 }
 0x5c2   : > { %1620 = vmatpush.bf16.msra.mxu3 (%p1172_p3), %v2018_v23 }
 0x5c3   : > { %p2338_p12 = pnand (%p1172_p3), %p2337_p11, %p2333_p7 }
 0x5c6   : > { %1621 = vmatpush.bf16.msra.mxu3 (%p1172_p3), %v2017_v16 }
 0x634   : >> { %v1335_v17 = vpop.f32.mrf.mxu0 }
 0x635   : >> { %v1340_v57 = vadd.f32 %v2448_v50, %v1335_v17  }
 0x637   : >> { %v3383_v50 = vmov %v1340_v57  ;;  %v3188_v53 = vadd.f32 (%p1172_p3), %v1340_v57, %v2632_v0  ;;  %v1905_v0 = vld [vmem:[%s3350_s3 + $0x30] sm:$0xf] (%p1172_p3)  ;;  %v2008_v57 = vld [vmem:[%s3351_s4 + $0x18] sm:$0xff] (%p1172_p3) }
 0x638   : > { %v1906_v20 = vor.u32 (%p1172_p3), %v2004_v15, %v1905_v0  ;;  %v2013_v0 = vld [vmem:[%s3351_s4 + $0x40] sm:$0xff] (%p1172_p3) }
 0x639   : > { %v1344_v63 = vmul.f32 (%p1172_p3), %v3188_v53, %v3188_v53 }
 0x63a   : > { %1442 = vmatpush.bf16.msra.mxu0 (%p1172_p3), %v1906_v20 }
 0x63b   : > { %1174 = sbr.rel (!%p1172_p3) target bundleno = 1039 (0x40f), region = 135  ;;  %v1347_v54 = vsel (%p1172_p3), %vm339_vm0, %v1344_v63, 0.0  ;;  %v2015_v63 = vld [vmem:[%s3351_s4 + $0x50] sm:$0xff] (%p1172_p3) }
 0x63c   : >> { %v1337_v18 = vpop.f32.mrf.mxu0  ;;  %1348 = vadd.xlane.f32.xlu0 (%p1172_p3), %v1347_v54  ;;  %v2006_v54 = vld [vmem:[%s3351_s4 + $0x8] sm:$0xff] (%p1172_p3) }
 0x63d   : >> { %v1341_v52 = vadd.f32 %v2444_v7, %v1337_v18   ;;  %v2016_v18 = vld [vmem:[%s3351_s4 + $0x58] sm:$0xff] (%p1172_p3) }
 0x63e   : > { %1443 = vmatpush.bf16.msra.mxu0 (%p1172_p3), %v1898_v13  ;;  %1622 = vmatpush.bf16.msra.mxu3 (%p1172_p3), %v2016_v18 }
 0x63f   : >> { %v3382_v7 = vmov %v1341_v52  ;;  %v3193_v50 = vadd.f32 (%p1172_p3), %v1341_v52, %v2636_v2  ;;  %v2003_v2 = vld [vmem:[%s3350_s3 + $0x34] sm:$0xf] (%p1172_p3) }
 0x640   : > { %v1910_v7 = vor.u32 %v2003_v2, %v1907_v41  ;;  %v2007_v52 = vld [vmem:[%s3351_s4 + $0x10] sm:$0xff] }
 0x641   : > { %v1345_v59 = vmul.f32 %v3193_v50, %v3193_v50 }
 0x642   : > { %1456 = vmatpush.bf16.msra.mxu1 %v1910_v7  ;;  %1444 = vmatpush.bf16.msra.mxu0 %v1890_v61 }
 0x643   : > { %v1350_v56 = vsel %vm339_vm0, %v1345_v59, 0.0  ;;  %1623 = vmatpush.bf16.msra.mxu3 %v2015_v63  ;;  %v2014_v59 = vld [vmem:[%s3351_s4 + $0x48] sm:$0xff] }
 0x644   : > { %1351 = vadd.xlane.f32.xlu0 %v1350_v56  ;;  %v2005_v56 = vld [vmem:[%s3351_s4] sm:$0xff] }
 0x646   : > { %1457 = vmatpush.bf16.msra.mxu1 %v1902_v8  ;;  %1445 = vmatpush.bf16.msra.mxu0 %v1882_v30 }
 0x647   : > { %1624 = vmatpush.bf16.msra.mxu3 %v2014_v59 }
 0x64a   : > { %1458 = vmatpush.bf16.msra.mxu1 %v1894_v27 }
 0x64b   : > { %1625 = vmatpush.bf16.msra.mxu3 %v2013_v0 }
 0x64e   : > { %1459 = vmatpush.bf16.msra.mxu1 %v1886_v22 }
 0x6af   : > { %v1349_v24 = vpop.xlane.xlu0 %1348 }
 0x6b0   : > { %v1360_v31 = vmul.f32 %v1349_v24, %v2711_v37 }
 0x6b2   : > { %v1362_v5 = vadd.f32 1.1920929e-07, %v1360_v31 }
 0x6b4   : > { %2250 = vrsqrt.f32 %v1362_v5  ;;  %vm1370_vm12 = vweird.f32 %v1362_v5 }
 0x6b7   : > { %v1352_v39 = vpop.xlane.xlu0 %1351 }
 0x6b8   : > { %v1361_v55 = vmul.f32 %v1352_v39, %v2711_v37  ;;  %v2009_v37 = vld [vmem:[%s3351_s4 + $0x20] sm:$0xff] }
 0x6b9   : > { %1607 = vmatpush.bf16.msra.mxu2 %v2009_v37 }
 0x6ba   : > { %v2251_v51 = vpop.eup %2250  ;;  %v1363_v14 = vadd.f32 1.1920929e-07, %v1361_v55 }
 0x6bb   : > { %v1365_v1 = vmul.f32 %v2251_v51, %v1362_v5  ;;  %vm1371_vm10 = vweird.f32 %v2251_v51 }
 0x6bc   : > { %2252 = vrsqrt.f32 %v1363_v14  ;;  %vm1372_vm14 = vmor %vm1370_vm12, %vm1371_vm10  ;;  %vm1380_vm15 = vweird.f32 %v1363_v14 }
 0x6bd   : > { %v1366_v28 = vmul.f32 %v2251_v51, %v1365_v1  ;;  %1608 = vmatpush.bf16.msra.mxu2 %v2008_v57 }
 0x6bf   : > { %v1367_v29 = vmul.f32 0.5, %v1366_v28 }
 0x6c1   : > { %v1368_v19 = vsub.f32 1.5, %v1367_v29  ;;  %1609 = vmatpush.bf16.msra.mxu2 %v2007_v52 }
 0x6c2   : > { %v2253_v40 = vpop.eup %2252 }
 0x6c3   : > { %v1375_v11 = vmul.f32 %v2253_v40, %v1363_v14  ;;  %v1369_v26 = vmul.f32 %v2251_v51, %v1368_v19  ;;  %vm1381_vm13 = vweird.f32 %v2253_v40 }
 0x6c4   : > { %vm1382_vm1 = vmor %vm1380_vm15, %vm1381_vm13 }
 0x6c5   : > { %v1376_v35 = vmul.f32 %v2253_v40, %v1375_v11  ;;  %v1373_v47 = vsel %vm1372_vm14, %v2251_v51, %v1369_v26  ;;  %1610 = vmatpush.bf16.msra.mxu2 %v2006_v54 }
 0x6c6   : > { %v1384_v58 = vmul.f32 %v1373_v47, %v3188_v53 }
 0x6c7   : > { %v1377_v43 = vmul.f32 0.5, %v1376_v35 }
 0x6c9   : > { %v1378_v45 = vsub.f32 1.5, %v1377_v43  ;;  %1611 = vmatpush.bf16.msra.mxu2 %v2005_v56 }
 0x6cb   : > { %v1379_v44 = vmul.f32 %v2253_v40, %v1378_v45 }
 0x6cd   : > { %v1383_v48 = vsel %vm1382_vm1, %v2253_v40, %v1379_v44 }
 0x6ce   : > { %v1385_v49 = vmul.f32 %v1383_v48, %v3193_v50 }
 0x6d0   : > { %v1386_v17 = vpack.c.bf16 %v1385_v49, %v1384_v58 }
 0x6d2   : > { %1911 = vmatmul.msk.bf16.vlgmr.msra.gmra.mxu0 %vm339_vm0, %v1386_v17  ;;  %1912 = vmatmul.msk.bf16.vlgmr.msra.gmra.mxu1 %vm339_vm0, %v1386_v17 }
 0x74f   : > { %v1447_v15 = vpop.f32.mrf.mxu0  ;;  %v1461_v2 = vpop.f32.mrf.mxu1 }
 0x750   : > { %v1466_v20 = vmax.f32 %v1447_v15, 0.0  ;;  %v1467_v41 = vmax.f32 %v1461_v2, 0.0 }
 0x752   : > { %v1470_v13 = vmul.f32 %v1466_v20, %v1466_v20  ;;  %v1471_v6 = vmul.f32 %v1467_v41, %v1467_v41 }
 0x757   : > { %v1449_v7 = vpop.f32.mrf.mxu0  ;;  %v1463_v3 = vpop.f32.mrf.mxu1 }
 0x758   : > { %v1468_v4 = vmax.f32 %v1449_v7, 0.0  ;;  %v1469_v12 = vmax.f32 %v1463_v3, 0.0 }
 0x75a   : > { %v1472_v8 = vmul.f32 %v1468_v4, %v1468_v4  ;;  %v1473_v10 = vmul.f32 %v1469_v12, %v1469_v12 }
 0x75c   : > { %v1474_v62 = vpack.c.bf16 %v1472_v8, %v1470_v13  ;;  %v1475_v33 = vpack.c.bf16 %v1473_v10, %v1471_v6 }
 0x75e   : > { %1612 = vmatmul.bf16.vlgmr.msra.gmra.mxu2 %v1474_v62  ;;  %1626 = vmatmul.bf16.vlgmr.msra.gmra.mxu3 %v1475_v33 }
 0x7e1   : > { %v1613_v61 = vpop.f32.mrf.mxu2  ;;  %v1627_v46 = vpop.f32.mrf.mxu3 }
 0x7e2   : > { %v1628_v60 = vadd.f32 %v1627_v46, %v1613_v61 }
 0x7e4   : > { %v1632_v21 = vadd.f32 %v1628_v60, %v3188_v53 }
 0x7e6   : > { %1634 = vst.msk [vmem:[%s3084_s30] sm:$0xff] %vm339_vm0, %v1632_v21 }
 0x7e9   : > { %v1615_v27 = vpop.f32.mrf.mxu2  ;;  %v1629_v9 = vpop.f32.mrf.mxu3 }
 0x7ea   : > { %v1630_v42 = vadd.f32 %v1629_v9, %v1615_v27 }
 0x7ec   : > { %v1633_v30 = vadd.f32 %v1630_v42, %v3193_v50 }
 0x7ee   : > { %1635 = vst.msk [vmem:[%s3084_s30 + $0x8] sm:$0xff] %vm339_vm0, %v1633_v30 }
 0x7ef   : > { %2341 = shalt.err (!%p2338_p12)
}
 0x7f0   : > { %s2503_s30 = smov 128  }
 0x7f1   : > { %2030 = dma.vmem_to_hbm [thread:$0]  (%p2584_p4), %s1652_s21, 256, %s1654_s19, %s1637_s8, %s2503_s30, %s2503_s30, %s2495_s18  }
 0x7f2 PF: > { %p2047_p13 = scmp.ge.s32.totalorder %s2440_s29, 2  ;;  %s1668_s22 = sand.u32 1, %s2420_s24  }
 0x7f3   : > { %s1669_s27 = scalar_lea.sflag [#allocation7], %s1668_s22 }
 0x7f4   : > { %p2040_p0 = pnand %p2047_p13, %p2591_p8 }
 0x7f6   : > { %p2041_p1 = pneg %p2040_p0 }
 0x7f8   : > { %2415 = dma.done.wait (%p2041_p1), %s1669_s27, 256  }
 0x7f9   : > { %2417 = vsyncadd (%p2041_p1), %s1669_s27, 4294967040  ;;  %s22_s29 = sadd.s32 1, %s2440_s29   ;;  %s3385_s24 = smov %s2424_s25 }
 0x7fa   : > { %p19_p2 = scmp.ge.s32.totalorder %s22_s29, 4   ;;  %s3386_s25 = smov %s2428_s26 }
 0x7fb   : > { %s3387_s26 = smov %s2597_s14  ;;  %s3388_s27 = smov %s2436_s28 }
 0x7fc   : > { %s3389_s28 = smov %s3391_s9  ;;  %21 = sbr.rel (!%p19_p2) target bundleno = 6 (0x6), region = 146 }
 0x801   :  { %1675 = vsyncpa [#allocation6], 1 }
 0x802   :  { %1677 = vsyncpa [#allocation6 + $0x1], 1 }
 0x803   :  { %1678 = vsyncpa [#allocation9], 1 }
 0x804   :  { %1679 = vsyncpa [#allocation7], 1 }
 0x805   :  { %1681 = vsyncpa [#allocation7 + $0x1], 1 }

</bundles_post_ra>
